<compile_context>
chip_gen: v6e
topology: v6e:2x2x1
jax: 0.10.0
libtpu: 0.0.40
codegen_flags: <defaults>
</compile_context>

<pallas_src>
import functools

import jax
import jax.numpy as jnp
from jax.experimental import pallas as pl
from jax.experimental.pallas import tpu as pltpu


# ------------------------------------------------------------------ helpers

def _erf(x):
    # Abramowitz & Stegun 7.1.26, |err| < 1.5e-7 -> matches PyTorch's erf-based
    # F.gelu to float32 noise using only ops Mosaic lowers.
    a1, a2, a3, a4, a5 = 0.254829592, -0.284496736, 1.421413741, -1.453152027, 1.061405429
    p = 0.3275911
    s = jnp.where(x >= 0.0, 1.0, -1.0)
    ax = jnp.abs(x)
    t = 1.0 / (1.0 + p * ax)
    poly = ((((a5 * t + a4) * t + a3) * t + a2) * t + a1) * t
    return s * (1.0 - poly * jnp.exp(-ax * ax))


def _gelu(x):
    return 0.5 * x * (1.0 + _erf(x * 0.7071067811865476))


def _sigmoid(x):
    return 1.0 / (1.0 + jnp.exp(-x))


# -------------------------------------------- generic gridded matmul kernel
# n_in inputs (same M), n_out outputs.  y_o = sum_i x_i @ W_{o,i} + b_o  (+ activation).
# Rows are tiled (grid over M, "parallel"); weights/biases stay resident via constant
# index maps.  Used for: post-CNN linear, GRU input projections (both directions in one
# pass, fed by the previous layer's fwd/bwd pair without concatenation), classifier.

def _mlinear_kernel(*refs, n_in, n_out, activation):
    xs = [refs[i][...] for i in range(n_in)]
    n_wb = n_out * (n_in + 1)
    out_refs = refs[n_in + n_wb:]
    pos = n_in
    for o in range(n_out):
        w_refs = refs[pos:pos + n_in]
        b_ref = refs[pos + n_in]
        pos += n_in + 1
        acc = jnp.dot(xs[0], w_refs[0][...], preferred_element_type=jnp.float32)
        for q in range(1, n_in):
            acc = acc + jnp.dot(xs[q], w_refs[q][...],
                                preferred_element_type=jnp.float32)
        y = acc + b_ref[...]
        if activation == "gelu":
            y = _gelu(y)
        elif activation == "log_softmax":
            m = jnp.max(y, axis=-1, keepdims=True)
            e = y - m
            y = e - jnp.log(jnp.sum(jnp.exp(e), axis=-1, keepdims=True))
        out_refs[o][...] = y.astype(out_refs[o].dtype)


def mlinear(xs, weights, biases, activation="none", tile_m=256):
    """xs: list of (M, K_i); weights: list (n_out) of lists (n_in) of (K_i, N_o);
    biases: list (n_out) of (N_o,).  Returns list of (M, N_o)."""
    n_in, n_out = len(xs), len(weights)
    M = xs[0].shape[0]
    tm = min(tile_m, M)
    pad = (-M) % tm
    if pad:
        xs = [jnp.pad(x, ((0, pad), (0, 0))) for x in xs]
    Mp = M + pad

    args, in_specs = [], []
    for x in xs:
        K = x.shape[1]
        in_specs.append(pl.BlockSpec((tm, K), lambda i: (i, 0)))
        args.append(x)
    out_specs, out_shapes = [], []
    for o in range(n_out):
        N = weights[o][0].shape[1]
        for q in range(n_in):
            K = xs[q].shape[1]
            in_specs.append(pl.BlockSpec((K, N), lambda i: (0, 0)))
            args.append(weights[o][q])
        in_specs.append(pl.BlockSpec((1, N), lambda i: (0, 0)))
        args.append(biases[o].reshape(1, -1))
        out_specs.append(pl.BlockSpec((tm, N), lambda i: (i, 0)))
        out_shapes.append(jax.ShapeDtypeStruct((Mp, N), jnp.float32))

    outs = pl.pallas_call(
        functools.partial(_mlinear_kernel, n_in=n_in, n_out=n_out,
                          activation=activation),
        grid=(Mp // tm,),
        in_specs=in_specs,
        out_specs=out_specs,
        out_shape=out_shapes,
        compiler_params=pltpu.CompilerParams(dimension_semantics=("parallel",)),
    )(*args)
    if pad:
        outs = [o_[:M] for o_ in outs]
    return list(outs)


# ------------------------- fused [LN(F)+GELU] -> 3x3 conv -> [+residual] kernel
# Grid over batch ("parallel"); weights resident; 'same' padding handled in-kernel via a
# VMEM halo scratch (border re-zeroed each iteration so megacore sharding stays safe).
# im2col: the 9 taps are concatenated along the channel (lane) axis and contracted in a
# single K = 9*Cin matmul; Cin == 1 (stem) keeps the cheap broadcast-multiply path.
# The T axis is processed in chunks inside the kernel to bound the im2col intermediate.
# TODO(synk): at production T (~1000) add grid-level T tiling with halo carry so the
#             per-batch slab does not have to be VMEM-resident.

def _conv_block_kernel(*refs, do_ln, has_res, F, T, Cin, Cout, Tc):
    it = iter(refs)
    x_ref = next(it)
    g_ref = beta_ref = None
    if do_ln:
        g_ref = next(it)
        beta_ref = next(it)
    w_ref = next(it)
    b_ref = next(it)
    r_ref = next(it) if has_res else None
    o_ref = next(it)
    xp = next(it)                                   # (F+2, T+2, Cin) halo scratch

    z = x_ref[0]                                    # (F, T, Cin)
    if do_ln:
        mean = jnp.mean(z, axis=0, keepdims=True)   # LayerNorm over the F axis
        var = jnp.mean((z - mean) ** 2, axis=0, keepdims=True)
        zn = (z - mean) * jax.lax.rsqrt(var + 1e-5)
        z = _gelu(zn * g_ref[...] + beta_ref[...])

    # zero the halo border (cheap strips), write the center
    xp[0:1, :, :] = jnp.zeros((1, T + 2, Cin), jnp.float32)
    xp[F + 1:F + 2, :, :] = jnp.zeros((1, T + 2, Cin), jnp.float32)
    xp[:, 0:1, :] = jnp.zeros((F + 2, 1, Cin), jnp.float32)
    xp[:, T + 1:T + 2, :] = jnp.zeros((F + 2, 1, Cin), jnp.float32)
    xp[1:F + 1, 1:T + 1, :] = z

    w = w_ref[...]                                  # (9*Cin, Cout)
    bias = b_ref[...]                               # (1, 1, Cout)

    for ci in range(T // Tc):
        ts = ci * Tc
        if Cin == 1:
            acc = jnp.zeros((F, Tc, Cout), jnp.float32)
            for df in range(3):
                for dt in range(3):
                    tap = df * 3 + dt
                    sl = xp[df:df + F, ts + dt:ts + dt + Tc, :]       # (F, Tc, 1)
                    acc = acc + sl * w[tap:tap + 1, :].reshape(1, 1, Cout)
            y = acc + bias
        else:
            cols = jnp.concatenate(
                [xp[df:df + F, ts + dt:ts + dt + Tc, :]
                 for df in range(3) for dt in range(3)], axis=-1)     # (F, Tc, 9*Cin)
            y = jnp.dot(cols.reshape(F * Tc, 9 * Cin), w,
                        preferred_element_type=jnp.float32)
            y = y.reshape(F, Tc, Cout) + bias
        if has_res:
            y = y + r_ref[0, :, ts:ts + Tc, :]
        o_ref[0, :, ts:ts + Tc, :] = y


def conv_block(x, w, b, ln=None, residual=None, t_chunk=128):
    """x: (B, F, T, Cin); w: (3, 3, Cin, Cout); 'same' padding, stride 1."""
    B, F, T, Cin = x.shape
    Cout = w.shape[-1]
    w9 = w.reshape(9 * Cin, Cout)
    Tc = next(d for d in range(min(T, t_chunk), 0, -1) if T % d == 0)
    do_ln = ln is not None
    has_res = residual is not None

    args = [x]
    in_specs = [pl.BlockSpec((1, F, T, Cin), lambda bb: (bb, 0, 0, 0))]
    if do_ln:
        g, beta = ln
        args += [jnp.broadcast_to(g.reshape(F, 1, 1), (F, 1, Cin)),
                 jnp.broadcast_to(beta.reshape(F, 1, 1), (F, 1, Cin))]
        in_specs += [pl.BlockSpec((F, 1, Cin), lambda bb: (0, 0, 0)),
                     pl.BlockSpec((F, 1, Cin), lambda bb: (0, 0, 0))]
    args += [w9, b.reshape(1, 1, Cout)]
    in_specs += [pl.BlockSpec((9 * Cin, Cout), lambda bb: (0, 0)),
                 pl.BlockSpec((1, 1, Cout), lambda bb: (0, 0, 0))]
    if has_res:
        args += [residual]
        in_specs += [pl.BlockSpec((1, F, T, Cout), lambda bb: (bb, 0, 0, 0))]

    return pl.pallas_call(
        functools.partial(_conv_block_kernel, do_ln=do_ln, has_res=has_res,
                          F=F, T=T, Cin=Cin, Cout=Cout, Tc=Tc),
        grid=(B,),
        in_specs=in_specs,
        out_specs=pl.BlockSpec((1, F, T, Cout), lambda bb: (bb, 0, 0, 0)),
        out_shape=jax.ShapeDtypeStruct((B, F, T, Cout), jnp.float32),
        scratch_shapes=[pltpu.VMEM((F + 2, T + 2, Cin), jnp.float32)],
        compiler_params=pltpu.CompilerParams(dimension_semantics=("parallel",)),
    )(*args)


# --------------------------------------------- bidirectional GRU recurrence
# Input projections (gi = x @ W_ih + b_ih, both directions) are precomputed outside as a
# batched matmul; this kernel only runs the recurrence gh = h @ W_hh, processing k time
# steps per grid iteration.  Length masking reproduces packed-sequence semantics.

def _bigru_kernel(len_ref, gif_ref, gib_ref, whf_ref, bhf_ref, whb_ref, bhb_ref,
                  of_ref, ob_ref, hf, hb, *, k, H):
    s = pl.program_id(0)
    nT = pl.num_programs(0)

    @pl.when(s == 0)
    def _():
        hf[...] = jnp.zeros_like(hf)
        hb[...] = jnp.zeros_like(hb)

    lengths = len_ref[...]                           # (B, 1) int32
    t0 = s * k                                       # first forward time of this block
    tb0 = (nT - 1 - s) * k                           # first backward time of this block

    def gru_cell(gi, h_prev, wh_ref, bh_ref):
        gh = jnp.dot(h_prev, wh_ref[...], preferred_element_type=jnp.float32) + bh_ref[...]
        r = _sigmoid(gi[:, 0:H] + gh[:, 0:H])
        z = _sigmoid(gi[:, H:2 * H] + gh[:, H:2 * H])
        n = jnp.tanh(gi[:, 2 * H:3 * H] + r * gh[:, 2 * H:3 * H])
        return (1.0 - z) * n + z * h_prev

    for j in range(k):
        # forward direction, time t0 + j
        h_prev = hf[...]
        h_new = gru_cell(gif_ref[j], h_prev, whf_ref, bhf_ref)
        m_f = lengths > (t0 + j)
        h_cur = jnp.where(m_f, h_new, h_prev)
        hf[...] = h_cur
        of_ref[j] = jnp.where(m_f, h_cur, 0.0)

        # backward direction, time tb0 + (k-1-j)  (processed in decreasing time order)
        jj = k - 1 - j
        hb_prev = hb[...]
        hb_new = gru_cell(gib_ref[jj], hb_prev, whb_ref, bhb_ref)
        m_b = lengths > (tb0 + jj)
        hb_cur = jnp.where(m_b, hb_new, hb_prev)
        hb[...] = hb_cur
        ob_ref[jj] = jnp.where(m_b, hb_cur, 0.0)


def bigru_core(gi_f, gi_b, lengths, rp):
    """gi_f/gi_b: (T, B, 3H) precomputed input projections.  Returns (out_f, out_b)."""
    T, B, threeH = gi_f.shape
    H = threeH // 3
    k = next(d for d in (8, 4, 2, 1) if T % d == 0)
    nT = T // k
    len2d = lengths.astype(jnp.int32).reshape(B, 1)
    const2 = lambda s: (0, 0)

    out_f, out_b = pl.pallas_call(
        functools.partial(_bigru_kernel, k=k, H=H),
        grid=(nT,),
        in_specs=[
            pl.BlockSpec((B, 1), const2),
            pl.BlockSpec((k, B, 3 * H), lambda s: (s, 0, 0)),
            pl.BlockSpec((k, B, 3 * H), lambda s: (nT - 1 - s, 0, 0)),
            pl.BlockSpec((H, 3 * H), const2),
            pl.BlockSpec((1, 3 * H), const2),
            pl.BlockSpec((H, 3 * H), const2),
            pl.BlockSpec((1, 3 * H), const2),
        ],
        out_specs=[
            pl.BlockSpec((k, B, H), lambda s: (s, 0, 0)),
            pl.BlockSpec((k, B, H), lambda s: (nT - 1 - s, 0, 0)),
        ],
        out_shape=[jax.ShapeDtypeStruct((T, B, H), jnp.float32),
                   jax.ShapeDtypeStruct((T, B, H), jnp.float32)],
        scratch_shapes=[pltpu.VMEM((B, H), jnp.float32),
                        pltpu.VMEM((B, H), jnp.float32)],
        compiler_params=pltpu.CompilerParams(dimension_semantics=("arbitrary",)),
    )(len2d, gi_f, gi_b,
      rp["whh_f"], rp["bhh_f"].reshape(1, -1),
      rp["whh_b"], rp["bhh_b"].reshape(1, -1))
    return out_f, out_b


# --------------------------------------------------------------- model glue

def asr_forward(params, x_nchw, lengths):
    B = x_nchw.shape[0]
    F = x_nchw.shape[2]
    T = x_nchw.shape[3]
    # NCHW (B,1,F,T) -> channels-last (B,F,T,1): pure reshape (the size-1 axis moves).
    x = x_nchw.reshape(B, F, T, 1)

    out = conv_block(x, params["cnn_w"], params["cnn_b"])            # (B, F, T, 32)
    for rp in params["residual"]:
        h1 = conv_block(out, rp["w1"], rp["b1"], ln=(rp["g1"], rp["beta1"]))
        out = conv_block(h1, rp["w2"], rp["b2"], ln=(rp["g2"], rp["beta2"]),
                         residual=out)

    C = out.shape[-1]
    # PyTorch: view(B, C*F, T).permute(2, 0, 1) -> (T, B, C*F), flat index c*F + f
    feats = jnp.transpose(out, (2, 0, 3, 1)).reshape(T * B, C * F)

    H = params["lin_w"].shape[1]
    h0 = mlinear([feats], [[params["lin_w"]]], [params["lin_b"]])[0]  # (T*B, H)

    out_f = out_b = None
    for i, rp in enumerate(params["rnn"]):
        # RecurrentBlock: LN/GELU result is discarded in the reference; GRU on raw input.
        if i == 0:
            gi_f2, gi_b2 = mlinear(
                [h0],
                [[rp["wih_f"]], [rp["wih_b"]]],
                [rp["bih_f"], rp["bih_b"]])
        else:
            xf2 = out_f.reshape(T * B, H)
            xb2 = out_b.reshape(T * B, H)
            gi_f2, gi_b2 = mlinear(
                [xf2, xb2],
                [[rp["wih_f"][:H], rp["wih_f"][H:]],
                 [rp["wih_b"][:H], rp["wih_b"][H:]]],
                [rp["bih_f"], rp["bih_b"]])
        gi_f = gi_f2.reshape(T, B, 3 * H)
        gi_b = gi_b2.reshape(T, B, 3 * H)
        out_f, out_b = bigru_core(gi_f, gi_b, lengths, rp)

    # classifier consumes the (fwd, bwd) pair directly -> no (T,B,2H) concatenate.
    xf2 = out_f.reshape(T * B, H)
    xb2 = out_b.reshape(T * B, H)
    w1 = params["cls_w1"]                                            # (2H, H)
    y = mlinear([xf2, xb2], [[w1[:H], w1[H:]]], [params["cls_b1"]],
                activation="gelu")[0]
    y = mlinear([y], [[params["cls_w2"]]], [params["cls_b2"]],
                activation="log_softmax")[0]
    n_classes = params["cls_w2"].shape[1]
    return y.reshape(T, B, n_classes)


def init_params(key, n_residual_layers, n_rnn_layers, rnn_hidden_size,
                n_classes, n_features):
    C = 32
    F, H = n_features, rnn_hidden_size
    keys = iter(jax.random.split(key, 512))

    def nrm(shape, scale=0.1):
        return (scale * jax.random.normal(next(keys), shape)).astype(jnp.float32)

    params = {
        "cnn_w": nrm((3, 3, 1, C)),
        "cnn_b": nrm((C,)),
        "residual": [],
        "rnn": [],
    }
    for _ in range(n_residual_layers):
        params["residual"].append({
            "g1": 1.0 + nrm((F,), 0.05), "beta1": nrm((F,), 0.05),
            "w1": nrm((3, 3, C, C)), "b1": nrm((C,)),
            "g2": 1.0 + nrm((F,), 0.05), "beta2": nrm((F,), 0.05),
            "w2": nrm((3, 3, C, C)), "b2": nrm((C,)),
        })
    params["lin_w"] = nrm((F * C, H))
    params["lin_b"] = nrm((H,))
    for i in range(n_rnn_layers):
        D = H if i == 0 else 2 * H
        params["rnn"].append({
            "wih_f": nrm((D, 3 * H)), "whh_f": nrm((H, 3 * H)),
            "bih_f": nrm((3 * H,)), "bhh_f": nrm((3 * H,)),
            "wih_b": nrm((D, 3 * H)), "whh_b": nrm((H, 3 * H)),
            "bih_b": nrm((3 * H,)), "bhh_b": nrm((3 * H,)),
        })
    params["cls_w1"] = nrm((2 * H, H))
    params["cls_b1"] = nrm((H,))
    params["cls_w2"] = nrm((H, n_classes))
    params["cls_b2"] = nrm((n_classes,))
    return params


if __name__ == "__main__":
    B, F, T = 2, 16, 16
    H, n_classes = 32, 16
    n_residual_layers, n_rnn_layers = 1, 2

    key = jax.random.PRNGKey(0)
    pkey, xkey = jax.random.split(key)
    params = init_params(pkey, n_residual_layers, n_rnn_layers, H, n_classes, F)

    x = jax.random.normal(xkey, (B, 1, F, T), dtype=jnp.float32)
    # lengths sorted descending with max == T (pack_padded_sequence semantics)
    lengths = jnp.array([T, 12], dtype=jnp.int32)

    out = asr_forward(params, x, lengths)
    out = jax.block_until_ready(out)
    assert out.shape == (T, B, n_classes), out.shape
    assert bool(jnp.isfinite(out).all())
    print("KERNEL_OK")
</pallas_src>

<mosaic_0001>
module attributes {stable_mosaic.version = 11 : i64} {
  func.func @_conv_block_kernel(%arg0: i32, %arg1: memref<1x16x16x1xf32, #tpu.memory_space<vmem>>, %arg2: memref<9x32xf32, #tpu.memory_space<vmem>>, %arg3: memref<1x1x32xf32, #tpu.memory_space<vmem>>, %arg4: memref<1x16x16x32xf32, #tpu.memory_space<vmem>>, %arg5: memref<18x18x1xf32, #tpu.memory_space<vmem>>) attributes {dimension_semantics = [#tpu.dimension_semantics<parallel>], iteration_bounds = array<i64: 2>, scalar_prefetch = 0 : i64, scratch_operands = 1 : i64, tpu.core_type = #tpu.core_type<tc>, window_params = [{transform_indices = @transform_0, window_bounds = array<i64: 1, 16, 16, 1>}, {pipeline_mode = #tpu.pipeline_mode<synchronous>, transform_indices = @transform_1, window_bounds = array<i64: 9, 32>}, {pipeline_mode = #tpu.pipeline_mode<synchronous>, transform_indices = @transform_2, window_bounds = array<i64: 1, 1, 32>}, {transform_indices = @transform_3, window_bounds = array<i64: 1, 16, 16, 32>}]} {
    %c0 = arith.constant 0 : index
    %c0_0 = arith.constant 0 : index
    %c0_1 = arith.constant 0 : index
    %c0_2 = arith.constant 0 : index
    %0 = vector.load %arg1[%c0, %c0_0, %c0_1, %c0_2] : memref<1x16x16x1xf32, #tpu.memory_space<vmem>>, vector<1x16x16x1xf32>
    %1 = vector.shape_cast %0 : vector<1x16x16x1xf32> to vector<16x16x1xf32>
    %cst = arith.constant 0.000000e+00 : f32
    %2 = vector.broadcast %cst : f32 to vector<1x18x1xf32>
    %c0_3 = arith.constant 0 : index
    %c0_4 = arith.constant 0 : index
    %c0_5 = arith.constant 0 : index
    %3 = vector.load %arg5[%c0_3, %c0_4, %c0_5] : memref<18x18x1xf32, #tpu.memory_space<vmem>>, vector<1x18x1xf32>
    tpu.vector_store %arg5[%c0_3, %c0_4, %c0_5], %2 {strides = array<i32>} : memref<18x18x1xf32, #tpu.memory_space<vmem>>, vector<1x18x1xf32>,
    %cst_6 = arith.constant 0.000000e+00 : f32
    %4 = vector.broadcast %cst_6 : f32 to vector<1x18x1xf32>
    %c17 = arith.constant 17 : index
    %c0_7 = arith.constant 0 : index
    %c0_8 = arith.constant 0 : index
    %5 = vector.load %arg5[%c17, %c0_7, %c0_8] : memref<18x18x1xf32, #tpu.memory_space<vmem>>, vector<1x18x1xf32>
    tpu.vector_store %arg5[%c17, %c0_7, %c0_8], %4 {strides = array<i32>} : memref<18x18x1xf32, #tpu.memory_space<vmem>>, vector<1x18x1xf32>,
    %cst_9 = arith.constant 0.000000e+00 : f32
    %6 = vector.broadcast %cst_9 : f32 to vector<18x1x1xf32>
    %c0_10 = arith.constant 0 : index
    %c0_11 = arith.constant 0 : index
    %c0_12 = arith.constant 0 : index
    %7 = vector.load %arg5[%c0_10, %c0_11, %c0_12] : memref<18x18x1xf32, #tpu.memory_space<vmem>>, vector<18x1x1xf32>
    tpu.vector_store %arg5[%c0_10, %c0_11, %c0_12], %6 {strides = array<i32>} : memref<18x18x1xf32, #tpu.memory_space<vmem>>, vector<18x1x1xf32>,
    %cst_13 = arith.constant 0.000000e+00 : f32
    %8 = vector.broadcast %cst_13 : f32 to vector<18x1x1xf32>
    %c0_14 = arith.constant 0 : index
    %c17_15 = arith.constant 17 : index
    %c0_16 = arith.constant 0 : index
    %9 = vector.load %arg5[%c0_14, %c17_15, %c0_16] : memref<18x18x1xf32, #tpu.memory_space<vmem>>, vector<18x1x1xf32>
    tpu.vector_store %arg5[%c0_14, %c17_15, %c0_16], %8 {strides = array<i32>} : memref<18x18x1xf32, #tpu.memory_space<vmem>>, vector<18x1x1xf32>,
    %c1 = arith.constant 1 : index
    %c1_17 = arith.constant 1 : index
    %c0_18 = arith.constant 0 : index
    %10 = vector.load %arg5[%c1, %c1_17, %c0_18] : memref<18x18x1xf32, #tpu.memory_space<vmem>>, vector<16x16x1xf32>
    tpu.vector_store %arg5[%c1, %c1_17, %c0_18], %1 {strides = array<i32>} : memref<18x18x1xf32, #tpu.memory_space<vmem>>, vector<16x16x1xf32>,
    %c0_19 = arith.constant 0 : index
    %c0_20 = arith.constant 0 : index
    %11 = vector.load %arg2[%c0_19, %c0_20] : memref<9x32xf32, #tpu.memory_space<vmem>>, vector<9x32xf32>
    %c0_21 = arith.constant 0 : index
    %c0_22 = arith.constant 0 : index
    %c0_23 = arith.constant 0 : index
    %12 = vector.load %arg3[%c0_21, %c0_22, %c0_23] : memref<1x1x32xf32, #tpu.memory_space<vmem>>, vector<1x1x32xf32>
    %cst_24 = arith.constant 0.000000e+00 : f32
    %13 = vector.broadcast %cst_24 : f32 to vector<16x16x32xf32>
    %c0_25 = arith.constant 0 : index
    %c0_26 = arith.constant 0 : index
    %c0_27 = arith.constant 0 : index
    %14 = vector.load %arg5[%c0_25, %c0_26, %c0_27] : memref<18x18x1xf32, #tpu.memory_space<vmem>>, vector<16x16x1xf32>
    %15 = vector.extract_strided_slice %11 {offsets = [0, 0], sizes = [1, 32], strides = [1, 1]} : vector<9x32xf32> to vector<1x32xf32>
    %16 = vector.shape_cast %15 : vector<1x32xf32> to vector<1x1x32xf32>
    %17 = vector.broadcast %14 : vector<16x16x1xf32> to vector<16x16x32xf32>
    %18 = vector.broadcast %16 : vector<1x1x32xf32> to vector<16x16x32xf32>
    %19 = arith.mulf %17, %18 : vector<16x16x32xf32>
    %20 = arith.addf %13, %19 : vector<16x16x32xf32>
    %c0_28 = arith.constant 0 : index
    %c1_29 = arith.constant 1 : index
    %c0_30 = arith.constant 0 : index
    %21 = vector.load %arg5[%c0_28, %c1_29, %c0_30] : memref<18x18x1xf32, #tpu.memory_space<vmem>>, vector<16x16x1xf32>
    %22 = vector.extract_strided_slice %11 {offsets = [1, 0], sizes = [1, 32], strides = [1, 1]} : vector<9x32xf32> to vector<1x32xf32>
    %23 = vector.shape_cast %22 : vector<1x32xf32> to vector<1x1x32xf32>
    %24 = vector.broadcast %21 : vector<16x16x1xf32> to vector<16x16x32xf32>
    %25 = vector.broadcast %23 : vector<1x1x32xf32> to vector<16x16x32xf32>
    %26 = arith.mulf %24, %25 : vector<16x16x32xf32>
    %27 = arith.addf %20, %26 : vector<16x16x32xf32>
    %c0_31 = arith.constant 0 : index
    %c2 = arith.constant 2 : index
    %c0_32 = arith.constant 0 : index
    %28 = vector.load %arg5[%c0_31, %c2, %c0_32] : memref<18x18x1xf32, #tpu.memory_space<vmem>>, vector<16x16x1xf32>
    %29 = vector.extract_strided_slice %11 {offsets = [2, 0], sizes = [1, 32], strides = [1, 1]} : vector<9x32xf32> to vector<1x32xf32>
    %30 = vector.shape_cast %29 : vector<1x32xf32> to vector<1x1x32xf32>
    %31 = vector.broadcast %28 : vector<16x16x1xf32> to vector<16x16x32xf32>
    %32 = vector.broadcast %30 : vector<1x1x32xf32> to vector<16x16x32xf32>
    %33 = arith.mulf %31, %32 : vector<16x16x32xf32>
    %34 = arith.addf %27, %33 : vector<16x16x32xf32>
    %c1_33 = arith.constant 1 : index
    %c0_34 = arith.constant 0 : index
    %c0_35 = arith.constant 0 : index
    %35 = vector.load %arg5[%c1_33, %c0_34, %c0_35] : memref<18x18x1xf32, #tpu.memory_space<vmem>>, vector<16x16x1xf32>
    %36 = vector.extract_strided_slice %11 {offsets = [3, 0], sizes = [1, 32], strides = [1, 1]} : vector<9x32xf32> to vector<1x32xf32>
    %37 = vector.shape_cast %36 : vector<1x32xf32> to vector<1x1x32xf32>
    %38 = vector.broadcast %35 : vector<16x16x1xf32> to vector<16x16x32xf32>
    %39 = vector.broadcast %37 : vector<1x1x32xf32> to vector<16x16x32xf32>
    %40 = arith.mulf %38, %39 : vector<16x16x32xf32>
    %41 = arith.addf %34, %40 : vector<16x16x32xf32>
    %c1_36 = arith.constant 1 : index
    %c1_37 = arith.constant 1 : index
    %c0_38 = arith.constant 0 : index
    %42 = vector.load %arg5[%c1_36, %c1_37, %c0_38] : memref<18x18x1xf32, #tpu.memory_space<vmem>>, vector<16x16x1xf32>
    %43 = vector.extract_strided_slice %11 {offsets = [4, 0], sizes = [1, 32], strides = [1, 1]} : vector<9x32xf32> to vector<1x32xf32>
    %44 = vector.shape_cast %43 : vector<1x32xf32> to vector<1x1x32xf32>
    %45 = vector.broadcast %42 : vector<16x16x1xf32> to vector<16x16x32xf32>
    %46 = vector.broadcast %44 : vector<1x1x32xf32> to vector<16x16x32xf32>
    %47 = arith.mulf %45, %46 : vector<16x16x32xf32>
    %48 = arith.addf %41, %47 : vector<16x16x32xf32>
    %c1_39 = arith.constant 1 : index
    %c2_40 = arith.constant 2 : index
    %c0_41 = arith.constant 0 : index
    %49 = vector.load %arg5[%c1_39, %c2_40, %c0_41] : memref<18x18x1xf32, #tpu.memory_space<vmem>>, vector<16x16x1xf32>
    %50 = vector.extract_strided_slice %11 {offsets = [5, 0], sizes = [1, 32], strides = [1, 1]} : vector<9x32xf32> to vector<1x32xf32>
    %51 = vector.shape_cast %50 : vector<1x32xf32> to vector<1x1x32xf32>
    %52 = vector.broadcast %49 : vector<16x16x1xf32> to vector<16x16x32xf32>
    %53 = vector.broadcast %51 : vector<1x1x32xf32> to vector<16x16x32xf32>
    %54 = arith.mulf %52, %53 : vector<16x16x32xf32>
    %55 = arith.addf %48, %54 : vector<16x16x32xf32>
    %c2_42 = arith.constant 2 : index
    %c0_43 = arith.constant 0 : index
    %c0_44 = arith.constant 0 : index
    %56 = vector.load %arg5[%c2_42, %c0_43, %c0_44] : memref<18x18x1xf32, #tpu.memory_space<vmem>>, vector<16x16x1xf32>
    %57 = vector.extract_strided_slice %11 {offsets = [6, 0], sizes = [1, 32], strides = [1, 1]} : vector<9x32xf32> to vector<1x32xf32>
    %58 = vector.shape_cast %57 : vector<1x32xf32> to vector<1x1x32xf32>
    %59 = vector.broadcast %56 : vector<16x16x1xf32> to vector<16x16x32xf32>
    %60 = vector.broadcast %58 : vector<1x1x32xf32> to vector<16x16x32xf32>
    %61 = arith.mulf %59, %60 : vector<16x16x32xf32>
    %62 = arith.addf %55, %61 : vector<16x16x32xf32>
    %c2_45 = arith.constant 2 : index
    %c1_46 = arith.constant 1 : index
    %c0_47 = arith.constant 0 : index
    %63 = vector.load %arg5[%c2_45, %c1_46, %c0_47] : memref<18x18x1xf32, #tpu.memory_space<vmem>>, vector<16x16x1xf32>
    %64 = vector.extract_strided_slice %11 {offsets = [7, 0], sizes = [1, 32], strides = [1, 1]} : vector<9x32xf32> to vector<1x32xf32>
    %65 = vector.shape_cast %64 : vector<1x32xf32> to vector<1x1x32xf32>
    %66 = vector.broadcast %63 : vector<16x16x1xf32> to vector<16x16x32xf32>
    %67 = vector.broadcast %65 : vector<1x1x32xf32> to vector<16x16x32xf32>
    %68 = arith.mulf %66, %67 : vector<16x16x32xf32>
    %69 = arith.addf %62, %68 : vector<16x16x32xf32>
    %c2_48 = arith.constant 2 : index
    %c2_49 = arith.constant 2 : index
    %c0_50 = arith.constant 0 : index
    %70 = vector.load %arg5[%c2_48, %c2_49, %c0_50] : memref<18x18x1xf32, #tpu.memory_space<vmem>>, vector<16x16x1xf32>
    %71 = vector.extract_strided_slice %11 {offsets = [8, 0], sizes = [1, 32], strides = [1, 1]} : vector<9x32xf32> to vector<1x32xf32>
    %72 = vector.shape_cast %71 : vector<1x32xf32> to vector<1x1x32xf32>
    %73 = vector.broadcast %70 : vector<16x16x1xf32> to vector<16x16x32xf32>
    %74 = vector.broadcast %72 : vector<1x1x32xf32> to vector<16x16x32xf32>
    %75 = arith.mulf %73, %74 : vector<16x16x32xf32>
    %76 = arith.addf %69, %75 : vector<16x16x32xf32>
    %77 = vector.broadcast %12 : vector<1x1x32xf32> to vector<16x16x32xf32>
    %78 = arith.addf %76, %77 : vector<16x16x32xf32>
    %c0_51 = arith.constant 0 : index
    %c0_52 = arith.constant 0 : index
    %c0_53 = arith.constant 0 : index
    %c0_54 = arith.constant 0 : index
    %79 = vector.load %arg4[%c0_51, %c0_52, %c0_53, %c0_54] : memref<1x16x16x32xf32, #tpu.memory_space<vmem>>, vector<1x16x16x32xf32>
    %80 = vector.shape_cast %79 : vector<1x16x16x32xf32> to vector<16x16x32xf32>
    %81 = vector.shape_cast %78 : vector<16x16x32xf32> to vector<1x16x16x32xf32>
    tpu.vector_store %arg4[%c0_51, %c0_52, %c0_53, %c0_54], %81 {strides = array<i32>} : memref<1x16x16x32xf32, #tpu.memory_space<vmem>>, vector<1x16x16x32xf32>,
    return
  }
  func.func @transform_0(%arg0: i32) -> (i32, i32, i32, i32) {
    %c0_i32 = arith.constant 0 : i32
    %c0_i32_0 = arith.constant 0 : i32
    %c0_i32_1 = arith.constant 0 : i32
    %c0_i32_2 = arith.constant 0 : i32
    return %arg0, %c0_i32, %c0_i32_0, %c0_i32_1 : i32, i32, i32, i32
  }
  func.func @transform_1(%arg0: i32) -> (i32, i32) {
    %c0_i32 = arith.constant 0 : i32
    %c0_i32_0 = arith.constant 0 : i32
    %c0_i32_1 = arith.constant 0 : i32
    return %c0_i32, %c0_i32_0 : i32, i32
  }
  func.func @transform_2(%arg0: i32) -> (i32, i32, i32) {
    %c0_i32 = arith.constant 0 : i32
    %c0_i32_0 = arith.constant 0 : i32
    %c0_i32_1 = arith.constant 0 : i32
    %c0_i32_2 = arith.constant 0 : i32
    return %c0_i32, %c0_i32_0, %c0_i32_1 : i32, i32, i32
  }
  func.func @transform_3(%arg0: i32) -> (i32, i32, i32, i32) {
    %c0_i32 = arith.constant 0 : i32
    %c0_i32_0 = arith.constant 0 : i32
    %c0_i32_1 = arith.constant 0 : i32
    %c0_i32_2 = arith.constant 0 : i32
    return %arg0, %c0_i32, %c0_i32_0, %c0_i32_1 : i32, i32, i32, i32
  }
}

</mosaic_0001>

<bundles_post_ra>
// kernel: tpu_custom_call.1
= control target key start
LH: loop header
LB: loop body
LE: loop exit
PB: predicated region body
PF: predicated region fallthrough
CT: control target
= control target key end

     0   :  { %8 = vsyncpa [#allocation4], 0  ;;  %s5219_s0 = inlined_call_operand.vmem [shape: f32[2,16,16,1], index: 0, kind: input, shape index: {}]   ;;  %s5220_s1 = inlined_call_operand.vmem [shape: f32[9,32], index: 1, kind: input, shape index: {}]   ;;  %s5221_s2 = inlined_call_operand.vmem [shape: f32[1,1,32], index: 2, kind: input, shape index: {}]   ;;  %s5222_s3 = inlined_call_operand.hbm [shape: f32[2,16,16,32], index: 3, kind: output, shape index: {}]  }
   0x1   :  { %10 = vsyncpa [#allocation4 + $0x1], 0  ;;  %s2919_s12 = smov 0   ;;  %s2921_s13 = smov 0  }
   0x2   :  { %s2923_s14 = smov 0   ;;  %s2925_s15 = smov 0  }
   0x3 LB: > { %s2940_s16 = sadd.s32 4294967295, %s2892_s15   ;;  %s2771_s17 = sadd.s32 4294967294, %s2892_s15   ;;  %s2892_s15 = sphi %s2925_s15, %s5792_s15   ;;  %s2888_s14 = sphi %s2923_s14, %s5791_s14   ;;  %s2884_s13 = sphi %s2921_s13, %s5790_s13   ;;  %s2880_s12 = sphi %s2919_s12, %s5789_s12  }
   0x4   : > { %s2944_s18 = sadd.s32 1, %s2892_s15   ;;  %s91_s19 = sadd.s32 1, %s2888_s14 }
   0x5   : > { %s88_s20 = ssub.s32 %s2892_s15, %s2944_s18  ;;  %p101_p0 = scmp.ne.s32.totalorder %s2888_s14, %s2884_s13 }
   0x6   : > { %p89_p1 = scmp.eq.s32.totalorder %s88_s20, 0  ;;  %p102_p2 = scmp.eq.s32.totalorder %s2940_s16, 1 }
   0x7   : > { %p107_p3 = scmp.ne.s32.totalorder %s2884_s13, %s2880_s12  ;;  %p108_p4 = scmp.eq.s32.totalorder %s2771_s17, 1 }
   0x8   : > { %s2955_s21 = scalar_select %p89_p1, %s2888_s14, %s91_s19  }
   0x9   : > { %p2957_p5 = por %p102_p2, %p101_p0  ;;  %p2961_p6 = por %p108_p4, %p107_p3 }
   0xa   : > { %p2774_p7 = scmp.ge.s32.totalorder %s2892_s15, 1  ;;  %p140_p8 = scmp.lt.s32.totalorder %s2892_s15, 3 }
   0xc   : > { %p141_p9 = pnand %p2774_p7, %p140_p8 }
   0xe   : > { %144 = sbr.rel (%p141_p9) target bundleno = 768 (0x300), region = 32 }
  0x13   : > { %vm201_vm0 = vcmask 7168   ;;  %vm210_vm1 = vcmask 0   ;;  %p164_p10 = scmp.lt.s32.totalorder %s2940_s16, 1  ;;  %v2894_v0 = vmov 0   ;;  %v2895_v1 = vmov 0.0   ;;  %s161_s6 = sand.u32 1, %s2884_s13  }
  0x14   : > { %2830 = vset.pattern.permute.xlu0 %v2894_v0  ;;  %203 = vst.msk [vmem:[#allocation2 + $0x8] sm:$0xff] %vm201_vm0, %v2895_v1  ;;  %202 = vst.msk [vmem:[#allocation2] sm:$0xff] %vm201_vm0, %v2895_v1  ;;  %2831 = vset.pattern.permute.xlu1 %v2894_v0  ;;  %vm204_vm2 = vcmask 1024   ;;  %s2775_s7 = sshll.u32 %s161_s6, 8  ;;  %vm2662_vm3 = vcmask 261120   ;;  %s2786_s11 = sshll.u32 %s2940_s16, 12 }
  0x15   : > { %207 = vst.msk [vmem:[#allocation2 + $0x198] sm:$0xff] %vm201_vm0, %v2895_v1  ;;  %208 = vst.msk [vmem:[#allocation2 + $0x1a0] sm:$0xff] %vm201_vm0, %v2895_v1  ;;  %s165_s24 = scalar_select %p164_p10, %s2940_s16, 1 }
  0x16   : > { %212 = vst.msk [vmem:[#allocation2 + $0x18] sm:$0x1] %vm210_vm1, %v2895_v1  ;;  %213 = vst.msk [vmem:[#allocation2 + $0x30] sm:$0x1] %vm210_vm1, %v2895_v1  ;;  %s4868_s10 = scalar_lea.vmem [#allocation3], %s2775_s7  ;;  %s5179_s16 = scalar_lea.sflag [#allocation4], %s161_s6 }
  0x17   : > { %214 = vst.msk [vmem:[#allocation2 + $0x48] sm:$0x1] %vm210_vm1, %v2895_v1  ;;  %215 = vst.msk [vmem:[#allocation2 + $0x60] sm:$0x1] %vm210_vm1, %v2895_v1  ;;  %s2785_s25 = sshll.u32 %s165_s24, 8  ;;  %s2709_s17 = sshll.u32 %s4868_s10, 4  ;;  %s5172_s17 = int_to_ptr.vmem [resolvable:$true] %s2709_s17 }
  0x18   : > { %216 = vst.msk [vmem:[#allocation2 + $0x78] sm:$0x1] %vm210_vm1, %v2895_v1  ;;  %217 = vst.msk [vmem:[#allocation2 + $0x90] sm:$0x1] %vm210_vm1, %v2895_v1  ;;  %s3014_s28 = scalar_lea.vmem %s5219_s0, %s2785_s25  ;;  %s5170_s24 = scalar_lea.hbm %s5222_s3, %s2786_s11 }
  0x19   : > { %218 = vst.msk [vmem:[#allocation2 + $0xa8] sm:$0x1] %vm210_vm1, %v2895_v1  ;;  %219 = vst.msk [vmem:[#allocation2 + $0xc0] sm:$0x1] %vm210_vm1, %v2895_v1  ;;  %v169_v2 = vld [vmem:[%s3014_s28] sm:$0xff]  ;;  %v171_v3 = vld [vmem:[%s3014_s28 + $0x10] sm:$0xff] }
  0x1a   : > { %220 = vst.msk [vmem:[#allocation2 + $0xd8] sm:$0x1] %vm210_vm1, %v2895_v1  ;;  %221 = vst.msk [vmem:[#allocation2 + $0xf0] sm:$0x1] %vm210_vm1, %v2895_v1  ;;  %v170_v4 = vld [vmem:[%s3014_s28 + $0x8] sm:$0xff]  ;;  %v173_v5 = vld [vmem:[%s3014_s28 + $0x20] sm:$0xff] }
  0x1b   : > { %222 = vst.msk [vmem:[#allocation2 + $0x108] sm:$0x1] %vm210_vm1, %v2895_v1  ;;  %223 = vst.msk [vmem:[#allocation2 + $0x120] sm:$0x1] %vm210_vm1, %v2895_v1  ;;  %v172_v6 = vld [vmem:[%s3014_s28 + $0x18] sm:$0xff]  ;;  %v175_v7 = vld [vmem:[%s3014_s28 + $0x30] sm:$0xff] }
  0x1c   : > { %224 = vst.msk [vmem:[#allocation2 + $0x138] sm:$0x1] %vm210_vm1, %v2895_v1  ;;  %225 = vst.msk [vmem:[#allocation2 + $0x150] sm:$0x1] %vm210_vm1, %v2895_v1  ;;  %v284_v8 = vld [vmem:[#allocation2 + $0x8] sm:$0xff]  ;;  %v177_v10 = vld [vmem:[%s3014_s28 + $0x40] sm:$0xff] }
  0x1d   : > { %226 = vst.msk [vmem:[#allocation2 + $0x168] sm:$0x1] %vm210_vm1, %v2895_v1  ;;  %227 = vst.msk [vmem:[#allocation2 + $0x180] sm:$0x1] %vm210_vm1, %v2895_v1  ;;  %v174_v9 = vld [vmem:[%s3014_s28 + $0x28] sm:$0xff]  ;;  %322 = vperm.xlu0 %2830, %v284_v8   ;;  %v176_v12 = vld [vmem:[%s3014_s28 + $0x38] sm:$0xff] }
  0x1e   : > { %230 = vst.msk [vmem:[#allocation2 + $0x29] sm:$0x1] %vm210_vm1, %v2895_v1  ;;  %231 = vst.msk [vmem:[#allocation2 + $0x41] sm:$0x1] %vm210_vm1, %v2895_v1  ;;  %v179_v13 = vld [vmem:[%s3014_s28 + $0x50] sm:$0xff]  ;;  %v178_v14 = vld [vmem:[%s3014_s28 + $0x48] sm:$0xff] }
  0x1f   : > { %232 = vst.msk [vmem:[#allocation2 + $0x59] sm:$0x1] %vm210_vm1, %v2895_v1  ;;  %233 = vst.msk [vmem:[#allocation2 + $0x71] sm:$0x1] %vm210_vm1, %v2895_v1  ;;  %v181_v15 = vld [vmem:[%s3014_s28 + $0x60] sm:$0xff]  ;;  %v180_v16 = vld [vmem:[%s3014_s28 + $0x58] sm:$0xff] }
  0x20   : > { %234 = vst.msk [vmem:[#allocation2 + $0x89] sm:$0x1] %vm210_vm1, %v2895_v1  ;;  %235 = vst.msk [vmem:[#allocation2 + $0xa1] sm:$0x1] %vm210_vm1, %v2895_v1  ;;  %v183_v17 = vld [vmem:[%s3014_s28 + $0x70] sm:$0xff]  ;;  %v182_v18 = vld [vmem:[%s3014_s28 + $0x68] sm:$0xff] }
  0x21   : > { %236 = vst.msk [vmem:[#allocation2 + $0xb9] sm:$0x1] %vm210_vm1, %v2895_v1  ;;  %237 = vst.msk [vmem:[#allocation2 + $0xd1] sm:$0x1] %vm210_vm1, %v2895_v1  ;;  %v185_v19 = vld [vmem:[%s3014_s28 + $0x80] sm:$0xff]  ;;  %v184_v20 = vld [vmem:[%s3014_s28 + $0x78] sm:$0xff] }
  0x22   : > { %238 = vst.msk [vmem:[#allocation2 + $0xe9] sm:$0x1] %vm210_vm1, %v2895_v1  ;;  %239 = vst.msk [vmem:[#allocation2 + $0x101] sm:$0x1] %vm210_vm1, %v2895_v1  ;;  %v187_v21 = vld [vmem:[%s3014_s28 + $0x90] sm:$0xff]  ;;  %v186_v22 = vld [vmem:[%s3014_s28 + $0x88] sm:$0xff] }
  0x23   : > { %240 = vst.msk [vmem:[#allocation2 + $0x119] sm:$0x1] %vm210_vm1, %v2895_v1  ;;  %241 = vst.msk [vmem:[#allocation2 + $0x131] sm:$0x1] %vm210_vm1, %v2895_v1  ;;  %v189_v23 = vld [vmem:[%s3014_s28 + $0xa0] sm:$0xff]  ;;  %v188_v24 = vld [vmem:[%s3014_s28 + $0x98] sm:$0xff] }
  0x24   : > { %242 = vst.msk [vmem:[#allocation2 + $0x149] sm:$0x1] %vm210_vm1, %v2895_v1  ;;  %243 = vst.msk [vmem:[#allocation2 + $0x161] sm:$0x1] %vm210_vm1, %v2895_v1  ;;  %v191_v25 = vld [vmem:[%s3014_s28 + $0xb0] sm:$0xff]  ;;  %v190_v29 = vld [vmem:[%s3014_s28 + $0xa8] sm:$0xff] }
  0x25   : > { %244 = vst.msk [vmem:[#allocation2 + $0x179] sm:$0x1] %vm210_vm1, %v2895_v1  ;;  %245 = vst.msk [vmem:[#allocation2 + $0x191] sm:$0x1] %vm210_vm1, %v2895_v1  ;;  %v193_v30 = vld [vmem:[%s3014_s28 + $0xc0] sm:$0xff]  ;;  %v192_v34 = vld [vmem:[%s3014_s28 + $0xb8] sm:$0xff] }
  0x26   : > { %211 = vst.msk [vmem:[#allocation2] sm:$0x1] %vm210_vm1, %v2895_v1  ;;  %228 = vst.msk [vmem:[#allocation2 + $0x198] sm:$0x1] %vm210_vm1, %v2895_v1  ;;  %v195_v35 = vld [vmem:[%s3014_s28 + $0xd0] sm:$0xff]  ;;  %v194_v36 = vld [vmem:[%s3014_s28 + $0xc8] sm:$0xff] }
  0x27   : > { %205 = vst.msk [vmem:[#allocation2 + $0x10] sm:$0x3] %vm204_vm2, %v2895_v1  ;;  %209 = vst.msk [vmem:[#allocation2 + $0x1a8] sm:$0x3] %vm204_vm2, %v2895_v1  ;;  %v197_v37 = vld [vmem:[%s3014_s28 + $0xe0] sm:$0xff]  ;;  %v196_v38 = vld [vmem:[%s3014_s28 + $0xd8] sm:$0xff] }
  0x28   : > { %229 = vst.msk [vmem:[#allocation2 + $0x11] sm:$0x1] %vm210_vm1, %v2895_v1  ;;  %246 = vst.msk [vmem:[#allocation2 + $0x1a9] sm:$0x1] %vm210_vm1, %v2895_v1  ;;  %v198_v40 = vld [vmem:[%s3014_s28 + $0xe8] sm:$0xff]  ;;  %s2832_s25 = scalar_lea.vmem %s5172_s17, 4096 }
  0x29   : > { %248 = vst.msk [vmem:[#allocation2 + $0x19] sm:$0xff] %vm201_vm0, %v169_v2  ;;  %250 = vst.msk [vmem:[#allocation2 + $0x31] sm:$0xff] %vm201_vm0, %v171_v3  ;;  %v543_v63 = vld [vmem:[#allocation2 + $0x1] sm:$0xff]  ;;  %p2833_p11 = scmp.ne.s32.totalorder %s5172_s17, %s2832_s25  ;;  %s2896_s26 = smov [#allocation3]  }
  0x2a   : > { %249 = vst.msk [vmem:[#allocation2 + $0x21] sm:$0xff] %vm201_vm0, %v170_v4  ;;  %252 = vst.msk [vmem:[#allocation2 + $0x49] sm:$0xff] %vm201_vm0, %v173_v5  ;;  %s2836_s27 = sshll.u32 %s2896_s26, 4  ;;  %s2837_s27 = int_to_ptr.vmem [resolvable:$false] %s2836_s27 }
  0x2b   : > { %251 = vst.msk [vmem:[#allocation2 + $0x39] sm:$0xff] %vm201_vm0, %v172_v6  ;;  %254 = vst.msk [vmem:[#allocation2 + $0x61] sm:$0xff] %vm201_vm0, %v175_v7  ;;  %p2834_p12 = pnand %p2833_p11, %p2957_p5  ;;  %p2839_p0 = scmp.lt.s32.totalorder %s5172_s17, %s2837_s27 }
  0x2c   : > { %253 = vst.msk [vmem:[#allocation2 + $0x51] sm:$0xff] %vm201_vm0, %v174_v9  ;;  %256 = vst.msk [vmem:[#allocation2 + $0x79] sm:$0xff] %vm201_vm0, %v177_v10 }
  0x2d   : > { %v283_v11 = vld [vmem:[#allocation2] sm:$0xff]  ;;  %255 = vst.msk [vmem:[#allocation2 + $0x69] sm:$0xff] %vm201_vm0, %v176_v12  ;;  %258 = vst.msk [vmem:[#allocation2 + $0x91] sm:$0xff] %vm201_vm0, %v179_v13  ;;  %p2835_p13 = pneg %p2834_p12 }
  0x2e   : > { %257 = vst.msk [vmem:[#allocation2 + $0x81] sm:$0xff] %vm201_vm0, %v178_v14  ;;  %260 = vst.msk [vmem:[#allocation2 + $0xa9] sm:$0xff] %vm201_vm0, %v181_v15  ;;  %317 = vperm.xlu0 %2830, %v283_v11   ;;  %v544_v2 = vld [vmem:[#allocation2 + $0x9] sm:$0xff] }
  0x2f   : > { %259 = vst.msk [vmem:[#allocation2 + $0x99] sm:$0xff] %vm201_vm0, %v180_v16  ;;  %262 = vst.msk [vmem:[#allocation2 + $0xc1] sm:$0xff] %vm201_vm0, %v183_v17 }
  0x30   : > { %261 = vst.msk [vmem:[#allocation2 + $0xb1] sm:$0xff] %vm201_vm0, %v182_v18  ;;  %264 = vst.msk [vmem:[#allocation2 + $0xd9] sm:$0xff] %vm201_vm0, %v185_v19  ;;  %v3057_v26 = vld [vmem:[#allocation2 + $0x18] sm:$0xff]  ;;  %v3059_v27 = vld [vmem:[#allocation2 + $0x30] sm:$0xff] }
  0x31   : > { %263 = vst.msk [vmem:[#allocation2 + $0xc9] sm:$0xff] %vm201_vm0, %v184_v20  ;;  %266 = vst.msk [vmem:[#allocation2 + $0xf1] sm:$0xff] %vm201_vm0, %v187_v21  ;;  %327 = vperm.xlu1 %2831, %v3057_v26   ;;  %v3065_v28 = vld [vmem:[#allocation2 + $0x20] sm:$0xff]  ;;  %v3071_v31 = vld [vmem:[#allocation2 + $0x48] sm:$0xff] }
  0x32   : > { %265 = vst.msk [vmem:[#allocation2 + $0xe1] sm:$0xff] %vm201_vm0, %v186_v22  ;;  %268 = vst.msk [vmem:[#allocation2 + $0x109] sm:$0xff] %vm201_vm0, %v189_v23  ;;  %337 = vperm.xlu0 %2830, %v3059_v27   ;;  %v3075_v32 = vld [vmem:[#allocation2 + $0x38] sm:$0xff]  ;;  %v3078_v33 = vld [vmem:[#allocation2 + $0x60] sm:$0xff] }
  0x33   : > { %267 = vst.msk [vmem:[#allocation2 + $0xf9] sm:$0xff] %vm201_vm0, %v188_v24  ;;  %270 = vst.msk [vmem:[#allocation2 + $0x121] sm:$0xff] %vm201_vm0, %v191_v25  ;;  %v3089_v39 = vld [vmem:[#allocation2 + $0x50] sm:$0xff]  ;;  %v3096_v41 = vld [vmem:[#allocation2 + $0x78] sm:$0xff] }
  0x34   : > { %269 = vst.msk [vmem:[#allocation2 + $0x111] sm:$0xff] %vm201_vm0, %v190_v29  ;;  %272 = vst.msk [vmem:[#allocation2 + $0x139] sm:$0xff] %vm201_vm0, %v193_v30  ;;  %v3099_v42 = vld [vmem:[#allocation2 + $0x68] sm:$0xff]  ;;  %v3102_v43 = vld [vmem:[#allocation2 + $0x90] sm:$0xff] }
  0x35   : > { %332 = vperm.xlu1 %2831, %v3065_v28   ;;  %271 = vst.msk [vmem:[#allocation2 + $0x129] sm:$0xff] %vm201_vm0, %v192_v34  ;;  %274 = vst.msk [vmem:[#allocation2 + $0x151] sm:$0xff] %vm201_vm0, %v195_v35  ;;  %v3105_v44 = vld [vmem:[#allocation2 + $0x80] sm:$0xff]  ;;  %v3108_v45 = vld [vmem:[#allocation2 + $0xa8] sm:$0xff] }
  0x36   : > { %347 = vperm.xlu0 %2830, %v3071_v31   ;;  %273 = vst.msk [vmem:[#allocation2 + $0x141] sm:$0xff] %vm201_vm0, %v194_v36  ;;  %276 = vst.msk [vmem:[#allocation2 + $0x169] sm:$0xff] %vm201_vm0, %v197_v37  ;;  %v3111_v46 = vld [vmem:[#allocation2 + $0x98] sm:$0xff]  ;;  %v3114_v47 = vld [vmem:[#allocation2 + $0xc0] sm:$0xff] }
  0x37   : > { %275 = vst.msk [vmem:[#allocation2 + $0x159] sm:$0xff] %vm201_vm0, %v196_v38  ;;  %277 = vst.msk [vmem:[#allocation2 + $0x171] sm:$0xff] %vm201_vm0, %v198_v40  ;;  %v3117_v48 = vld [vmem:[#allocation2 + $0xb0] sm:$0xff]  ;;  %v3120_v49 = vld [vmem:[#allocation2 + $0xd8] sm:$0xff] }
  0x38   : > { %v3123_v50 = vld [vmem:[#allocation2 + $0xc8] sm:$0xff]  ;;  %v3126_v51 = vld [vmem:[#allocation2 + $0xf0] sm:$0xff]  ;;  %v3165_v1 = vld [vmem:[#allocation2 + $0x19] sm:$0xff] }
  0x39   : > { %342 = vperm.xlu1 %2831, %v3075_v32   ;;  %v3129_v52 = vld [vmem:[#allocation2 + $0xe0] sm:$0xff]  ;;  %v3132_v53 = vld [vmem:[#allocation2 + $0x108] sm:$0xff]  ;;  %v3169_v3 = vld [vmem:[#allocation2 + $0x31] sm:$0xff] }
  0x3a   : > { %357 = vperm.xlu0 %2830, %v3078_v33   ;;  %v3135_v54 = vld [vmem:[#allocation2 + $0xf8] sm:$0xff]  ;;  %v3138_v55 = vld [vmem:[#allocation2 + $0x120] sm:$0xff]  ;;  %v3174_v5 = vld [vmem:[#allocation2 + $0x49] sm:$0xff] }
  0x3b   : > { %v3141_v56 = vld [vmem:[#allocation2 + $0x110] sm:$0xff]  ;;  %v3144_v57 = vld [vmem:[#allocation2 + $0x138] sm:$0xff]  ;;  %v3171_v4 = vld [vmem:[#allocation2 + $0x21] sm:$0xff] }
  0x3c   : > { %v3147_v58 = vld [vmem:[#allocation2 + $0x128] sm:$0xff]  ;;  %v3150_v59 = vld [vmem:[#allocation2 + $0x150] sm:$0xff]  ;;  %v3177_v6 = vld [vmem:[#allocation2 + $0x39] sm:$0xff] }
  0x3d   : > { %352 = vperm.xlu1 %2831, %v3089_v39   ;;  %v3153_v60 = vld [vmem:[#allocation2 + $0x140] sm:$0xff]  ;;  %v3156_v61 = vld [vmem:[#allocation2 + $0x168] sm:$0xff]  ;;  %v3183_v8 = vld [vmem:[#allocation2 + $0x51] sm:$0xff] }
  0x3e   : > { %367 = vperm.xlu0 %2830, %v3096_v41   ;;  %v3159_v62 = vld [vmem:[#allocation2 + $0x158] sm:$0xff]  ;;  %v3163_v0 = vld [vmem:[#allocation2 + $0x170] sm:$0xff]  ;;  %v3180_v7 = vld [vmem:[#allocation2 + $0x61] sm:$0xff] }
  0x3f   : > { %v3186_v9 = vld [vmem:[#allocation2 + $0x79] sm:$0xff]  ;;  %v3189_v10 = vld [vmem:[#allocation2 + $0x69] sm:$0xff]  ;;  %v3192_v11 = vld [vmem:[#allocation2 + $0x91] sm:$0xff] }
  0x40   : > { %v3195_v12 = vld [vmem:[#allocation2 + $0x81] sm:$0xff]  ;;  %v3198_v13 = vld [vmem:[#allocation2 + $0xa9] sm:$0xff]  ;;  %v3201_v14 = vld [vmem:[#allocation2 + $0x99] sm:$0xff] }
  0x41   : > { %362 = vperm.xlu1 %2831, %v3099_v42   ;;  %v3204_v15 = vld [vmem:[#allocation2 + $0xc1] sm:$0xff]  ;;  %v3207_v16 = vld [vmem:[#allocation2 + $0xb1] sm:$0xff]  ;;  %v3210_v17 = vld [vmem:[#allocation2 + $0xd9] sm:$0xff] }
  0x42   : > { %377 = vperm.xlu0 %2830, %v3102_v43   ;;  %v3213_v18 = vld [vmem:[#allocation2 + $0xc9] sm:$0xff]  ;;  %v3216_v19 = vld [vmem:[#allocation2 + $0xf1] sm:$0xff]  ;;  %v3219_v20 = vld [vmem:[#allocation2 + $0xe1] sm:$0xff] }
  0x43   : > { %v3222_v21 = vld [vmem:[#allocation2 + $0x109] sm:$0xff]  ;;  %v3225_v22 = vld [vmem:[#allocation2 + $0xf9] sm:$0xff]  ;;  %v3228_v23 = vld [vmem:[#allocation2 + $0x121] sm:$0xff] }
  0x44   : > { %v3231_v24 = vld [vmem:[#allocation2 + $0x111] sm:$0xff]  ;;  %v3234_v25 = vld [vmem:[#allocation2 + $0x139] sm:$0xff]  ;;  %v3237_v29 = vld [vmem:[#allocation2 + $0x129] sm:$0xff] }
  0x45   : > { %372 = vperm.xlu1 %2831, %v3105_v44   ;;  %5257 = vst [vmem:[#allocation6_spill] sm:$0xff] %v3237_v29  ;;  %v199_v30 = vld [vmem:[%s3014_s28 + $0xf0] sm:$0xff]  ;;  %v3245_v35 = vld [vmem:[#allocation2 + $0x141] sm:$0xff]  ;;  %v200_v37 = vld [vmem:[%s3014_s28 + $0xf8] sm:$0xff]  ;;  %s2838_s28 = scalar_lea.vmem %s2837_s27, 8192 }
  0x46   : > { %387 = vperm.xlu0 %2830, %v3108_v45   ;;  %278 = vst.msk [vmem:[#allocation2 + $0x181] sm:$0xff] %vm201_vm0, %v199_v30  ;;  %v3242_v34 = vld [vmem:[#allocation2 + $0x151] sm:$0xff]  ;;  %5259 = vst [vmem:[#allocation8_spill] sm:$0xff] %v3245_v35  ;;  %v3248_v36 = vld [vmem:[#allocation2 + $0x169] sm:$0xff]  ;;  %p2840_p1 = scmp.lt.s32.totalorder %s2838_s28, %s2832_s25 }
  0x47   : > { %5258 = vst [vmem:[#allocation7_spill] sm:$0xff] %v3242_v34  ;;  %5260 = vst [vmem:[#allocation9_spill] sm:$0xff] %v3248_v36  ;;  %v3255_v40 = vld [vmem:[#allocation2 + $0x159] sm:$0xff]  ;;  %v3261_v30 = vld [vmem:[#allocation2 + $0x171] sm:$0xff] }
  0x48   : > { %279 = vst.msk [vmem:[#allocation2 + $0x189] sm:$0xff] %vm201_vm0, %v200_v37  ;;  %5262 = vst [vmem:[#allocation11_spill] sm:$0xff] %v3255_v40  ;;  %p2841_p2 = por %p2840_p1, %p2839_p0 }
  0x49   : > { %382 = vperm.xlu1 %2831, %v3111_v46  }
  0x4a   : > { %397 = vperm.xlu0 %2830, %v3114_v47   ;;  %p2842_p3 = pnand %p2841_p2, %p2835_p13 }
  0x4d   : > { %392 = vperm.xlu1 %2831, %v3117_v48  }
  0x4e   : > { %407 = vperm.xlu0 %2830, %v3120_v49  }
  0x51   : > { %402 = vperm.xlu1 %2831, %v3123_v50  }
  0x52   : > { %417 = vperm.xlu0 %2830, %v3126_v51  }
  0x55   : > { %412 = vperm.xlu1 %2831, %v3129_v52  }
  0x56   : > { %427 = vperm.xlu0 %2830, %v3132_v53  }
  0x59   : > { %422 = vperm.xlu1 %2831, %v3135_v54  }
  0x5a   : > { %437 = vperm.xlu0 %2830, %v3138_v55  }
  0x5d   : > { %432 = vperm.xlu1 %2831, %v3141_v56  }
  0x5e   : > { %447 = vperm.xlu0 %2830, %v3144_v57  }
  0x61   : > { %442 = vperm.xlu1 %2831, %v3147_v58  }
  0x62   : > { %457 = vperm.xlu0 %2830, %v3150_v59  }
  0x65   : > { %452 = vperm.xlu1 %2831, %v3153_v60  }
  0x66   : > { %467 = vperm.xlu0 %2830, %v3156_v61  }
  0x69   : > { %462 = vperm.xlu1 %2831, %v3159_v62  }
  0x6a   : > { %577 = vperm.xlu0 %2830, %v543_v63   ;;  %v803_v63 = vld [vmem:[#allocation2 + $0x2] sm:$0xff] }
  0x6d   : > { %472 = vperm.xlu1 %2831, %v3163_v0  }
  0x6e   : > { %587 = vperm.xlu0 %2830, %v3165_v1  }
  0x71   : > { %582 = vperm.xlu1 %2831, %v544_v2  }
  0x72   : > { %597 = vperm.xlu0 %2830, %v3169_v3  }
  0x75   : > { %592 = vperm.xlu1 %2831, %v3171_v4  }
  0x76   : > { %607 = vperm.xlu0 %2830, %v3174_v5  }
  0x79   : > { %602 = vperm.xlu1 %2831, %v3177_v6  }
  0x7a   : > { %617 = vperm.xlu0 %2830, %v3180_v7  }
  0x7d   : > { %612 = vperm.xlu1 %2831, %v3183_v8  }
  0x7e   : > { %627 = vperm.xlu0 %2830, %v3186_v9  }
  0x81   : > { %622 = vperm.xlu1 %2831, %v3189_v10  }
  0x82   : > { %637 = vperm.xlu0 %2830, %v3192_v11  }
  0x85   : > { %632 = vperm.xlu1 %2831, %v3195_v12  }
  0x86   : > { %647 = vperm.xlu0 %2830, %v3198_v13  }
  0x89   : > { %642 = vperm.xlu1 %2831, %v3201_v14  }
  0x8a   : > { %657 = vperm.xlu0 %2830, %v3204_v15  }
  0x8d   : > { %652 = vperm.xlu1 %2831, %v3207_v16  }
  0x8e   : > { %667 = vperm.xlu0 %2830, %v3210_v17  }
  0x91   : > { %662 = vperm.xlu1 %2831, %v3213_v18  }
  0x92   : > { %677 = vperm.xlu0 %2830, %v3216_v19  }
  0x95   : > { %672 = vperm.xlu1 %2831, %v3219_v20  }
  0x96   : > { %687 = vperm.xlu0 %2830, %v3222_v21  }
  0x98   : > { %v3253_v38 = vpop.permute.xlu0 %322 }
  0x99   : > { %682 = vperm.xlu1 %2831, %v3225_v22   ;;  %5261 = vst [vmem:[#allocation10_spill] sm:$0xff] %v3253_v38  ;;  %v804_v38 = vld [vmem:[#allocation2 + $0xa] sm:$0xff] }
  0x9a   : > { %697 = vperm.xlu0 %2830, %v3228_v23  }
  0x9d   : > { %692 = vperm.xlu1 %2831, %v3231_v24  }
  0x9e   : > { %707 = vperm.xlu0 %2830, %v3234_v25  }
  0xa1   : > { %702 = vperm.xlu1 %2831, %v3237_v29   ;;  %v3265_v29 = vld [vmem:[#allocation2 + $0x1a] sm:$0xff] }
  0xa2   : > { %717 = vperm.xlu0 %2830, %v3242_v34   ;;  %5265 = vst [vmem:[#allocation14_spill] sm:$0xff] %v3265_v29 }
  0xa5   : > { %712 = vperm.xlu1 %2831, %v3245_v35   ;;  %v3273_v35 = vld [vmem:[#allocation2 + $0x32] sm:$0xff] }
  0xa6   : > { %727 = vperm.xlu0 %2830, %v3248_v36   ;;  %5268 = vst [vmem:[#allocation17_spill] sm:$0xff] %v3273_v35 }
  0xa9   : > { %722 = vperm.xlu1 %2831, %v3255_v40   ;;  %v3259_v2 = vpop.permute.xlu0 %317  ;;  %v3277_v40 = vld [vmem:[#allocation2 + $0x22] sm:$0xff] }
  0xaa   : > { %5263 = vst [vmem:[#allocation12_spill] sm:$0xff] %v3259_v2  ;;  %837 = vperm.xlu0 %2830, %v803_v63   ;;  %5270 = vst [vmem:[#allocation19_spill] sm:$0xff] %v3277_v40 }
  0xac   : > { %v3263_v34 = vpop.permute.xlu1 %327 }
  0xad   : > { %5264 = vst [vmem:[#allocation13_spill] sm:$0xff] %v3263_v34  ;;  %732 = vperm.xlu1 %2831, %v3261_v30   ;;  %v3268_v37 = vpop.permute.xlu0 %337  ;;  %v3282_v34 = vld [vmem:[#allocation2 + $0x4a] sm:$0xff] }
  0xae   : > { %5266 = vst [vmem:[#allocation15_spill] sm:$0xff] %v3268_v37  ;;  %847 = vperm.xlu0 %2830, %v3265_v29   ;;  %5272 = vst [vmem:[#allocation21_spill] sm:$0xff] %v3282_v34  ;;  %v3287_v29 = vld [vmem:[#allocation2 + $0x3a] sm:$0xff] }
  0xaf   : > { %5274 = vst [vmem:[#allocation23_spill] sm:$0xff] %v3287_v29 }
  0xb0   : > { %v3271_v36 = vpop.permute.xlu1 %332 }
  0xb1   : > { %5267 = vst [vmem:[#allocation16_spill] sm:$0xff] %v3271_v36  ;;  %842 = vperm.xlu1 %2831, %v804_v38   ;;  %v3275_v2 = vpop.permute.xlu0 %347  ;;  %v3292_v38 = vld [vmem:[#allocation2 + $0x62] sm:$0xff] }
  0xb2   : > { %5269 = vst [vmem:[#allocation18_spill] sm:$0xff] %v3275_v2  ;;  %857 = vperm.xlu0 %2830, %v3273_v35   ;;  %5276 = vst [vmem:[#allocation25_spill] sm:$0xff] %v3292_v38  ;;  %v3297_v35 = vld [vmem:[#allocation2 + $0x52] sm:$0xff] }
  0xb3   : > { %5278 = vst [vmem:[#allocation27_spill] sm:$0xff] %v3297_v35 }
  0xb4   : > { %v3280_v63 = vpop.permute.xlu1 %342 }
  0xb5   : > { %5271 = vst [vmem:[#allocation20_spill] sm:$0xff] %v3280_v63  ;;  %852 = vperm.xlu1 %2831, %v3277_v40   ;;  %v3285_v37 = vpop.permute.xlu0 %357  ;;  %v3302_v40 = vld [vmem:[#allocation2 + $0x7a] sm:$0xff] }
  0xb6   : > { %5273 = vst [vmem:[#allocation22_spill] sm:$0xff] %v3285_v37  ;;  %867 = vperm.xlu0 %2830, %v3282_v34   ;;  %5280 = vst [vmem:[#allocation29_spill] sm:$0xff] %v3302_v40  ;;  %v3307_v34 = vld [vmem:[#allocation2 + $0x6a] sm:$0xff] }
  0xb7   : > { %5282 = vst [vmem:[#allocation31_spill] sm:$0xff] %v3307_v34 }
  0xb8   : > { %v3290_v36 = vpop.permute.xlu1 %352 }
  0xb9   : > { %5275 = vst [vmem:[#allocation24_spill] sm:$0xff] %v3290_v36  ;;  %862 = vperm.xlu1 %2831, %v3287_v29   ;;  %v3295_v2 = vpop.permute.xlu0 %367  ;;  %v3312_v29 = vld [vmem:[#allocation2 + $0x92] sm:$0xff] }
  0xba   : > { %5277 = vst [vmem:[#allocation26_spill] sm:$0xff] %v3295_v2  ;;  %877 = vperm.xlu0 %2830, %v3292_v38   ;;  %5284 = vst [vmem:[#allocation33_spill] sm:$0xff] %v3312_v29  ;;  %v3317_v38 = vld [vmem:[#allocation2 + $0x82] sm:$0xff] }
  0xbb   : > { %5286 = vst [vmem:[#allocation35_spill] sm:$0xff] %v3317_v38 }
  0xbc   : > { %v3300_v63 = vpop.permute.xlu1 %362 }
  0xbd   : > { %5279 = vst [vmem:[#allocation28_spill] sm:$0xff] %v3300_v63  ;;  %872 = vperm.xlu1 %2831, %v3297_v35   ;;  %v3305_v37 = vpop.permute.xlu0 %377  ;;  %v3322_v35 = vld [vmem:[#allocation2 + $0xaa] sm:$0xff] }
  0xbe   : > { %5281 = vst [vmem:[#allocation30_spill] sm:$0xff] %v3305_v37  ;;  %887 = vperm.xlu0 %2830, %v3302_v40   ;;  %5288 = vst [vmem:[#allocation37_spill] sm:$0xff] %v3322_v35  ;;  %v3327_v40 = vld [vmem:[#allocation2 + $0x9a] sm:$0xff] }
  0xbf   : > { %5290 = vst [vmem:[#allocation39_spill] sm:$0xff] %v3327_v40 }
  0xc0   : > { %v3310_v36 = vpop.permute.xlu1 %372 }
  0xc1   : > { %5283 = vst [vmem:[#allocation32_spill] sm:$0xff] %v3310_v36  ;;  %882 = vperm.xlu1 %2831, %v3307_v34   ;;  %v3315_v2 = vpop.permute.xlu0 %387  ;;  %v3332_v34 = vld [vmem:[#allocation2 + $0xc2] sm:$0xff] }
  0xc2   : > { %5285 = vst [vmem:[#allocation34_spill] sm:$0xff] %v3315_v2  ;;  %897 = vperm.xlu0 %2830, %v3312_v29   ;;  %5292 = vst [vmem:[#allocation41_spill] sm:$0xff] %v3332_v34  ;;  %v3337_v29 = vld [vmem:[#allocation2 + $0xb2] sm:$0xff] }
  0xc3   : > { %5294 = vst [vmem:[#allocation43_spill] sm:$0xff] %v3337_v29 }
  0xc4   : > { %v3320_v63 = vpop.permute.xlu1 %382 }
  0xc5   : > { %5287 = vst [vmem:[#allocation36_spill] sm:$0xff] %v3320_v63  ;;  %892 = vperm.xlu1 %2831, %v3317_v38   ;;  %v3325_v37 = vpop.permute.xlu0 %397  ;;  %v3342_v38 = vld [vmem:[#allocation2 + $0xda] sm:$0xff] }
  0xc6   : > { %5289 = vst [vmem:[#allocation38_spill] sm:$0xff] %v3325_v37  ;;  %907 = vperm.xlu0 %2830, %v3322_v35   ;;  %5296 = vst [vmem:[#allocation45_spill] sm:$0xff] %v3342_v38  ;;  %v3347_v35 = vld [vmem:[#allocation2 + $0xca] sm:$0xff] }
  0xc7   : > { %5298 = vst [vmem:[#allocation47_spill] sm:$0xff] %v3347_v35 }
  0xc8   : > { %v3330_v36 = vpop.permute.xlu1 %392 }
  0xc9   : > { %5291 = vst [vmem:[#allocation40_spill] sm:$0xff] %v3330_v36  ;;  %902 = vperm.xlu1 %2831, %v3327_v40   ;;  %v3335_v2 = vpop.permute.xlu0 %407  ;;  %v3352_v40 = vld [vmem:[#allocation2 + $0xf2] sm:$0xff] }
  0xca   : > { %5293 = vst [vmem:[#allocation42_spill] sm:$0xff] %v3335_v2  ;;  %917 = vperm.xlu0 %2830, %v3332_v34   ;;  %5300 = vst [vmem:[#allocation49_spill] sm:$0xff] %v3352_v40  ;;  %v3357_v34 = vld [vmem:[#allocation2 + $0xe2] sm:$0xff] }
  0xcb   : > { %5302 = vst [vmem:[#allocation51_spill] sm:$0xff] %v3357_v34 }
  0xcc   : > { %v3340_v63 = vpop.permute.xlu1 %402 }
  0xcd   : > { %5295 = vst [vmem:[#allocation44_spill] sm:$0xff] %v3340_v63  ;;  %912 = vperm.xlu1 %2831, %v3337_v29   ;;  %v3345_v37 = vpop.permute.xlu0 %417  ;;  %v3362_v29 = vld [vmem:[#allocation2 + $0x10a] sm:$0xff] }
  0xce   : > { %5297 = vst [vmem:[#allocation46_spill] sm:$0xff] %v3345_v37  ;;  %927 = vperm.xlu0 %2830, %v3342_v38   ;;  %5304 = vst [vmem:[#allocation53_spill] sm:$0xff] %v3362_v29  ;;  %v3367_v38 = vld [vmem:[#allocation2 + $0xfa] sm:$0xff] }
  0xcf   : > { %5306 = vst [vmem:[#allocation55_spill] sm:$0xff] %v3367_v38 }
  0xd0   : > { %v3350_v36 = vpop.permute.xlu1 %412 }
  0xd1   : > { %5299 = vst [vmem:[#allocation48_spill] sm:$0xff] %v3350_v36  ;;  %922 = vperm.xlu1 %2831, %v3347_v35   ;;  %v3355_v2 = vpop.permute.xlu0 %427  ;;  %v3372_v35 = vld [vmem:[#allocation2 + $0x122] sm:$0xff] }
  0xd2   : > { %5301 = vst [vmem:[#allocation50_spill] sm:$0xff] %v3355_v2  ;;  %937 = vperm.xlu0 %2830, %v3352_v40   ;;  %5308 = vst [vmem:[#allocation57_spill] sm:$0xff] %v3372_v35  ;;  %v3377_v40 = vld [vmem:[#allocation2 + $0x112] sm:$0xff] }
  0xd3   : > { %5310 = vst [vmem:[#allocation59_spill] sm:$0xff] %v3377_v40 }
  0xd4   : > { %v3360_v63 = vpop.permute.xlu1 %422 }
  0xd5   : > { %5303 = vst [vmem:[#allocation52_spill] sm:$0xff] %v3360_v63  ;;  %932 = vperm.xlu1 %2831, %v3357_v34   ;;  %v3365_v37 = vpop.permute.xlu0 %437  ;;  %v3382_v34 = vld [vmem:[#allocation2 + $0x13a] sm:$0xff] }
  0xd6   : > { %5305 = vst [vmem:[#allocation54_spill] sm:$0xff] %v3365_v37  ;;  %947 = vperm.xlu0 %2830, %v3362_v29   ;;  %5312 = vst [vmem:[#allocation61_spill] sm:$0xff] %v3382_v34  ;;  %v3387_v29 = vld [vmem:[#allocation2 + $0x12a] sm:$0xff] }
  0xd7   : > { %5314 = vst [vmem:[#allocation63_spill] sm:$0xff] %v3387_v29 }
  0xd8   : > { %v3370_v36 = vpop.permute.xlu1 %432 }
  0xd9   : > { %5307 = vst [vmem:[#allocation56_spill] sm:$0xff] %v3370_v36  ;;  %942 = vperm.xlu1 %2831, %v3367_v38   ;;  %v3375_v2 = vpop.permute.xlu0 %447  ;;  %v3392_v38 = vld [vmem:[#allocation2 + $0x152] sm:$0xff] }
  0xda   : > { %5309 = vst [vmem:[#allocation58_spill] sm:$0xff] %v3375_v2  ;;  %957 = vperm.xlu0 %2830, %v3372_v35   ;;  %v3397_v35 = vld [vmem:[#allocation2 + $0x142] sm:$0xff] }
  0xdb   : > { %5317 = vst [vmem:[#allocation66_spill] sm:$0xff] %v3397_v35 }
  0xdc   : > { %v3380_v63 = vpop.permute.xlu1 %442 }
  0xdd   : > { %5311 = vst [vmem:[#allocation60_spill] sm:$0xff] %v3380_v63  ;;  %952 = vperm.xlu1 %2831, %v3377_v40   ;;  %v3385_v37 = vpop.permute.xlu0 %457  ;;  %v3402_v40 = vld [vmem:[#allocation2 + $0x16a] sm:$0xff] }
  0xde   : > { %5313 = vst [vmem:[#allocation62_spill] sm:$0xff] %v3385_v37  ;;  %967 = vperm.xlu0 %2830, %v3382_v34   ;;  %v3407_v34 = vld [vmem:[#allocation2 + $0x15a] sm:$0xff] }
  0xe0   : > { %v3390_v36 = vpop.permute.xlu1 %452 }
  0xe1   : > { %5315 = vst [vmem:[#allocation64_spill] sm:$0xff] %v3390_v36  ;;  %962 = vperm.xlu1 %2831, %v3387_v29   ;;  %v3395_v2 = vpop.permute.xlu0 %467  ;;  %v3415_v29 = vld [vmem:[#allocation2 + $0x172] sm:$0xff] }
  0xe2   : > { %5316 = vst [vmem:[#allocation65_spill] sm:$0xff] %v3395_v2  ;;  %977 = vperm.xlu0 %2830, %v3392_v38  }
  0xe4   : > { %v3400_v63 = vpop.permute.xlu1 %462 }
  0xe5   : > { %5318 = vst [vmem:[#allocation67_spill] sm:$0xff] %v3400_v63  ;;  %972 = vperm.xlu1 %2831, %v3397_v35   ;;  %v3405_v37 = vpop.permute.xlu0 %577 }
  0xe6   : > { %5319 = vst [vmem:[#allocation68_spill] sm:$0xff] %v3405_v37  ;;  %987 = vperm.xlu0 %2830, %v3402_v40  }
  0xe8   : > { %v3410_v36 = vpop.permute.xlu1 %472 }
  0xe9   : > { %5320 = vst [vmem:[#allocation69_spill] sm:$0xff] %v3410_v36  ;;  %982 = vperm.xlu1 %2831, %v3407_v34   ;;  %v3413_v2 = vpop.permute.xlu0 %587 }
  0xea   : > { %5321 = vst [vmem:[#allocation70_spill] sm:$0xff] %v3413_v2  ;;  %1097 = vperm.xlu0 %2830, %v3057_v26  }
  0xec   : > { %v3418_v63 = vpop.permute.xlu1 %582 }
  0xed   : > { %5322 = vst [vmem:[#allocation71_spill] sm:$0xff] %v3418_v63  ;;  %992 = vperm.xlu1 %2831, %v3415_v29   ;;  %v3421_v35 = vpop.permute.xlu0 %597 }
  0xee   : > { %1107 = vperm.xlu0 %2830, %v3059_v27  }
  0xf0   : > { %v3424_v37 = vpop.permute.xlu1 %592 }
  0xf1   : > { %1102 = vperm.xlu1 %2831, %v3065_v28   ;;  %v3427_v36 = vpop.permute.xlu0 %607 }
  0xf2   : > { %1117 = vperm.xlu0 %2830, %v3071_v31  }
  0xf4   : > { %v3430_v2 = vpop.permute.xlu1 %602 }
  0xf5   : > { %1112 = vperm.xlu1 %2831, %v3075_v32   ;;  %v3433_v26 = vpop.permute.xlu0 %617 }
  0xf6   : > { %1127 = vperm.xlu0 %2830, %v3078_v33  }
  0xf8   : > { %v3436_v63 = vpop.permute.xlu1 %612 }
  0xf9   : > { %1122 = vperm.xlu1 %2831, %v3089_v39   ;;  %v3439_v27 = vpop.permute.xlu0 %627 }
  0xfa   : > { %1137 = vperm.xlu0 %2830, %v3096_v41  }
  0xfc   : > { %v3442_v28 = vpop.permute.xlu1 %622 }
  0xfd   : > { %1132 = vperm.xlu1 %2831, %v3099_v42   ;;  %v3445_v31 = vpop.permute.xlu0 %637 }
  0xfe   : > { %1147 = vperm.xlu0 %2830, %v3102_v43  }
 0x100   : > { %v3448_v32 = vpop.permute.xlu1 %632 }
 0x101   : > { %1142 = vperm.xlu1 %2831, %v3105_v44   ;;  %v3451_v33 = vpop.permute.xlu0 %647 }
 0x102   : > { %1157 = vperm.xlu0 %2830, %v3108_v45  }
 0x104   : > { %v3454_v39 = vpop.permute.xlu1 %642 }
 0x105   : > { %1152 = vperm.xlu1 %2831, %v3111_v46   ;;  %v3457_v41 = vpop.permute.xlu0 %657 }
 0x106   : > { %1167 = vperm.xlu0 %2830, %v3114_v47  }
 0x108   : > { %v3460_v42 = vpop.permute.xlu1 %652 }
 0x109   : > { %1162 = vperm.xlu1 %2831, %v3117_v48   ;;  %v3463_v43 = vpop.permute.xlu0 %667 }
 0x10a   : > { %1177 = vperm.xlu0 %2830, %v3120_v49  }
 0x10c   : > { %v3466_v44 = vpop.permute.xlu1 %662 }
 0x10d   : > { %1172 = vperm.xlu1 %2831, %v3123_v50   ;;  %v3469_v45 = vpop.permute.xlu0 %677 }
 0x10e   : > { %1187 = vperm.xlu0 %2830, %v3126_v51  }
 0x110   : > { %v3472_v46 = vpop.permute.xlu1 %672 }
 0x111   : > { %1182 = vperm.xlu1 %2831, %v3129_v52   ;;  %v3475_v47 = vpop.permute.xlu0 %687 }
 0x112   : > { %1197 = vperm.xlu0 %2830, %v3132_v53  }
 0x114   : > { %v3478_v48 = vpop.permute.xlu1 %682 }
 0x115   : > { %5323 = vst [vmem:[#allocation72_spill] sm:$0xff] %v3478_v48  ;;  %1192 = vperm.xlu1 %2831, %v3135_v54   ;;  %v3481_v49 = vpop.permute.xlu0 %697 }
 0x116   : > { %5324 = vst [vmem:[#allocation73_spill] sm:$0xff] %v3481_v49  ;;  %1207 = vperm.xlu0 %2830, %v3138_v55   ;;  %v5530_v49 = vld [vmem:[#allocation42_spill] sm:$0xff] }
 0x118   : > { %v3484_v50 = vpop.permute.xlu1 %692 }
 0x119   : > { %5325 = vst [vmem:[#allocation74_spill] sm:$0xff] %v3484_v50  ;;  %1202 = vperm.xlu1 %2831, %v3141_v56   ;;  %v3487_v51 = vpop.permute.xlu0 %707 }
 0x11a   : > { %5326 = vst [vmem:[#allocation75_spill] sm:$0xff] %v3487_v51  ;;  %1217 = vperm.xlu0 %2830, %v3144_v57   ;;  %v3504_v51 = vld [vmem:[#allocation2 + $0x180] sm:$0xff] }
 0x11c   : > { %v3490_v52 = vpop.permute.xlu1 %702 }
 0x11d   : > { %5327 = vst [vmem:[#allocation76_spill] sm:$0xff] %v3490_v52  ;;  %1212 = vperm.xlu1 %2831, %v3147_v58   ;;  %v3493_v53 = vpop.permute.xlu0 %717 }
 0x11e   : > { %5328 = vst [vmem:[#allocation77_spill] sm:$0xff] %v3493_v53  ;;  %1227 = vperm.xlu0 %2830, %v3150_v59   ;;  %v2385_v53 = vld [vmem:[#allocation2 + $0x12a] sm:$0xff] }
 0x120   : > { %v3496_v54 = vpop.permute.xlu1 %712 }
 0x121   : > { %5329 = vst [vmem:[#allocation78_spill] sm:$0xff] %v3496_v54  ;;  %1222 = vperm.xlu1 %2831, %v3153_v60   ;;  %v3499_v55 = vpop.permute.xlu0 %727  ;;  %v3515_v60 = vld [vmem:[#allocation2 + $0x188] sm:$0xff] }
 0x122   : > { %1237 = vperm.xlu0 %2830, %v3156_v61  }
 0x124   : > { %v3502_v56 = vpop.permute.xlu1 %722 }
 0x125   : > { %5330 = vst [vmem:[#allocation79_spill] sm:$0xff] %v3502_v56  ;;  %1232 = vperm.xlu1 %2831, %v3159_v62   ;;  %v3507_v57 = vpop.permute.xlu0 %837 }
 0x126   : > { %5331 = vst [vmem:[#allocation80_spill] sm:$0xff] %v3507_v57  ;;  %1247 = vperm.xlu0 %2830, %v3504_v51  }
 0x128   : > { %v3510_v58 = vpop.permute.xlu1 %732 }
 0x129   : > { %1242 = vperm.xlu1 %2831, %v3163_v0   ;;  %v3513_v59 = vpop.permute.xlu0 %847 }
 0x12a   : > { %5332 = vst [vmem:[#allocation81_spill] sm:$0xff] %v3513_v59  ;;  %1357 = vperm.xlu0 %2830, %v3165_v1  }
 0x12c   : > { %v3518_v61 = vpop.permute.xlu1 %842 }
 0x12d   : > { %5333 = vst [vmem:[#allocation82_spill] sm:$0xff] %v3518_v61  ;;  %1252 = vperm.xlu1 %2831, %v3515_v60   ;;  %v3521_v56 = vpop.permute.xlu0 %857 }
 0x12e   : > { %5334 = vst [vmem:[#allocation83_spill] sm:$0xff] %v3521_v56  ;;  %1367 = vperm.xlu0 %2830, %v3169_v3  }
 0x130   : > { %v3524_v62 = vpop.permute.xlu1 %852 }
 0x131   : > { %5335 = vst [vmem:[#allocation84_spill] sm:$0xff] %v3524_v62  ;;  %1362 = vperm.xlu1 %2831, %v3171_v4   ;;  %v3527_v57 = vpop.permute.xlu0 %867 }
 0x132   : > { %5336 = vst [vmem:[#allocation85_spill] sm:$0xff] %v3527_v57  ;;  %1377 = vperm.xlu0 %2830, %v3174_v5  }
 0x134   : > { %v3530_v0 = vpop.permute.xlu1 %862 }
 0x135   : > { %5337 = vst [vmem:[#allocation86_spill] sm:$0xff] %v3530_v0  ;;  %1372 = vperm.xlu1 %2831, %v3177_v6   ;;  %v3533_v1 = vpop.permute.xlu0 %877 }
 0x136   : > { %5338 = vst [vmem:[#allocation87_spill] sm:$0xff] %v3533_v1  ;;  %1387 = vperm.xlu0 %2830, %v3180_v7  }
 0x138   : > { %v3536_v61 = vpop.permute.xlu1 %872 }
 0x139   : > { %5339 = vst [vmem:[#allocation88_spill] sm:$0xff] %v3536_v61  ;;  %1382 = vperm.xlu1 %2831, %v3183_v8   ;;  %v3539_v3 = vpop.permute.xlu0 %887 }
 0x13a   : > { %5340 = vst [vmem:[#allocation89_spill] sm:$0xff] %v3539_v3  ;;  %1397 = vperm.xlu0 %2830, %v3186_v9   ;;  %v5512_v3 = vld [vmem:[#allocation22_spill] sm:$0xff] }
 0x13c   : > { %v3542_v4 = vpop.permute.xlu1 %882 }
 0x13d   : > { %5341 = vst [vmem:[#allocation90_spill] sm:$0xff] %v3542_v4  ;;  %1392 = vperm.xlu1 %2831, %v3189_v10   ;;  %v3545_v5 = vpop.permute.xlu0 %897  ;;  %v5511_v4 = vld [vmem:[#allocation20_spill] sm:$0xff] }
 0x13e   : > { %5342 = vst [vmem:[#allocation91_spill] sm:$0xff] %v3545_v5  ;;  %1407 = vperm.xlu0 %2830, %v3192_v11   ;;  %v5510_v5 = vld [vmem:[#allocation18_spill] sm:$0xff] }
 0x140   : > { %v3548_v6 = vpop.permute.xlu1 %892 }
 0x141   : > { %5343 = vst [vmem:[#allocation92_spill] sm:$0xff] %v3548_v6  ;;  %1402 = vperm.xlu1 %2831, %v3195_v12   ;;  %v3551_v7 = vpop.permute.xlu0 %907  ;;  %v5507_v6 = vld [vmem:[#allocation13_spill] sm:$0xff] }
 0x142   : > { %5344 = vst [vmem:[#allocation93_spill] sm:$0xff] %v3551_v7  ;;  %1417 = vperm.xlu0 %2830, %v3198_v13   ;;  %v5505_v7 = vld [vmem:[#allocation10_spill] sm:$0xff] }
 0x144   : > { %v3554_v8 = vpop.permute.xlu1 %902 }
 0x145   : > { %5345 = vst [vmem:[#allocation94_spill] sm:$0xff] %v3554_v8  ;;  %1412 = vperm.xlu1 %2831, %v3201_v14   ;;  %v3557_v9 = vpop.permute.xlu0 %917  ;;  %v2383_v8 = vld [vmem:[#allocation2 + $0x112] sm:$0xff] }
 0x146   : > { %5346 = vst [vmem:[#allocation95_spill] sm:$0xff] %v3557_v9  ;;  %1427 = vperm.xlu0 %2830, %v3204_v15  }
 0x148   : > { %v3560_v10 = vpop.permute.xlu1 %912 }
 0x149   : > { %5347 = vst [vmem:[#allocation96_spill] sm:$0xff] %v3560_v10  ;;  %1422 = vperm.xlu1 %2831, %v3207_v16   ;;  %v3563_v11 = vpop.permute.xlu0 %927 }
 0x14a   : > { %5348 = vst [vmem:[#allocation97_spill] sm:$0xff] %v3563_v11  ;;  %1437 = vperm.xlu0 %2830, %v3210_v17  }
 0x14c   : > { %v3566_v12 = vpop.permute.xlu1 %922 }
 0x14d   : > { %5349 = vst [vmem:[#allocation98_spill] sm:$0xff] %v3566_v12  ;;  %1432 = vperm.xlu1 %2831, %v3213_v18   ;;  %v3569_v13 = vpop.permute.xlu0 %937 }
 0x14e   : > { %5350 = vst [vmem:[#allocation99_spill] sm:$0xff] %v3569_v13  ;;  %1447 = vperm.xlu0 %2830, %v3216_v19   ;;  %v5377_v13 = vld [vmem:[#allocation23_spill] sm:$0xff] }
 0x150   : > { %v3572_v14 = vpop.permute.xlu1 %932 }
 0x151   : > { %5351 = vst [vmem:[#allocation100_spill] sm:$0xff] %v3572_v14  ;;  %1442 = vperm.xlu1 %2831, %v3219_v20   ;;  %v3575_v15 = vpop.permute.xlu0 %947 }
 0x152   : > { %5352 = vst [vmem:[#allocation101_spill] sm:$0xff] %v3575_v15  ;;  %1457 = vperm.xlu0 %2830, %v3222_v21   ;;  %v5358_v15 = vld [vmem:[#allocation6_spill] sm:$0xff] }
 0x154   : > { %v3578_v16 = vpop.permute.xlu1 %942 }
 0x155   : > { %5353 = vst [vmem:[#allocation102_spill] sm:$0xff] %v3578_v16  ;;  %1452 = vperm.xlu1 %2831, %v3225_v22   ;;  %v3581_v17 = vpop.permute.xlu0 %957  ;;  %v5360_v16 = vld [vmem:[#allocation7_spill] sm:$0xff] }
 0x156   : > { %5354 = vst [vmem:[#allocation103_spill] sm:$0xff] %v3581_v17  ;;  %1467 = vperm.xlu0 %2830, %v3228_v23   ;;  %v5362_v17 = vld [vmem:[#allocation8_spill] sm:$0xff] }
 0x158   : > { %v3584_v18 = vpop.permute.xlu1 %952 }
 0x159   : > { %5355 = vst [vmem:[#allocation104_spill] sm:$0xff] %v3584_v18  ;;  %1462 = vperm.xlu1 %2831, %v3231_v24   ;;  %v3587_v19 = vpop.permute.xlu0 %967  ;;  %v5363_v18 = vld [vmem:[#allocation9_spill] sm:$0xff] }
 0x15a   : > { %5356 = vst [vmem:[#allocation105_spill] sm:$0xff] %v3587_v19  ;;  %1477 = vperm.xlu0 %2830, %v3234_v25   ;;  %v3604_v19 = vld [vmem:[#allocation2 + $0x181] sm:$0xff]  ;;  %v5365_v25 = vld [vmem:[#allocation11_spill] sm:$0xff] }
 0x15c   : > { %v3590_v20 = vpop.permute.xlu1 %962 }
 0x15d   : > { %5357 = vst [vmem:[#allocation106_spill] sm:$0xff] %v3590_v20  ;;  %1472 = vperm.xlu1 %2831, %v5358_v15   ;;  %v3593_v21 = vpop.permute.xlu0 %977 }
 0x15e   : > { %5359 = vst [vmem:[#allocation6_spill] sm:$0xff] %v3593_v21  ;;  %1487 = vperm.xlu0 %2830, %v5360_v16   ;;  %v5373_v21 = vld [vmem:[#allocation19_spill] sm:$0xff] }
 0x160   : > { %v3596_v22 = vpop.permute.xlu1 %972 }
 0x161   : > { %5361 = vst [vmem:[#allocation7_spill] sm:$0xff] %v3596_v22  ;;  %1482 = vperm.xlu1 %2831, %v5362_v17   ;;  %v3599_v23 = vpop.permute.xlu0 %987  ;;  %v3615_v17 = vld [vmem:[#allocation2 + $0x189] sm:$0xff] }
 0x162   : > { %1497 = vperm.xlu0 %2830, %v5363_v18   ;;  %v5368_v22 = vld [vmem:[#allocation14_spill] sm:$0xff] }
 0x164   : > { %v3602_v24 = vpop.permute.xlu1 %982 }
 0x165   : > { %5364 = vst [vmem:[#allocation8_spill] sm:$0xff] %v3602_v24  ;;  %1492 = vperm.xlu1 %2831, %v5365_v25   ;;  %v3607_v20 = vpop.permute.xlu0 %1097  ;;  %v5371_v25 = vld [vmem:[#allocation17_spill] sm:$0xff] }
 0x166   : > { %5366 = vst [vmem:[#allocation9_spill] sm:$0xff] %v3607_v20  ;;  %1507 = vperm.xlu0 %2830, %v3604_v19  }
 0x168   : > { %v3610_v15 = vpop.permute.xlu1 %992 }
 0x169   : > { %1502 = vperm.xlu1 %2831, %v3261_v30   ;;  %v3613_v16 = vpop.permute.xlu0 %1107  ;;  %v5375_v30 = vld [vmem:[#allocation21_spill] sm:$0xff] }
 0x16a   : > { %5367 = vst [vmem:[#allocation11_spill] sm:$0xff] %v3613_v16  ;;  %1617 = vperm.xlu0 %2830, %v5368_v22  }
 0x16c   : > { %v3618_v18 = vpop.permute.xlu1 %1102 }
 0x16d   : > { %5369 = vst [vmem:[#allocation14_spill] sm:$0xff] %v3618_v18  ;;  %1512 = vperm.xlu1 %2831, %v3615_v17   ;;  %v3621_v24 = vpop.permute.xlu0 %1117  ;;  %v5379_v18 = vld [vmem:[#allocation25_spill] sm:$0xff] }
 0x16e   : > { %5370 = vst [vmem:[#allocation107_spill] sm:$0xff] %v3621_v24  ;;  %1627 = vperm.xlu0 %2830, %v5371_v25   ;;  %v5381_v24 = vld [vmem:[#allocation27_spill] sm:$0xff] }
 0x170   : > { %v3624_v20 = vpop.permute.xlu1 %1112 }
 0x171   : > { %5372 = vst [vmem:[#allocation17_spill] sm:$0xff] %v3624_v20  ;;  %1622 = vperm.xlu1 %2831, %v5373_v21   ;;  %v3627_v14 = vpop.permute.xlu0 %1127  ;;  %v5383_v20 = vld [vmem:[#allocation29_spill] sm:$0xff] }
 0x172   : > { %5374 = vst [vmem:[#allocation19_spill] sm:$0xff] %v3627_v14  ;;  %1637 = vperm.xlu0 %2830, %v5375_v30   ;;  %v5385_v14 = vld [vmem:[#allocation31_spill] sm:$0xff] }
 0x174   : > { %v3630_v16 = vpop.permute.xlu1 %1122 }
 0x175   : > { %5376 = vst [vmem:[#allocation21_spill] sm:$0xff] %v3630_v16  ;;  %1632 = vperm.xlu1 %2831, %v5377_v13   ;;  %v3633_v22 = vpop.permute.xlu0 %1137  ;;  %v5387_v16 = vld [vmem:[#allocation33_spill] sm:$0xff] }
 0x176   : > { %5378 = vst [vmem:[#allocation23_spill] sm:$0xff] %v3633_v22  ;;  %1647 = vperm.xlu0 %2830, %v5379_v18   ;;  %v5389_v22 = vld [vmem:[#allocation35_spill] sm:$0xff] }
 0x178   : > { %v3636_v12 = vpop.permute.xlu1 %1132 }
 0x179   : > { %5380 = vst [vmem:[#allocation25_spill] sm:$0xff] %v3636_v12  ;;  %1642 = vperm.xlu1 %2831, %v5381_v24   ;;  %v3639_v25 = vpop.permute.xlu0 %1147  ;;  %v5391_v12 = vld [vmem:[#allocation37_spill] sm:$0xff] }
 0x17a   : > { %5382 = vst [vmem:[#allocation27_spill] sm:$0xff] %v3639_v25  ;;  %1657 = vperm.xlu0 %2830, %v5383_v20   ;;  %v5393_v25 = vld [vmem:[#allocation39_spill] sm:$0xff] }
 0x17c   : > { %v3642_v21 = vpop.permute.xlu1 %1142 }
 0x17d   : > { %5384 = vst [vmem:[#allocation29_spill] sm:$0xff] %v3642_v21  ;;  %1652 = vperm.xlu1 %2831, %v5385_v14   ;;  %v3645_v30 = vpop.permute.xlu0 %1157  ;;  %v5395_v21 = vld [vmem:[#allocation41_spill] sm:$0xff] }
 0x17e   : > { %5386 = vst [vmem:[#allocation31_spill] sm:$0xff] %v3645_v30  ;;  %1667 = vperm.xlu0 %2830, %v5387_v16   ;;  %v5397_v30 = vld [vmem:[#allocation43_spill] sm:$0xff] }
 0x180   : > { %v3648_v13 = vpop.permute.xlu1 %1152 }
 0x181   : > { %5388 = vst [vmem:[#allocation33_spill] sm:$0xff] %v3648_v13  ;;  %1662 = vperm.xlu1 %2831, %v5389_v22   ;;  %v3651_v18 = vpop.permute.xlu0 %1167  ;;  %v5399_v13 = vld [vmem:[#allocation45_spill] sm:$0xff] }
 0x182   : > { %5390 = vst [vmem:[#allocation35_spill] sm:$0xff] %v3651_v18  ;;  %1677 = vperm.xlu0 %2830, %v5391_v12   ;;  %v5401_v18 = vld [vmem:[#allocation47_spill] sm:$0xff] }
 0x184   : > { %v3654_v24 = vpop.permute.xlu1 %1162 }
 0x185   : > { %5392 = vst [vmem:[#allocation37_spill] sm:$0xff] %v3654_v24  ;;  %1672 = vperm.xlu1 %2831, %v5393_v25   ;;  %v3657_v20 = vpop.permute.xlu0 %1177  ;;  %v5403_v24 = vld [vmem:[#allocation49_spill] sm:$0xff] }
 0x186   : > { %5394 = vst [vmem:[#allocation39_spill] sm:$0xff] %v3657_v20  ;;  %1687 = vperm.xlu0 %2830, %v5395_v21   ;;  %v5405_v20 = vld [vmem:[#allocation51_spill] sm:$0xff] }
 0x188   : > { %v3660_v14 = vpop.permute.xlu1 %1172 }
 0x189   : > { %5396 = vst [vmem:[#allocation41_spill] sm:$0xff] %v3660_v14  ;;  %1682 = vperm.xlu1 %2831, %v5397_v30   ;;  %v3663_v16 = vpop.permute.xlu0 %1187  ;;  %v5407_v14 = vld [vmem:[#allocation53_spill] sm:$0xff] }
 0x18a   : > { %5398 = vst [vmem:[#allocation43_spill] sm:$0xff] %v3663_v16  ;;  %1697 = vperm.xlu0 %2830, %v5399_v13   ;;  %v5409_v16 = vld [vmem:[#allocation55_spill] sm:$0xff] }
 0x18c   : > { %v3666_v22 = vpop.permute.xlu1 %1182 }
 0x18d   : > { %5400 = vst [vmem:[#allocation45_spill] sm:$0xff] %v3666_v22  ;;  %1692 = vperm.xlu1 %2831, %v5401_v18   ;;  %v3669_v12 = vpop.permute.xlu0 %1197  ;;  %v5411_v22 = vld [vmem:[#allocation57_spill] sm:$0xff] }
 0x18e   : > { %5402 = vst [vmem:[#allocation47_spill] sm:$0xff] %v3669_v12  ;;  %1707 = vperm.xlu0 %2830, %v5403_v24   ;;  %v5413_v12 = vld [vmem:[#allocation59_spill] sm:$0xff] }
 0x190   : > { %v3672_v25 = vpop.permute.xlu1 %1192 }
 0x191   : > { %5404 = vst [vmem:[#allocation49_spill] sm:$0xff] %v3672_v25  ;;  %1702 = vperm.xlu1 %2831, %v5405_v20   ;;  %v3675_v21 = vpop.permute.xlu0 %1207  ;;  %v5415_v25 = vld [vmem:[#allocation61_spill] sm:$0xff] }
 0x192   : > { %5406 = vst [vmem:[#allocation51_spill] sm:$0xff] %v3675_v21  ;;  %1717 = vperm.xlu0 %2830, %v5407_v14   ;;  %v5417_v21 = vld [vmem:[#allocation63_spill] sm:$0xff] }
 0x194   : > { %v3678_v30 = vpop.permute.xlu1 %1202 }
 0x195   : > { %5408 = vst [vmem:[#allocation53_spill] sm:$0xff] %v3678_v30  ;;  %1712 = vperm.xlu1 %2831, %v5409_v16   ;;  %v3681_v13 = vpop.permute.xlu0 %1217  ;;  %v1849_v30 = vld [vmem:[#allocation2 + $0x68] sm:$0xff] }
 0x196   : > { %5410 = vst [vmem:[#allocation55_spill] sm:$0xff] %v3681_v13  ;;  %1727 = vperm.xlu0 %2830, %v5411_v22   ;;  %v5420_v13 = vld [vmem:[#allocation66_spill] sm:$0xff] }
 0x198   : > { %v3684_v18 = vpop.permute.xlu1 %1212 }
 0x199   : > { %5412 = vst [vmem:[#allocation57_spill] sm:$0xff] %v3684_v18  ;;  %1722 = vperm.xlu1 %2831, %v5413_v12   ;;  %v3687_v24 = vpop.permute.xlu0 %1227 }
 0x19a   : > { %5414 = vst [vmem:[#allocation59_spill] sm:$0xff] %v3687_v24  ;;  %1737 = vperm.xlu0 %2830, %v5415_v25   ;;  %v3704_v24 = vld [vmem:[#allocation2 + $0x182] sm:$0xff] }
 0x19c   : > { %v3690_v20 = vpop.permute.xlu1 %1222 }
 0x19d   : > { %5416 = vst [vmem:[#allocation61_spill] sm:$0xff] %v3690_v20  ;;  %1732 = vperm.xlu1 %2831, %v5417_v21   ;;  %v3693_v14 = vpop.permute.xlu0 %1237  ;;  %v1848_v20 = vld [vmem:[#allocation2 + $0x60] sm:$0xff] }
 0x19e   : > { %5418 = vst [vmem:[#allocation63_spill] sm:$0xff] %v3693_v14  ;;  %1747 = vperm.xlu0 %2830, %v3392_v38   ;;  %v1844_v38 = vld [vmem:[#allocation2 + $0x30] sm:$0xff] }
 0x1a0   : > { %v3696_v16 = vpop.permute.xlu1 %1232 }
 0x1a1   : > { %5419 = vst [vmem:[#allocation108_spill] sm:$0xff] %v3696_v16  ;;  %1742 = vperm.xlu1 %2831, %v5420_v13   ;;  %v3699_v22 = vpop.permute.xlu0 %1247  ;;  %v3715_v16 = vld [vmem:[#allocation2 + $0x18a] sm:$0xff] }
 0x1a2   : > { %1757 = vperm.xlu0 %2830, %v3402_v40  }
 0x1a4   : > { %v3702_v12 = vpop.permute.xlu1 %1242 }
 0x1a5   : > { %5421 = vst [vmem:[#allocation66_spill] sm:$0xff] %v3702_v12  ;;  %1752 = vperm.xlu1 %2831, %v3407_v34   ;;  %v3707_v25 = vpop.permute.xlu0 %1357  ;;  %v1846_v12 = vld [vmem:[#allocation2 + $0x48] sm:$0xff] }
 0x1a6   : > { %5422 = vst [vmem:[#allocation109_spill] sm:$0xff] %v3707_v25  ;;  %1767 = vperm.xlu0 %2830, %v3704_v24   ;;  %v1845_v25 = vld [vmem:[#allocation2 + $0x38] sm:$0xff] }
 0x1a8   : > { %v3710_v21 = vpop.permute.xlu1 %1252 }
 0x1a9   : > { %1762 = vperm.xlu1 %2831, %v3415_v29   ;;  %v3713_v13 = vpop.permute.xlu0 %1367  ;;  %v1847_v29 = vld [vmem:[#allocation2 + $0x50] sm:$0xff] }
 0x1aa   : > { %5423 = vst [vmem:[#allocation110_spill] sm:$0xff] %v3713_v13  ;;  %1878 = vperm.xlu0 %2830, %v1844_v38   ;;  %v1850_v38 = vld [vmem:[#allocation2 + $0x78] sm:$0xff] }
 0x1ac   : > { %v3717_v40 = vpop.permute.xlu1 %1362 }
 0x1ad   : > { %5424 = vst [vmem:[#allocation111_spill] sm:$0xff] %v3717_v40  ;;  %1772 = vperm.xlu1 %2831, %v3715_v16   ;;  %v3720_v34 = vpop.permute.xlu0 %1377 }
 0x1ae   : > { %5425 = vst [vmem:[#allocation112_spill] sm:$0xff] %v3720_v34  ;;  %1888 = vperm.xlu0 %2830, %v1846_v12   ;;  %v1852_v34 = vld [vmem:[#allocation2 + $0x90] sm:$0xff] }
 0x1b0   : > { %v3722_v14 = vpop.permute.xlu1 %1372 }
 0x1b1   : > { %5426 = vst [vmem:[#allocation113_spill] sm:$0xff] %v3722_v14  ;;  %1883 = vperm.xlu1 %2831, %v1845_v25   ;;  %v3724_v18 = vpop.permute.xlu0 %1387  ;;  %v1851_v14 = vld [vmem:[#allocation2 + $0x80] sm:$0xff] }
 0x1b2   : > { %5427 = vst [vmem:[#allocation114_spill] sm:$0xff] %v3724_v18  ;;  %1898 = vperm.xlu0 %2830, %v1848_v20   ;;  %v1854_v18 = vld [vmem:[#allocation2 + $0xa8] sm:$0xff] }
 0x1b4   : > { %v3726_v13 = vpop.permute.xlu1 %1382 }
 0x1b5   : > { %5428 = vst [vmem:[#allocation115_spill] sm:$0xff] %v3726_v13  ;;  %1893 = vperm.xlu1 %2831, %v1847_v29   ;;  %v3728_v40 = vpop.permute.xlu0 %1397  ;;  %v1853_v13 = vld [vmem:[#allocation2 + $0x98] sm:$0xff] }
 0x1b6   : > { %5429 = vst [vmem:[#allocation116_spill] sm:$0xff] %v3728_v40  ;;  %1908 = vperm.xlu0 %2830, %v1850_v38   ;;  %v1856_v40 = vld [vmem:[#allocation2 + $0xc0] sm:$0xff] }
 0x1b8   : > { %v3730_v11 = vpop.permute.xlu1 %1392 }
 0x1b9   : > { %5430 = vst [vmem:[#allocation117_spill] sm:$0xff] %v3730_v11  ;;  %1903 = vperm.xlu1 %2831, %v1849_v30   ;;  %v3732_v12 = vpop.permute.xlu0 %1407  ;;  %v1855_v11 = vld [vmem:[#allocation2 + $0xb0] sm:$0xff] }
 0x1ba   : > { %5431 = vst [vmem:[#allocation118_spill] sm:$0xff] %v3732_v12  ;;  %1918 = vperm.xlu0 %2830, %v1852_v34   ;;  %v1858_v12 = vld [vmem:[#allocation2 + $0xd8] sm:$0xff] }
 0x1bc   : > { %v3734_v25 = vpop.permute.xlu1 %1402 }
 0x1bd   : > { %5432 = vst [vmem:[#allocation119_spill] sm:$0xff] %v3734_v25  ;;  %1913 = vperm.xlu1 %2831, %v1851_v14   ;;  %v3736_v20 = vpop.permute.xlu0 %1417  ;;  %v1857_v25 = vld [vmem:[#allocation2 + $0xc8] sm:$0xff] }
 0x1be   : > { %5433 = vst [vmem:[#allocation120_spill] sm:$0xff] %v3736_v20  ;;  %1928 = vperm.xlu0 %2830, %v1854_v18   ;;  %v1860_v20 = vld [vmem:[#allocation2 + $0xf0] sm:$0xff] }
 0x1c0   : > { %v3738_v29 = vpop.permute.xlu1 %1412 }
 0x1c1   : > { %5434 = vst [vmem:[#allocation121_spill] sm:$0xff] %v3738_v29  ;;  %1923 = vperm.xlu1 %2831, %v1853_v13   ;;  %v3740_v38 = vpop.permute.xlu0 %1427  ;;  %v1859_v29 = vld [vmem:[#allocation2 + $0xe0] sm:$0xff] }
 0x1c2   : > { %5435 = vst [vmem:[#allocation122_spill] sm:$0xff] %v3740_v38  ;;  %1938 = vperm.xlu0 %2830, %v1856_v40   ;;  %v1862_v38 = vld [vmem:[#allocation2 + $0x108] sm:$0xff] }
 0x1c4   : > { %v3742_v30 = vpop.permute.xlu1 %1422 }
 0x1c5   : > { %5436 = vst [vmem:[#allocation123_spill] sm:$0xff] %v3742_v30  ;;  %1933 = vperm.xlu1 %2831, %v1855_v11   ;;  %v3744_v34 = vpop.permute.xlu0 %1437  ;;  %v1861_v30 = vld [vmem:[#allocation2 + $0xf8] sm:$0xff] }
 0x1c6   : > { %5437 = vst [vmem:[#allocation124_spill] sm:$0xff] %v3744_v34  ;;  %1948 = vperm.xlu0 %2830, %v1858_v12   ;;  %v1864_v34 = vld [vmem:[#allocation2 + $0x120] sm:$0xff] }
 0x1c8   : > { %v3746_v14 = vpop.permute.xlu1 %1432 }
 0x1c9   : > { %5438 = vst [vmem:[#allocation125_spill] sm:$0xff] %v3746_v14  ;;  %1943 = vperm.xlu1 %2831, %v1857_v25   ;;  %v3748_v18 = vpop.permute.xlu0 %1447  ;;  %v1863_v14 = vld [vmem:[#allocation2 + $0x110] sm:$0xff] }
 0x1ca   : > { %5439 = vst [vmem:[#allocation126_spill] sm:$0xff] %v3748_v18  ;;  %1958 = vperm.xlu0 %2830, %v1860_v20   ;;  %v1866_v18 = vld [vmem:[#allocation2 + $0x138] sm:$0xff] }
 0x1cc   : > { %v3750_v13 = vpop.permute.xlu1 %1442 }
 0x1cd   : > { %5440 = vst [vmem:[#allocation127_spill] sm:$0xff] %v3750_v13  ;;  %1953 = vperm.xlu1 %2831, %v1859_v29   ;;  %v3752_v40 = vpop.permute.xlu0 %1457  ;;  %v1865_v13 = vld [vmem:[#allocation2 + $0x128] sm:$0xff] }
 0x1ce   : > { %5441 = vst [vmem:[#allocation128_spill] sm:$0xff] %v3752_v40  ;;  %1968 = vperm.xlu0 %2830, %v1862_v38   ;;  %v1868_v40 = vld [vmem:[#allocation2 + $0x150] sm:$0xff] }
 0x1d0   : > { %v3754_v11 = vpop.permute.xlu1 %1452 }
 0x1d1   : > { %5442 = vst [vmem:[#allocation129_spill] sm:$0xff] %v3754_v11  ;;  %1963 = vperm.xlu1 %2831, %v1861_v30   ;;  %v3756_v12 = vpop.permute.xlu0 %1467  ;;  %v1867_v11 = vld [vmem:[#allocation2 + $0x140] sm:$0xff] }
 0x1d2   : > { %5443 = vst [vmem:[#allocation130_spill] sm:$0xff] %v3756_v12  ;;  %1978 = vperm.xlu0 %2830, %v1864_v34   ;;  %v1870_v12 = vld [vmem:[#allocation2 + $0x168] sm:$0xff] }
 0x1d4   : > { %v3758_v25 = vpop.permute.xlu1 %1462 }
 0x1d5   : > { %5444 = vst [vmem:[#allocation131_spill] sm:$0xff] %v3758_v25  ;;  %1973 = vperm.xlu1 %2831, %v1863_v14   ;;  %v3760_v20 = vpop.permute.xlu0 %1477  ;;  %v1869_v25 = vld [vmem:[#allocation2 + $0x158] sm:$0xff] }
 0x1d6   : > { %5445 = vst [vmem:[#allocation132_spill] sm:$0xff] %v3760_v20  ;;  %1988 = vperm.xlu0 %2830, %v1866_v18   ;;  %v2107_v20 = vld [vmem:[#allocation2 + $0x51] sm:$0xff] }
 0x1d8   : > { %v3762_v29 = vpop.permute.xlu1 %1472 }
 0x1d9   : > { %5446 = vst [vmem:[#allocation133_spill] sm:$0xff] %v3762_v29  ;;  %1983 = vperm.xlu1 %2831, %v1865_v13   ;;  %v3764_v38 = vpop.permute.xlu0 %1487  ;;  %v1871_v29 = vld [vmem:[#allocation2 + $0x170] sm:$0xff] }
 0x1da   : > { %5447 = vst [vmem:[#allocation134_spill] sm:$0xff] %v3764_v38  ;;  %1998 = vperm.xlu0 %2830, %v1868_v40   ;;  %v1874_v38 = vld [vmem:[#allocation2 + $0x198] sm:$0xff] }
 0x1dc   : > { %v3766_v30 = vpop.permute.xlu1 %1482 }
 0x1dd   : > { %5448 = vst [vmem:[#allocation135_spill] sm:$0xff] %v3766_v30  ;;  %1993 = vperm.xlu1 %2831, %v1867_v11   ;;  %v3768_v34 = vpop.permute.xlu0 %1497  ;;  %v2106_v30 = vld [vmem:[#allocation2 + $0x49] sm:$0xff] }
 0x1de   : > { %5449 = vst [vmem:[#allocation136_spill] sm:$0xff] %v3768_v34  ;;  %2008 = vperm.xlu0 %2830, %v1870_v12   ;;  %v2104_v34 = vld [vmem:[#allocation2 + $0x31] sm:$0xff] }
 0x1e0   : > { %v3770_v14 = vpop.permute.xlu1 %1492 }
 0x1e1   : > { %5450 = vst [vmem:[#allocation137_spill] sm:$0xff] %v3770_v14  ;;  %2003 = vperm.xlu1 %2831, %v1869_v25   ;;  %v3772_v18 = vpop.permute.xlu0 %1507  ;;  %v1875_v25 = vld [vmem:[#allocation2 + $0x1a0] sm:$0xff] }
 0x1e2   : > { %2018 = vperm.xlu0 %2830, %v3504_v51  }
 0x1e4   : > { %v3775_v13 = vpop.permute.xlu1 %1502 }
 0x1e5   : > { %5451 = vst [vmem:[#allocation138_spill] sm:$0xff] %v3775_v13  ;;  %2013 = vperm.xlu1 %2831, %v1871_v29   ;;  %v3777_v40 = vpop.permute.xlu0 %1617  ;;  %v2105_v13 = vld [vmem:[#allocation2 + $0x39] sm:$0xff] }
 0x1e6   : > { %5452 = vst [vmem:[#allocation139_spill] sm:$0xff] %v3777_v40  ;;  %2028 = vperm.xlu0 %2830, %v1874_v38   ;;  %v2108_v38 = vld [vmem:[#allocation2 + $0x61] sm:$0xff] }
 0x1e8   : > { %v3779_v11 = vpop.permute.xlu1 %1512 }
 0x1e9   : > { %2023 = vperm.xlu1 %2831, %v3515_v60   ;;  %v3782_v12 = vpop.permute.xlu0 %1627 }
 0x1ea   : > { %5453 = vst [vmem:[#allocation140_spill] sm:$0xff] %v3782_v12  ;;  %2138 = vperm.xlu0 %2830, %v2104_v34   ;;  %v2110_v12 = vld [vmem:[#allocation2 + $0x79] sm:$0xff] }
 0x1ec   : > { %v3784_v14 = vpop.permute.xlu1 %1622 }
 0x1ed   : > { %5454 = vst [vmem:[#allocation141_spill] sm:$0xff] %v3784_v14  ;;  %2033 = vperm.xlu1 %2831, %v1875_v25   ;;  %v3786_v51 = vpop.permute.xlu0 %1637  ;;  %v2109_v14 = vld [vmem:[#allocation2 + $0x69] sm:$0xff] }
 0x1ee   : > { %5455 = vst [vmem:[#allocation142_spill] sm:$0xff] %v3786_v51  ;;  %2148 = vperm.xlu0 %2830, %v2106_v30   ;;  %v2112_v51 = vld [vmem:[#allocation2 + $0x91] sm:$0xff] }
 0x1f0   : > { %v3788_v29 = vpop.permute.xlu1 %1632 }
 0x1f1   : > { %5456 = vst [vmem:[#allocation143_spill] sm:$0xff] %v3788_v29  ;;  %2143 = vperm.xlu1 %2831, %v2105_v13   ;;  %v3790_v40 = vpop.permute.xlu0 %1647  ;;  %v2111_v29 = vld [vmem:[#allocation2 + $0x81] sm:$0xff] }
 0x1f2   : > { %5457 = vst [vmem:[#allocation144_spill] sm:$0xff] %v3790_v40  ;;  %2158 = vperm.xlu0 %2830, %v2108_v38   ;;  %v2114_v40 = vld [vmem:[#allocation2 + $0xa9] sm:$0xff] }
 0x1f4   : > { %v3792_v60 = vpop.permute.xlu1 %1642 }
 0x1f5   : > { %5458 = vst [vmem:[#allocation145_spill] sm:$0xff] %v3792_v60  ;;  %2153 = vperm.xlu1 %2831, %v2107_v20   ;;  %v3794_v34 = vpop.permute.xlu0 %1657  ;;  %v2113_v60 = vld [vmem:[#allocation2 + $0x99] sm:$0xff] }
 0x1f6   : > { %5459 = vst [vmem:[#allocation146_spill] sm:$0xff] %v3794_v34  ;;  %2168 = vperm.xlu0 %2830, %v2110_v12   ;;  %v2116_v34 = vld [vmem:[#allocation2 + $0xc1] sm:$0xff] }
 0x1f8   : > { %v3796_v25 = vpop.permute.xlu1 %1652 }
 0x1f9   : > { %5460 = vst [vmem:[#allocation147_spill] sm:$0xff] %v3796_v25  ;;  %2163 = vperm.xlu1 %2831, %v2109_v14   ;;  %v3798_v30 = vpop.permute.xlu0 %1667  ;;  %v2115_v25 = vld [vmem:[#allocation2 + $0xb1] sm:$0xff] }
 0x1fa   : > { %5461 = vst [vmem:[#allocation148_spill] sm:$0xff] %v3798_v30  ;;  %2178 = vperm.xlu0 %2830, %v2112_v51   ;;  %v2118_v30 = vld [vmem:[#allocation2 + $0xd9] sm:$0xff] }
 0x1fc   : > { %v3800_v13 = vpop.permute.xlu1 %1662 }
 0x1fd   : > { %5462 = vst [vmem:[#allocation149_spill] sm:$0xff] %v3800_v13  ;;  %2173 = vperm.xlu1 %2831, %v2111_v29   ;;  %v3802_v38 = vpop.permute.xlu0 %1677  ;;  %v2117_v13 = vld [vmem:[#allocation2 + $0xc9] sm:$0xff] }
 0x1fe   : > { %5463 = vst [vmem:[#allocation150_spill] sm:$0xff] %v3802_v38  ;;  %2188 = vperm.xlu0 %2830, %v2114_v40   ;;  %v2120_v38 = vld [vmem:[#allocation2 + $0xf1] sm:$0xff] }
 0x200   : > { %v3804_v20 = vpop.permute.xlu1 %1672 }
 0x201   : > { %5464 = vst [vmem:[#allocation151_spill] sm:$0xff] %v3804_v20  ;;  %2183 = vperm.xlu1 %2831, %v2113_v60   ;;  %v3806_v12 = vpop.permute.xlu0 %1687  ;;  %v2119_v20 = vld [vmem:[#allocation2 + $0xe1] sm:$0xff] }
 0x202   : > { %5465 = vst [vmem:[#allocation152_spill] sm:$0xff] %v3806_v12  ;;  %2198 = vperm.xlu0 %2830, %v2116_v34   ;;  %v2122_v12 = vld [vmem:[#allocation2 + $0x109] sm:$0xff] }
 0x204   : > { %v3808_v14 = vpop.permute.xlu1 %1682 }
 0x205   : > { %5466 = vst [vmem:[#allocation153_spill] sm:$0xff] %v3808_v14  ;;  %2193 = vperm.xlu1 %2831, %v2115_v25   ;;  %v3810_v51 = vpop.permute.xlu0 %1697  ;;  %v2121_v14 = vld [vmem:[#allocation2 + $0xf9] sm:$0xff] }
 0x206   : > { %5467 = vst [vmem:[#allocation154_spill] sm:$0xff] %v3810_v51  ;;  %2208 = vperm.xlu0 %2830, %v2118_v30   ;;  %v2124_v51 = vld [vmem:[#allocation2 + $0x121] sm:$0xff] }
 0x208   : > { %v3812_v29 = vpop.permute.xlu1 %1692 }
 0x209   : > { %5468 = vst [vmem:[#allocation155_spill] sm:$0xff] %v3812_v29  ;;  %2203 = vperm.xlu1 %2831, %v2117_v13   ;;  %v3814_v40 = vpop.permute.xlu0 %1707  ;;  %v2123_v29 = vld [vmem:[#allocation2 + $0x111] sm:$0xff] }
 0x20a   : > { %5469 = vst [vmem:[#allocation156_spill] sm:$0xff] %v3814_v40  ;;  %2218 = vperm.xlu0 %2830, %v2120_v38   ;;  %v2126_v40 = vld [vmem:[#allocation2 + $0x139] sm:$0xff] }
 0x20c   : > { %v3816_v60 = vpop.permute.xlu1 %1702 }
 0x20d   : > { %5470 = vst [vmem:[#allocation157_spill] sm:$0xff] %v3816_v60  ;;  %2213 = vperm.xlu1 %2831, %v2119_v20   ;;  %v3818_v34 = vpop.permute.xlu0 %1717  ;;  %v2125_v60 = vld [vmem:[#allocation2 + $0x129] sm:$0xff] }
 0x20e   : > { %5471 = vst [vmem:[#allocation158_spill] sm:$0xff] %v3818_v34  ;;  %2228 = vperm.xlu0 %2830, %v2122_v12   ;;  %v2128_v34 = vld [vmem:[#allocation2 + $0x151] sm:$0xff] }
 0x210   : > { %v3820_v25 = vpop.permute.xlu1 %1712 }
 0x211   : > { %5472 = vst [vmem:[#allocation159_spill] sm:$0xff] %v3820_v25  ;;  %2223 = vperm.xlu1 %2831, %v2121_v14   ;;  %v3822_v30 = vpop.permute.xlu0 %1727  ;;  %v2127_v25 = vld [vmem:[#allocation2 + $0x141] sm:$0xff] }
 0x212   : > { %5473 = vst [vmem:[#allocation160_spill] sm:$0xff] %v3822_v30  ;;  %2238 = vperm.xlu0 %2830, %v2124_v51   ;;  %v2130_v30 = vld [vmem:[#allocation2 + $0x169] sm:$0xff] }
 0x214   : > { %v3824_v13 = vpop.permute.xlu1 %1722 }
 0x215   : > { %5474 = vst [vmem:[#allocation161_spill] sm:$0xff] %v3824_v13  ;;  %2233 = vperm.xlu1 %2831, %v2123_v29   ;;  %v3826_v38 = vpop.permute.xlu0 %1737  ;;  %v2129_v13 = vld [vmem:[#allocation2 + $0x159] sm:$0xff] }
 0x216   : > { %5475 = vst [vmem:[#allocation162_spill] sm:$0xff] %v3826_v38  ;;  %2248 = vperm.xlu0 %2830, %v2126_v40  }
 0x218   : > { %v3828_v20 = vpop.permute.xlu1 %1732 }
 0x219   : > { %5476 = vst [vmem:[#allocation163_spill] sm:$0xff] %v3828_v20  ;;  %2243 = vperm.xlu1 %2831, %v2125_v60   ;;  %v3830_v12 = vpop.permute.xlu0 %1747  ;;  %v2131_v20 = vld [vmem:[#allocation2 + $0x171] sm:$0xff] }
 0x21a   : > { %5477 = vst [vmem:[#allocation164_spill] sm:$0xff] %v3830_v12  ;;  %2258 = vperm.xlu0 %2830, %v2128_v34   ;;  %v2134_v12 = vld [vmem:[#allocation2 + $0x199] sm:$0xff] }
 0x21c   : > { %v3832_v14 = vpop.permute.xlu1 %1742 }
 0x21d   : > { %5478 = vst [vmem:[#allocation165_spill] sm:$0xff] %v3832_v14  ;;  %2253 = vperm.xlu1 %2831, %v2127_v25   ;;  %v3834_v51 = vpop.permute.xlu0 %1757  ;;  %v2366_v14 = vld [vmem:[#allocation2 + $0x4a] sm:$0xff] }
 0x21e   : > { %5479 = vst [vmem:[#allocation166_spill] sm:$0xff] %v3834_v51  ;;  %2268 = vperm.xlu0 %2830, %v2130_v30   ;;  %v2364_v51 = vld [vmem:[#allocation2 + $0x32] sm:$0xff] }
 0x220   : > { %v3836_v29 = vpop.permute.xlu1 %1752 }
 0x221   : > { %5480 = vst [vmem:[#allocation167_spill] sm:$0xff] %v3836_v29  ;;  %2263 = vperm.xlu1 %2831, %v2129_v13   ;;  %v3838_v40 = vpop.permute.xlu0 %1767  ;;  %v2135_v13 = vld [vmem:[#allocation2 + $0x1a1] sm:$0xff] }
 0x222   : > { %2278 = vperm.xlu0 %2830, %v3604_v19  }
 0x224   : > { %v3841_v60 = vpop.permute.xlu1 %1762 }
 0x225   : > { %5481 = vst [vmem:[#allocation168_spill] sm:$0xff] %v3841_v60  ;;  %2273 = vperm.xlu1 %2831, %v2131_v20   ;;  %v3843_v34 = vpop.permute.xlu0 %1878  ;;  %v2365_v60 = vld [vmem:[#allocation2 + $0x3a] sm:$0xff] }
 0x226   : > { %5482 = vst [vmem:[#allocation169_spill] sm:$0xff] %v3843_v34  ;;  %2288 = vperm.xlu0 %2830, %v2134_v12   ;;  %v2368_v12 = vld [vmem:[#allocation2 + $0x62] sm:$0xff]  ;;  %v2367_v34 = vld [vmem:[#allocation2 + $0x52] sm:$0xff] }
 0x228   : > { %v3845_v25 = vpop.permute.xlu1 %1772 }
 0x229   : > { %2283 = vperm.xlu1 %2831, %v3615_v17   ;;  %v3848_v30 = vpop.permute.xlu0 %1888 }
 0x22a   : > { %5483 = vst [vmem:[#allocation170_spill] sm:$0xff] %v3848_v30  ;;  %2398 = vperm.xlu0 %2830, %v2364_v51   ;;  %v2370_v30 = vld [vmem:[#allocation2 + $0x7a] sm:$0xff] }
 0x22c   : > { %v3850_v29 = vpop.permute.xlu1 %1883 }
 0x22d   : > { %5484 = vst [vmem:[#allocation171_spill] sm:$0xff] %v3850_v29  ;;  %2293 = vperm.xlu1 %2831, %v2135_v13   ;;  %v3852_v19 = vpop.permute.xlu0 %1898  ;;  %v2369_v29 = vld [vmem:[#allocation2 + $0x6a] sm:$0xff] }
 0x22e   : > { %5485 = vst [vmem:[#allocation172_spill] sm:$0xff] %v3852_v19  ;;  %2408 = vperm.xlu0 %2830, %v2366_v14   ;;  %v2372_v19 = vld [vmem:[#allocation2 + $0x92] sm:$0xff] }
 0x230   : > { %v3854_v20 = vpop.permute.xlu1 %1893 }
 0x231   : > { %5486 = vst [vmem:[#allocation173_spill] sm:$0xff] %v3854_v20  ;;  %2403 = vperm.xlu1 %2831, %v2365_v60   ;;  %v3856_v38 = vpop.permute.xlu0 %1908  ;;  %v2371_v20 = vld [vmem:[#allocation2 + $0x82] sm:$0xff] }
 0x232   : > { %5487 = vst [vmem:[#allocation174_spill] sm:$0xff] %v3856_v38  ;;  %2418 = vperm.xlu0 %2830, %v2368_v12   ;;  %v2374_v38 = vld [vmem:[#allocation2 + $0xaa] sm:$0xff] }
 0x234   : > { %v3858_v17 = vpop.permute.xlu1 %1903 }
 0x235   : > { %5488 = vst [vmem:[#allocation175_spill] sm:$0xff] %v3858_v17  ;;  %2413 = vperm.xlu1 %2831, %v2367_v34   ;;  %v3860_v51 = vpop.permute.xlu0 %1918  ;;  %v2373_v17 = vld [vmem:[#allocation2 + $0x9a] sm:$0xff] }
 0x236   : > { %5489 = vst [vmem:[#allocation176_spill] sm:$0xff] %v3860_v51  ;;  %2428 = vperm.xlu0 %2830, %v2370_v30   ;;  %v2376_v51 = vld [vmem:[#allocation2 + $0xc2] sm:$0xff] }
 0x238   : > { %v3862_v13 = vpop.permute.xlu1 %1913 }
 0x239   : > { %5490 = vst [vmem:[#allocation177_spill] sm:$0xff] %v3862_v13  ;;  %2423 = vperm.xlu1 %2831, %v2369_v29   ;;  %v3864_v14 = vpop.permute.xlu0 %1928  ;;  %v2375_v13 = vld [vmem:[#allocation2 + $0xb2] sm:$0xff]  ;;  %v475_v29 = vlaneseq }
 0x23a   : > { %5491 = vst [vmem:[#allocation178_spill] sm:$0xff] %v3864_v14  ;;  %2438 = vperm.xlu0 %2830, %v2372_v19   ;;  %v2378_v19 = vld [vmem:[#allocation2 + $0xda] sm:$0xff] }
 0x23b   : > { %v3878_v10 = vshrl.u32 %v475_v29, 7  ;;  %v2382_v29 = vld [vmem:[#allocation2 + $0x10a] sm:$0xff] }
 0x23c   : > { %v3866_v60 = vpop.permute.xlu1 %1923 }
 0x23d   : > { %5492 = vst [vmem:[#allocation179_spill] sm:$0xff] %v3866_v60  ;;  %2433 = vperm.xlu1 %2831, %v2371_v20   ;;  %v3868_v12 = vpop.permute.xlu0 %1938  ;;  %v2377_v20 = vld [vmem:[#allocation2 + $0xca] sm:$0xff]  ;;  %5498 = vst [vmem:[#allocation185_spill] sm:$0xff] %v3878_v10 }
 0x23e   : > { %5493 = vst [vmem:[#allocation180_spill] sm:$0xff] %v3868_v12  ;;  %2448 = vperm.xlu0 %2830, %v2374_v38   ;;  %v477_v12 = vsub.s32 0, %v3878_v10 }
 0x240   : > { %v3870_v34 = vpop.permute.xlu1 %1933 }
 0x241   : > { %5494 = vst [vmem:[#allocation181_spill] sm:$0xff] %v3870_v34  ;;  %2443 = vperm.xlu1 %2831, %v2373_v17   ;;  %v3872_v30 = vpop.permute.xlu0 %1948  ;;  %v2380_v34 = vld [vmem:[#allocation2 + $0xf2] sm:$0xff] }
 0x242   : > { %5495 = vst [vmem:[#allocation182_spill] sm:$0xff] %v3872_v30  ;;  %2458 = vperm.xlu0 %2830, %v2376_v51   ;;  %v2379_v30 = vld [vmem:[#allocation2 + $0xe2] sm:$0xff] }
 0x243   : > { %v3888_v51 = vld [vmem:[%s5220_s1] sm:$0xff] }
 0x244   : > { %v3874_v14 = vpop.permute.xlu1 %1943 }
 0x245   : > { %5496 = vst [vmem:[#allocation183_spill] sm:$0xff] %v3874_v14  ;;  %2453 = vperm.xlu1 %2831, %v2375_v13   ;;  %v3876_v60 = vpop.permute.xlu0 %1958  ;;  %v2384_v14 = vld [vmem:[#allocation2 + $0x122] sm:$0xff] }
 0x246   : > { %5497 = vst [vmem:[#allocation184_spill] sm:$0xff] %v3876_v60  ;;  %2468 = vperm.xlu0 %2830, %v2378_v19   ;;  %v737_v19 = vsub.s32 1, %v3878_v10  ;;  %v3897_v60 = vrot.slane %v3888_v51, %v477_v12  ;;  %v5506_v12 = vld [vmem:[#allocation12_spill] sm:$0xff] }
 0x248   : > { %v3880_v38 = vpop.permute.xlu1 %1953  ;;  %v3902_v9 = vrot.slane %v3888_v51, %v737_v19 }
 0x249   : > { %5499 = vst [vmem:[#allocation186_spill] sm:$0xff] %v3880_v38  ;;  %2463 = vperm.xlu1 %2831, %v2377_v20   ;;  %v3882_v17 = vpop.permute.xlu0 %1968  ;;  %v997_v38 = vsub.s32 2, %v3878_v10 }
 0x24a   : > { %5500 = vst [vmem:[#allocation187_spill] sm:$0xff] %v3882_v17  ;;  %2478 = vperm.xlu0 %2830, %v2380_v34   ;;  %v2381_v17 = vld [vmem:[#allocation2 + $0xfa] sm:$0xff] }
 0x24c   : > { %v3890_v13 = vpop.permute.xlu1 %1963 }
 0x24d   : > { %5501 = vst [vmem:[#allocation188_spill] sm:$0xff] %v3890_v13  ;;  %2473 = vperm.xlu1 %2831, %v2379_v30   ;;  %v3894_v20 = vpop.permute.xlu0 %1978  ;;  %v3905_v30 = vrot.slane %v3888_v51, %v997_v38  ;;  %v5509_v38 = vld [vmem:[#allocation16_spill] sm:$0xff] }
 0x24e   : > { %5502 = vst [vmem:[#allocation189_spill] sm:$0xff] %v3894_v20  ;;  %2488 = vperm.xlu0 %2830, %v2382_v29   ;;  %v3911_v20 = vmul.f32 %v3897_v60, %v5505_v7  ;;  %v479_v29 = vmul.f32 %v3897_v60, %v5506_v12  ;;  %v3929_v7 = vmul.f32 %v3897_v60, %v5510_v5  ;;  %v5516_v5 = vld [vmem:[#allocation28_spill] sm:$0xff] }
 0x24f   : > { %v3933_v12 = vmul.f32 %v3897_v60, %v5511_v4  ;;  %v3951_v57 = vmul.f32 %v3897_v60, %v5516_v5  ;;  %v1257_v4 = vsub.s32 3, %v3878_v10 }
 0x250   : > { %v3899_v34 = vpop.permute.xlu1 %1973 }
 0x251   : > { %5503 = vst [vmem:[#allocation190_spill] sm:$0xff] %v3899_v34  ;;  %2483 = vperm.xlu1 %2831, %v2381_v17   ;;  %v3907_v13 = vpop.permute.xlu0 %1988  ;;  %v3917_v34 = vmul.f32 %v3897_v60, %v5507_v6  ;;  %v5508_v17 = vld [vmem:[#allocation15_spill] sm:$0xff]  ;;  %v3937_v6 = vmul.f32 %v3897_v60, %v5512_v3  ;;  %v5517_v3 = vld [vmem:[#allocation30_spill] sm:$0xff] }
 0x252   : > { %5504 = vst [vmem:[#allocation191_spill] sm:$0xff] %v3907_v13  ;;  %v3921_v19 = vmul.f32 %v3897_v60, %v5508_v17  ;;  %2498 = vperm.xlu0 %2830, %v2384_v14   ;;  %v3925_v13 = vmul.f32 %v3897_v60, %v5509_v38  ;;  %v2386_v17 = vld [vmem:[#allocation2 + $0x13a] sm:$0xff]  ;;  %v5515_v38 = vld [vmem:[#allocation26_spill] sm:$0xff]  ;;  %v3956_v62 = vmul.f32 %v3897_v60, %v5517_v3 }
 0x253   : > { %v5514_v14 = vld [vmem:[#allocation24_spill] sm:$0xff]  ;;  %v3947_v0 = vmul.f32 %v3897_v60, %v5515_v38 }
 0x254   : > { %v3939_v61 = vpop.permute.xlu1 %1983  ;;  %v3943_v1 = vmul.f32 %v3897_v60, %v5514_v14  ;;  %5518 = vst [vmem:[#allocation12_spill] sm:$0xff] %v3956_v62  ;;  %v5521_v14 = vld [vmem:[#allocation34_spill] sm:$0xff]  ;;  %v5523_v38 = vld [vmem:[#allocation36_spill] sm:$0xff] }
 0x255   : > { %5513 = vst [vmem:[#allocation10_spill] sm:$0xff] %v3939_v61  ;;  %2493 = vperm.xlu1 %2831, %v2383_v8   ;;  %v5519_v61 = vld [vmem:[#allocation32_spill] sm:$0xff]  ;;  %v3964_v59 = vmul.f32 %v3897_v60, %v5521_v14  ;;  %v3968_v54 = vmul.f32 %v3897_v60, %v5523_v38  ;;  %v3970_v5 = vpop.permute.xlu0 %1998  ;;  %v5526_v8 = vld [vmem:[#allocation38_spill] sm:$0xff]  ;;  %v1517_v14 = vsub.s32 4, %v3878_v10  ;;  %v3985_v38 = vmul.f32 %v3897_v60, %v5530_v49 }
 0x256   : > { %v3960_v56 = vmul.f32 %v3897_v60, %v5519_v61  ;;  %5525 = vst [vmem:[#allocation18_spill] sm:$0xff] %v3970_v5  ;;  %v3974_v52 = vmul.f32 %v3897_v60, %v5526_v8  ;;  %v5528_v3 = vld [vmem:[#allocation40_spill] sm:$0xff]  ;;  %v769_v61 = vmul.f32 %v3902_v9, %v3499_v55  ;;  %2508 = vperm.xlu0 %2830, %v2386_v17   ;;  %v5534_v8 = vld [vmem:[#allocation46_spill] sm:$0xff]  ;;  %v5539_v17 = vld [vmem:[#allocation65_spill] sm:$0xff] }
 0x257   : > { %5522 = vst [vmem:[#allocation15_spill] sm:$0xff] %v3964_v59  ;;  %5524 = vst [vmem:[#allocation16_spill] sm:$0xff] %v3968_v54  ;;  %v3978_v50 = vmul.f32 %v3897_v60, %v5528_v3  ;;  %v5532_v5 = vld [vmem:[#allocation44_spill] sm:$0xff]  ;;  %v2388_v59 = vld [vmem:[#allocation2 + $0x152] sm:$0xff]  ;;  %v509_v48 = vmul.f32 %v3897_v60, %v5539_v17  ;;  %v1029_v49 = vmul.f32 %v3905_v30, %v3599_v23 }
 0x258   : > { %5520 = vst [vmem:[#allocation13_spill] sm:$0xff] %v3960_v56  ;;  %5527 = vst [vmem:[#allocation20_spill] sm:$0xff] %v3974_v52  ;;  %v3989_v54 = vmul.f32 %v3897_v60, %v5532_v5  ;;  %v3993_v52 = vmul.f32 %v3897_v60, %v5534_v8  ;;  %v5536_v3 = vld [vmem:[#allocation48_spill] sm:$0xff]  ;;  %v3999_v55 = vpop.permute.xlu1 %1993  ;;  %v4006_v5 = vrot.slane %v3888_v51, %v1257_v4  ;;  %v5540_v8 = vld [vmem:[#allocation50_spill] sm:$0xff] }
 0x259   : > { %5529 = vst [vmem:[#allocation22_spill] sm:$0xff] %v3978_v50  ;;  %5531 = vst [vmem:[#allocation24_spill] sm:$0xff] %v3985_v38  ;;  %v3997_v50 = vmul.f32 %v3897_v60, %v5536_v3  ;;  %2503 = vperm.xlu1 %2831, %v2385_v53   ;;  %v5542_v3 = vld [vmem:[#allocation52_spill] sm:$0xff]  ;;  %v4023_v4 = vpop.permute.xlu0 %2008 }
 0x25a   : > { %5533 = vst [vmem:[#allocation26_spill] sm:$0xff] %v3989_v54  ;;  %5535 = vst [vmem:[#allocation28_spill] sm:$0xff] %v3993_v52  ;;  %v1777_v54 = vsub.s32 5, %v3878_v10  ;;  %v4011_v52 = vmul.f32 %v3897_v60, %v5540_v8  ;;  %v5546_v38 = vld [vmem:[#allocation68_spill] sm:$0xff]  ;;  %v801_v8 = vadd.f32 %v769_v61, %v509_v48  ;;  %2518 = vperm.xlu0 %2830, %v2388_v59   ;;  %v2390_v61 = vld [vmem:[#allocation2 + $0x16a] sm:$0xff] }
 0x25b   : > { %5537 = vst [vmem:[#allocation30_spill] sm:$0xff] %v3997_v50  ;;  %5538 = vst [vmem:[#allocation32_spill] sm:$0xff] %v3999_v55  ;;  %v4015_v55 = vmul.f32 %v3897_v60, %v5542_v3  ;;  %v5544_v50 = vld [vmem:[#allocation54_spill] sm:$0xff]  ;;  %v739_v23 = vmul.f32 %v3902_v9, %v5546_v38  ;;  %v2387_v56 = vld [vmem:[#allocation2 + $0x142] sm:$0xff]  ;;  %v4032_v3 = vrot.slane %v3888_v51, %v1517_v14 }
 0x25c   : > { %5541 = vst [vmem:[#allocation34_spill] sm:$0xff] %v4011_v52  ;;  %v4019_v17 = vmul.f32 %v3897_v60, %v5544_v50  ;;  %5547 = vst [vmem:[#allocation40_spill] sm:$0xff] %v4023_v4  ;;  %v5548_v62 = vld [vmem:[#allocation56_spill] sm:$0xff]  ;;  %v1289_v52 = vmul.f32 %v4006_v5, %v3699_v22  ;;  %v5549_v50 = vld [vmem:[#allocation58_spill] sm:$0xff]  ;;  %v770_v48 = vmul.f32 %v3902_v9, %v3510_v58  ;;  %v4048_v22 = vpop.permute.xlu1 %2003 }
 0x25d   : > { %5543 = vst [vmem:[#allocation36_spill] sm:$0xff] %v4015_v55  ;;  %v4027_v53 = vmul.f32 %v3897_v60, %v5548_v62  ;;  %v5551_v38 = vld [vmem:[#allocation60_spill] sm:$0xff]  ;;  %v5553_v55 = vld [vmem:[#allocation62_spill] sm:$0xff]  ;;  %5555 = vst [vmem:[#allocation48_spill] sm:$0xff] %v4048_v22  ;;  %v1061_v14 = vadd.f32 %v1029_v49, %v801_v8  ;;  %v1549_v59 = vmul.f32 %v4032_v3, %v3772_v18  ;;  %2513 = vperm.xlu1 %2831, %v2387_v56   ;;  %v4068_v18 = vpop.permute.xlu0 %2018 }
 0x25e   : > { %5545 = vst [vmem:[#allocation38_spill] sm:$0xff] %v4019_v17  ;;  %v4036_v17 = vmul.f32 %v3897_v60, %v5549_v50  ;;  %v4040_v4 = vmul.f32 %v3897_v60, %v5551_v38  ;;  %v4044_v62 = vmul.f32 %v3897_v60, %v5553_v55  ;;  %v4053_v50 = vrot.slane %v3888_v51, %v1777_v54  ;;  %v5559_v49 = vld [vmem:[#allocation69_spill] sm:$0xff]  ;;  %v2389_v54 = vld [vmem:[#allocation2 + $0x15a] sm:$0xff] }
 0x25f   : > { %v2038_v38 = vsub.s32 6, %v3878_v10  ;;  %v4064_v22 = vadd.f32 %v739_v23, %v479_v29  ;;  %v510_v8 = vmul.f32 %v3897_v60, %v5559_v49  ;;  %5560 = vst [vmem:[#allocation50_spill] sm:$0xff] %v4068_v18  ;;  %v1030_v56 = vmul.f32 %v3905_v30, %v3610_v15  ;;  %2528 = vperm.xlu0 %2830, %v2390_v61   ;;  %v5616_v18 = vld [vmem:[#allocation102_spill] sm:$0xff] }
 0x260   : > { %5550 = vst [vmem:[#allocation42_spill] sm:$0xff] %v4036_v17  ;;  %5552 = vst [vmem:[#allocation44_spill] sm:$0xff] %v4040_v4  ;;  %v5556_v4 = vld [vmem:[#allocation64_spill] sm:$0xff]  ;;  %v5561_v17 = vld [vmem:[#allocation70_spill] sm:$0xff]  ;;  %v742_v23 = vmul.f32 %v3902_v9, %v3424_v37  ;;  %v4084_v49 = vpop.permute.xlu1 %2013  ;;  %v747_v37 = vmul.f32 %v3902_v9, %v3433_v26 }
 0x261   : > { %5554 = vst [vmem:[#allocation46_spill] sm:$0xff] %v4044_v62  ;;  %v4058_v55 = vmul.f32 %v3897_v60, %v5556_v4  ;;  %v5558_v62 = vld [vmem:[#allocation67_spill] sm:$0xff]  ;;  %v741_v10 = vmul.f32 %v3902_v9, %v5561_v17  ;;  %v1321_v4 = vadd.f32 %v1289_v52, %v1061_v14  ;;  %v745_v17 = vmul.f32 %v3902_v9, %v3427_v36  ;;  %v2029_v14 = vpop.permute.xlu0 %2028 }
 0x262   : > { %v4062_v58 = vmul.f32 %v3897_v60, %v5558_v62  ;;  %v5562_v62 = vld [vmem:[#allocation71_spill] sm:$0xff]  ;;  %v743_v60 = vmul.f32 %v3902_v9, %v3421_v35  ;;  %5563 = vst [vmem:[#allocation52_spill] sm:$0xff] %v4084_v49  ;;  %v802_v15 = vadd.f32 %v770_v48, %v510_v8  ;;  %v1290_v52 = vmul.f32 %v4006_v5, %v3710_v21 }
 0x263   : > { %5557 = vst [vmem:[#allocation65_spill] sm:$0xff] %v4058_v55  ;;  %v1809_v55 = vmul.f32 %v4053_v50, %v3838_v40  ;;  %v740_v29 = vmul.f32 %v3902_v9, %v5562_v62  ;;  %v1581_v40 = vadd.f32 %v1549_v59, %v1321_v4  ;;  %v4089_v61 = vrot.slane %v3888_v51, %v2038_v38  ;;  %v2391_v8 = vld [vmem:[#allocation2 + $0x172] sm:$0xff] }
 0x264   : > { %2523 = vperm.xlu1 %2831, %v2389_v54   ;;  %v744_v35 = vmul.f32 %v3902_v9, %v3430_v2  ;;  %v746_v36 = vmul.f32 %v3902_v9, %v3436_v63  ;;  %v749_v48 = vmul.f32 %v3902_v9, %v3439_v27  ;;  %v1062_v21 = vadd.f32 %v1030_v56, %v802_v15  ;;  %v4115_v56 = vpop.permute.xlu1 %2023  ;;  %v5566_v15 = vld [vmem:[#allocation12_spill] sm:$0xff] }
 0x265   : > { %v1550_v59 = vmul.f32 %v4032_v3, %v3779_v11  ;;  %v1841_v38 = vadd.f32 %v1809_v55, %v1581_v40  ;;  %v2070_v54 = vmul.f32 %v4089_v61, %v2029_v14  ;;  %2538 = vperm.xlu0 %2830, %v3704_v24   ;;  %v4104_v2 = vadd.f32 %v741_v10, %v3917_v34  ;;  %v2394_v11 = vld [vmem:[#allocation2 + $0x19a] sm:$0xff]  ;;  %v5567_v40 = vld [vmem:[#allocation13_spill] sm:$0xff] }
 0x266   : > { %v4107_v26 = vadd.f32 %v740_v29, %v3911_v20  ;;  %v4110_v63 = vadd.f32 %v743_v60, %v3921_v19  ;;  %v4113_v27 = vadd.f32 %v742_v23, %v3925_v13  ;;  %5564 = vst [vmem:[#allocation54_spill] sm:$0xff] %v4115_v56  ;;  %v4118_v55 = vadd.f32 %v745_v17, %v3929_v7  ;;  %v4135_v7 = vpop.permute.xlu0 %2138 }
 0x267   : > { %v1322_v4 = vadd.f32 %v1290_v52, %v1062_v21  ;;  %v1810_v10 = vmul.f32 %v4053_v50, %v3845_v25  ;;  %v4122_v24 = vadd.f32 %v2070_v54, %v1841_v38  ;;  %v4125_v20 = vadd.f32 %v744_v35, %v3933_v12  ;;  %v5574_v38 = vld [vmem:[#allocation22_spill] sm:$0xff] }
 0x268   : > { %2533 = vperm.xlu1 %2831, %v2391_v8   ;;  %v4128_v34 = vadd.f32 %v747_v37, %v3937_v6  ;;  %v4131_v13 = vadd.f32 %v746_v36, %v3943_v1  ;;  %v748_v19 = vmul.f32 %v3902_v9, %v3442_v28  ;;  %v4138_v62 = vadd.f32 %v749_v48, %v3947_v0  ;;  %v2034_v60 = vpop.permute.xlu1 %2033  ;;  %v5573_v8 = vld [vmem:[#allocation73_spill] sm:$0xff] }
 0x269   : > { %5565 = vst [vmem:[#allocation68_spill] sm:$0xff] %v4122_v24  ;;  %v751_v25 = vmul.f32 %v3902_v9, %v3445_v31  ;;  %v750_v12 = vmul.f32 %v3902_v9, %v3448_v32  ;;  %v1582_v29 = vadd.f32 %v1550_v59, %v1322_v4  ;;  %2548 = vperm.xlu0 %2830, %v2394_v11   ;;  %v5575_v11 = vld [vmem:[#allocation24_spill] sm:$0xff] }
 0x26a   : > { %v753_v1 = vmul.f32 %v3902_v9, %v3451_v33  ;;  %v752_v6 = vmul.f32 %v3902_v9, %v3454_v39  ;;  %v755_v28 = vmul.f32 %v3902_v9, %v3457_v41  ;;  %v754_v0 = vmul.f32 %v3902_v9, %v3460_v42 }
 0x26b   : > { %v757_v31 = vmul.f32 %v3902_v9, %v3463_v43  ;;  %v756_v32 = vmul.f32 %v3902_v9, %v3466_v44  ;;  %v1842_v23 = vadd.f32 %v1810_v10, %v1582_v29  ;;  %v2071_v17 = vmul.f32 %v4089_v61, %v2034_v60  ;;  %v4167_v43 = vpop.permute.xlu0 %2148  ;;  %v2395_v44 = vld [vmem:[#allocation2 + $0x1a2] sm:$0xff]  ;;  %v5576_v10 = vld [vmem:[#allocation26_spill] sm:$0xff] }
 0x26c   : > { %2543 = vperm.xlu1 %2831, %v3715_v16   ;;  %v4159_v33 = vadd.f32 %v748_v19, %v3951_v57  ;;  %v759_v39 = vmul.f32 %v3902_v9, %v3469_v45  ;;  %v758_v41 = vmul.f32 %v3902_v9, %v3472_v46  ;;  %v761_v42 = vmul.f32 %v3902_v9, %v3475_v47  ;;  %v5568_v57 = vld [vmem:[#allocation72_spill] sm:$0xff]  ;;  %v5570_v45 = vld [vmem:[#allocation15_spill] sm:$0xff]  ;;  %v4190_v59 = vpop.permute.xlu1 %2143  ;;  %v5580_v60 = vld [vmem:[#allocation34_spill] sm:$0xff] }
 0x26d   : > { %v4170_v52 = vadd.f32 %v751_v25, %v5566_v15  ;;  %v4173_v16 = vadd.f32 %v750_v12, %v5567_v40  ;;  %v760_v35 = vmul.f32 %v3902_v9, %v5568_v57  ;;  %v4177_v37 = vadd.f32 %v2071_v17, %v1842_v23  ;;  %v5571_v46 = vld [vmem:[#allocation16_spill] sm:$0xff]  ;;  %v5577_v25 = vld [vmem:[#allocation74_spill] sm:$0xff]  ;;  %v5584_v57 = vld [vmem:[#allocation77_spill] sm:$0xff] }
 0x26e   : > { %v4180_v36 = vadd.f32 %v753_v1, %v5570_v45  ;;  %v4183_v48 = vadd.f32 %v752_v6, %v5571_v46  ;;  %v5572_v47 = vld [vmem:[#allocation20_spill] sm:$0xff]  ;;  %v763_v21 = vmul.f32 %v3902_v9, %v5573_v8  ;;  %v4193_v54 = vadd.f32 %v754_v0, %v5574_v38  ;;  %v5579_v6 = vld [vmem:[#allocation30_spill] sm:$0xff]  ;;  %v5581_v0 = vld [vmem:[#allocation75_spill] sm:$0xff] }
 0x26f   : > { %5569 = vst [vmem:[#allocation56_spill] sm:$0xff] %v4177_v37  ;;  %v4186_v14 = vadd.f32 %v755_v28, %v5572_v47  ;;  %v4196_v4 = vadd.f32 %v757_v31, %v5575_v11  ;;  %v4199_v19 = vadd.f32 %v756_v32, %v5576_v10  ;;  %v762_v12 = vmul.f32 %v3902_v9, %v5577_v25  ;;  %v5578_v29 = vld [vmem:[#allocation28_spill] sm:$0xff]  ;;  %v4214_v17 = vpop.permute.xlu0 %2158  ;;  %v5585_v45 = vld [vmem:[#allocation78_spill] sm:$0xff]  ;;  %v5587_v47 = vld [vmem:[#allocation79_spill] sm:$0xff] }
 0x270   : > { %2553 = vperm.xlu1 %2831, %v2395_v44   ;;  %v4204_v1 = vadd.f32 %v759_v39, %v5578_v29  ;;  %v4207_v28 = vadd.f32 %v758_v41, %v5579_v6  ;;  %v4210_v23 = vadd.f32 %v761_v42, %v5580_v60  ;;  %v765_v31 = vmul.f32 %v3902_v9, %v5581_v0  ;;  %v5582_v32 = vld [vmem:[#allocation36_spill] sm:$0xff]  ;;  %v5586_v46 = vld [vmem:[#allocation38_spill] sm:$0xff]  ;;  %v4234_v25 = vpop.permute.xlu1 %2153  ;;  %v5591_v0 = vld [vmem:[#allocation83_spill] sm:$0xff] }
 0x271   : > { %v4217_v15 = vadd.f32 %v760_v35, %v5582_v32  ;;  %v5583_v40 = vld [vmem:[#allocation76_spill] sm:$0xff]  ;;  %v767_v39 = vmul.f32 %v3902_v9, %v5584_v57  ;;  %v766_v41 = vmul.f32 %v3902_v9, %v5585_v45  ;;  %v4226_v42 = vadd.f32 %v763_v21, %v5586_v46  ;;  %v5589_v35 = vld [vmem:[#allocation81_spill] sm:$0xff]  ;;  %v5590_v6 = vld [vmem:[#allocation82_spill] sm:$0xff] }
 0x272   : > { %v764_v44 = vmul.f32 %v3902_v9, %v5583_v40  ;;  %v768_v8 = vmul.f32 %v3902_v9, %v5587_v47  ;;  %v5588_v38 = vld [vmem:[#allocation80_spill] sm:$0xff]  ;;  %v1001_v10 = vmul.f32 %v3905_v30, %v5589_v35  ;;  %v4237_v29 = vadd.f32 %v762_v12, %v4027_v53  ;;  %v5593_v40 = vld [vmem:[#allocation42_spill] sm:$0xff]  ;;  %v5594_v45 = vld [vmem:[#allocation85_spill] sm:$0xff] }
 0x273   : > { %v999_v11 = vmul.f32 %v3905_v30, %v5588_v38  ;;  %v1000_v60 = vmul.f32 %v3905_v30, %v5590_v6  ;;  %v1003_v21 = vmul.f32 %v3905_v30, %v5591_v0  ;;  %v5592_v32 = vld [vmem:[#allocation84_spill] sm:$0xff]  ;;  %v4246_v57 = vadd.f32 %v765_v31, %v5593_v40  ;;  %v5595_v47 = vld [vmem:[#allocation86_spill] sm:$0xff]  ;;  %v5596_v53 = vld [vmem:[#allocation87_spill] sm:$0xff]  ;;  %v4254_v35 = vpop.permute.xlu0 %2168 }
 0x274   : > { %v1002_v9 = vmul.f32 %v3905_v30, %v5592_v32  ;;  %v1005_v46 = vmul.f32 %v3905_v30, %v5594_v45  ;;  %v1004_v38 = vmul.f32 %v3905_v30, %v5595_v47  ;;  %v1007_v12 = vmul.f32 %v3905_v30, %v5596_v53  ;;  %v5597_v6 = vld [vmem:[#allocation44_spill] sm:$0xff]  ;;  %v5598_v0 = vld [vmem:[#allocation46_spill] sm:$0xff]  ;;  %v5599_v32 = vld [vmem:[#allocation65_spill] sm:$0xff] }
 0x275   : > { %v4257_v37 = vadd.f32 %v764_v44, %v5597_v6  ;;  %v4260_v24 = vadd.f32 %v767_v39, %v5598_v0  ;;  %v4263_v31 = vadd.f32 %v766_v41, %v5599_v32  ;;  %v5600_v40 = vld [vmem:[#allocation88_spill] sm:$0xff]  ;;  %v4268_v56 = vadd.f32 %v768_v8, %v4062_v58  ;;  %v5601_v44 = vld [vmem:[#allocation89_spill] sm:$0xff]  ;;  %v4278_v39 = vpop.permute.xlu1 %2163  ;;  %v5602_v8 = vld [vmem:[#allocation90_spill] sm:$0xff] }
 0x276   : > { %v1006_v45 = vmul.f32 %v3905_v30, %v5600_v40  ;;  %v4271_v47 = vadd.f32 %v999_v11, %v4064_v22  ;;  %v4274_v53 = vadd.f32 %v1001_v10, %v4104_v2  ;;  %v1009_v6 = vmul.f32 %v3905_v30, %v5601_v44  ;;  %v5606_v32 = vld [vmem:[#allocation93_spill] sm:$0xff]  ;;  %v5609_v40 = vld [vmem:[#allocation96_spill] sm:$0xff] }
 0x277   : > { %v4281_v41 = vadd.f32 %v1000_v60, %v4107_v26  ;;  %v4284_v0 = vadd.f32 %v1003_v21, %v4110_v63  ;;  %v4287_v58 = vadd.f32 %v1002_v9, %v4113_v27  ;;  %v1008_v22 = vmul.f32 %v3905_v30, %v5602_v8  ;;  %v5603_v26 = vld [vmem:[#allocation91_spill] sm:$0xff]  ;;  %v4302_v63 = vpop.permute.xlu0 %2178  ;;  %v5605_v21 = vld [vmem:[#allocation92_spill] sm:$0xff] }
 0x278   : > { %v4292_v2 = vadd.f32 %v1005_v46, %v4118_v55  ;;  %v4295_v11 = vadd.f32 %v1004_v38, %v4125_v20  ;;  %v4298_v10 = vadd.f32 %v1007_v12, %v4128_v34  ;;  %v1011_v60 = vmul.f32 %v3905_v30, %v5603_v26  ;;  %5604 = vst [vmem:[#allocation58_spill] sm:$0xff] %v4302_v63  ;;  %v5607_v46 = vld [vmem:[#allocation94_spill] sm:$0xff]  ;;  %v5608_v38 = vld [vmem:[#allocation95_spill] sm:$0xff] }
 0x279   : > { %v4305_v27 = vadd.f32 %v1006_v45, %v4131_v13  ;;  %v1010_v9 = vmul.f32 %v3905_v30, %v5605_v21  ;;  %v1013_v55 = vmul.f32 %v3905_v30, %v5606_v32  ;;  %v1012_v20 = vmul.f32 %v3905_v30, %v5607_v46  ;;  %v5610_v13 = vld [vmem:[#allocation97_spill] sm:$0xff]  ;;  %v4322_v8 = vpop.permute.xlu1 %2173  ;;  %v5612_v21 = vld [vmem:[#allocation98_spill] sm:$0xff]  ;;  %v5613_v46 = vld [vmem:[#allocation99_spill] sm:$0xff] }
 0x27a   : > { %v4314_v34 = vadd.f32 %v1009_v6, %v4138_v62  ;;  %v1015_v12 = vmul.f32 %v3905_v30, %v5608_v38  ;;  %v1014_v44 = vmul.f32 %v3905_v30, %v5609_v40  ;;  %v1017_v45 = vmul.f32 %v3905_v30, %v5610_v13  ;;  %5611 = vst [vmem:[#allocation60_spill] sm:$0xff] %v4322_v8  ;;  %v5614_v6 = vld [vmem:[#allocation100_spill] sm:$0xff]  ;;  %v5615_v40 = vld [vmem:[#allocation101_spill] sm:$0xff] }
 0x27b   : > { %v4325_v26 = vadd.f32 %v1008_v22, %v4159_v33  ;;  %v1016_v32 = vmul.f32 %v3905_v30, %v5612_v21  ;;  %v1019_v62 = vmul.f32 %v3905_v30, %v5613_v46  ;;  %v1018_v38 = vmul.f32 %v3905_v30, %v5614_v6  ;;  %v5617_v33 = vld [vmem:[#allocation103_spill] sm:$0xff]  ;;  %v4342_v63 = vpop.permute.xlu0 %2188 }
 0x27c   : > { %v4334_v49 = vadd.f32 %v1011_v60, %v4170_v52  ;;  %v1021_v13 = vmul.f32 %v3905_v30, %v5615_v40  ;;  %v1020_v8 = vmul.f32 %v3905_v30, %v5616_v18  ;;  %v1023_v22 = vmul.f32 %v3905_v30, %v5617_v33  ;;  %v5618_v60 = vld [vmem:[#allocation104_spill] sm:$0xff] }
 0x27d   : > { %v4345_v21 = vadd.f32 %v1010_v9, %v4173_v16  ;;  %v4348_v46 = vadd.f32 %v1013_v55, %v4180_v36  ;;  %v4351_v52 = vadd.f32 %v1012_v20, %v4183_v48  ;;  %v1022_v6 = vmul.f32 %v3905_v30, %v5618_v60  ;;  %v5619_v16 = vld [vmem:[#allocation105_spill] sm:$0xff]  ;;  %v4366_v36 = vpop.permute.xlu1 %2183  ;;  %v5621_v20 = vld [vmem:[#allocation106_spill] sm:$0xff] }
 0x27e   : > { %v4356_v40 = vadd.f32 %v1015_v12, %v4186_v14  ;;  %v4359_v18 = vadd.f32 %v1014_v44, %v4193_v54  ;;  %v4362_v33 = vadd.f32 %v1017_v45, %v4196_v4  ;;  %v1025_v9 = vmul.f32 %v3905_v30, %v5619_v16  ;;  %5620 = vst [vmem:[#allocation62_spill] sm:$0xff] %v4366_v36  ;;  %v5628_v60 = vld [vmem:[#allocation14_spill] sm:$0xff] }
 0x27f   : > { %v4369_v48 = vadd.f32 %v1016_v32, %v4199_v19  ;;  %v4372_v55 = vadd.f32 %v1019_v62, %v4204_v1  ;;  %v4375_v14 = vadd.f32 %v1018_v38, %v4207_v28  ;;  %v1024_v54 = vmul.f32 %v3905_v30, %v5621_v20  ;;  %v5622_v19 = vld [vmem:[#allocation6_spill] sm:$0xff]  ;;  %v4390_v1 = vpop.permute.xlu0 %2198  ;;  %v5624_v32 = vld [vmem:[#allocation7_spill] sm:$0xff]  ;;  %v5625_v38 = vld [vmem:[#allocation8_spill] sm:$0xff] }
 0x280   : > { %v4380_v4 = vadd.f32 %v1021_v13, %v4210_v23  ;;  %v4383_v12 = vadd.f32 %v1020_v8, %v4217_v15  ;;  %v4386_v44 = vadd.f32 %v1023_v22, %v4226_v42  ;;  %v1027_v45 = vmul.f32 %v3905_v30, %v5622_v19  ;;  %5623 = vst [vmem:[#allocation64_spill] sm:$0xff] %v4390_v1  ;;  %v5626_v13 = vld [vmem:[#allocation9_spill] sm:$0xff]  ;;  %v5627_v8 = vld [vmem:[#allocation11_spill] sm:$0xff] }
 0x281   : > { %v4393_v28 = vadd.f32 %v1022_v6, %v4237_v29  ;;  %v1026_v62 = vmul.f32 %v3905_v30, %v5624_v32  ;;  %v1028_v23 = vmul.f32 %v3905_v30, %v5625_v38  ;;  %v1259_v15 = vmul.f32 %v4006_v5, %v5626_v13  ;;  %v5629_v29 = vld [vmem:[#allocation107_spill] sm:$0xff]  ;;  %v4410_v20 = vpop.permute.xlu1 %2193  ;;  %v5631_v30 = vld [vmem:[#allocation17_spill] sm:$0xff] }
 0x282   : > { %v4402_v42 = vadd.f32 %v1025_v9, %v4246_v57  ;;  %v1261_v22 = vmul.f32 %v4006_v5, %v5627_v8  ;;  %v1260_v16 = vmul.f32 %v4006_v5, %v5628_v60  ;;  %v1263_v6 = vmul.f32 %v4006_v5, %v5629_v29  ;;  %5630 = vst [vmem:[#allocation67_spill] sm:$0xff] %v4410_v20  ;;  %v5632_v38 = vld [vmem:[#allocation19_spill] sm:$0xff]  ;;  %v5633_v9 = vld [vmem:[#allocation21_spill] sm:$0xff] }
 0x283   : > { %v4413_v19 = vadd.f32 %v1024_v54, %v4257_v37  ;;  %v1262_v32 = vmul.f32 %v4006_v5, %v5631_v30  ;;  %v1265_v57 = vmul.f32 %v4006_v5, %v5632_v38  ;;  %v1264_v13 = vmul.f32 %v4006_v5, %v5633_v9  ;;  %v5634_v60 = vld [vmem:[#allocation23_spill] sm:$0xff]  ;;  %v5635_v1 = vld [vmem:[#allocation25_spill] sm:$0xff]  ;;  %v4430_v36 = vpop.permute.xlu0 %2208 }
 0x284   : > { %v4422_v8 = vadd.f32 %v1027_v45, %v4260_v24  ;;  %v1267_v29 = vmul.f32 %v4006_v5, %v5634_v60  ;;  %v1266_v20 = vmul.f32 %v4006_v5, %v5635_v1  ;;  %v5636_v37 = vld [vmem:[#allocation27_spill] sm:$0xff]  ;;  %5637 = vst [vmem:[#allocation69_spill] sm:$0xff] %v4430_v36  ;;  %v4433_v30 = vadd.f32 %v1026_v62, %v4263_v31  ;;  %v5638_v45 = vld [vmem:[#allocation29_spill] sm:$0xff] }
 0x285   : > { %v1269_v54 = vmul.f32 %v4006_v5, %v5636_v37  ;;  %v4436_v38 = vadd.f32 %v1028_v23, %v4268_v56  ;;  %v4439_v24 = vadd.f32 %v1259_v15, %v4271_v47  ;;  %v1268_v9 = vmul.f32 %v4006_v5, %v5638_v45  ;;  %v5639_v31 = vld [vmem:[#allocation31_spill] sm:$0xff]  ;;  %v4454_v56 = vpop.permute.xlu1 %2203  ;;  %v5641_v15 = vld [vmem:[#allocation33_spill] sm:$0xff] }
 0x286   : > { %v4444_v60 = vadd.f32 %v1261_v22, %v4274_v53  ;;  %v4447_v1 = vadd.f32 %v1260_v16, %v4281_v41  ;;  %v4450_v37 = vadd.f32 %v1263_v6, %v4284_v0  ;;  %v1271_v62 = vmul.f32 %v4006_v5, %v5639_v31  ;;  %5640 = vst [vmem:[#allocation70_spill] sm:$0xff] %v4454_v56  ;;  %v5648_v45 = vld [vmem:[#allocation45_spill] sm:$0xff] }
 0x287   : > { %v4457_v47 = vadd.f32 %v1262_v32, %v4287_v58  ;;  %v4460_v23 = vadd.f32 %v1265_v57, %v4292_v2  ;;  %v4463_v53 = vadd.f32 %v1264_v13, %v4295_v11  ;;  %v1270_v41 = vmul.f32 %v4006_v5, %v5641_v15  ;;  %v5642_v58 = vld [vmem:[#allocation35_spill] sm:$0xff]  ;;  %v4478_v2 = vpop.permute.xlu0 %2218  ;;  %v5644_v32 = vld [vmem:[#allocation37_spill] sm:$0xff] }
 0x288   : > { %v4468_v0 = vadd.f32 %v1267_v29, %v4298_v10  ;;  %v4471_v22 = vadd.f32 %v1266_v20, %v4305_v27  ;;  %v4474_v16 = vadd.f32 %v1269_v54, %v4314_v34  ;;  %v1273_v6 = vmul.f32 %v4006_v5, %v5642_v58  ;;  %5643 = vst [vmem:[#allocation71_spill] sm:$0xff] %v4478_v2  ;;  %v5645_v13 = vld [vmem:[#allocation39_spill] sm:$0xff]  ;;  %v5646_v29 = vld [vmem:[#allocation41_spill] sm:$0xff] }
 0x289   : > { %v4481_v11 = vadd.f32 %v1268_v9, %v4325_v26  ;;  %v1272_v57 = vmul.f32 %v4006_v5, %v5644_v32  ;;  %v1275_v10 = vmul.f32 %v4006_v5, %v5645_v13  ;;  %v1274_v27 = vmul.f32 %v4006_v5, %v5646_v29  ;;  %v5647_v20 = vld [vmem:[#allocation43_spill] sm:$0xff]  ;;  %v4498_v15 = vpop.permute.xlu1 %2213  ;;  %v5651_v32 = vld [vmem:[#allocation49_spill] sm:$0xff] }
 0x28a   : > { %v4490_v34 = vadd.f32 %v1271_v62, %v4334_v49  ;;  %v1277_v54 = vmul.f32 %v4006_v5, %v5647_v20  ;;  %v1276_v31 = vmul.f32 %v4006_v5, %v5648_v45  ;;  %v5649_v26 = vld [vmem:[#allocation47_spill] sm:$0xff]  ;;  %5650 = vst [vmem:[#allocation12_spill] sm:$0xff] %v4498_v15  ;;  %v4501_v58 = vadd.f32 %v1270_v41, %v4345_v21  ;;  %v5653_v62 = vld [vmem:[#allocation53_spill] sm:$0xff] }
 0x28b   : > { %v1279_v9 = vmul.f32 %v4006_v5, %v5649_v26  ;;  %v1278_v13 = vmul.f32 %v4006_v5, %v5651_v32  ;;  %v5652_v29 = vld [vmem:[#allocation51_spill] sm:$0xff]  ;;  %v1280_v20 = vmul.f32 %v4006_v5, %v5653_v62  ;;  %v4510_v2 = vadd.f32 %v1273_v6, %v4348_v46  ;;  %v5655_v56 = vld [vmem:[#allocation57_spill] sm:$0xff]  ;;  %v4518_v36 = vpop.permute.xlu0 %2228 }
 0x28c   : > { %v1281_v49 = vmul.f32 %v4006_v5, %v5652_v29  ;;  %v5654_v45 = vld [vmem:[#allocation55_spill] sm:$0xff]  ;;  %v1282_v15 = vmul.f32 %v4006_v5, %v5655_v56  ;;  %v4521_v32 = vadd.f32 %v1272_v57, %v4351_v52  ;;  %v4524_v29 = vadd.f32 %v1275_v10, %v4356_v40  ;;  %v5657_v6 = vld [vmem:[#allocation61_spill] sm:$0xff] }
 0x28d   : > { %v1283_v26 = vmul.f32 %v4006_v5, %v5654_v45  ;;  %v5656_v21 = vld [vmem:[#allocation59_spill] sm:$0xff]  ;;  %v4527_v46 = vadd.f32 %v1274_v27, %v4359_v18  ;;  %v1284_v62 = vmul.f32 %v4006_v5, %v5657_v6  ;;  %v4532_v45 = vadd.f32 %v1277_v54, %v4362_v33  ;;  %v4542_v40 = vpop.permute.xlu1 %2223  ;;  %v5660_v27 = vld [vmem:[#allocation108_spill] sm:$0xff] }
 0x28e   : > { %v1285_v41 = vmul.f32 %v4006_v5, %v5656_v21  ;;  %v4535_v56 = vadd.f32 %v1276_v31, %v4369_v48  ;;  %v4538_v21 = vadd.f32 %v1279_v9, %v4372_v55  ;;  %v5658_v52 = vld [vmem:[#allocation63_spill] sm:$0xff]  ;;  %5659 = vst [vmem:[#allocation13_spill] sm:$0xff] %v4542_v40  ;;  %v4545_v18 = vadd.f32 %v1278_v13, %v4375_v14  ;;  %v5661_v14 = vld [vmem:[#allocation66_spill] sm:$0xff]  ;;  %v5663_v13 = vld [vmem:[#allocation109_spill] sm:$0xff] }
 0x28f   : > { %v1287_v57 = vmul.f32 %v4006_v5, %v5658_v52  ;;  %v4548_v10 = vadd.f32 %v1281_v49, %v4380_v4  ;;  %v4551_v33 = vadd.f32 %v1280_v20, %v4383_v12  ;;  %v1286_v48 = vmul.f32 %v4006_v5, %v5660_v27  ;;  %v4566_v4 = vpop.permute.xlu0 %2238  ;;  %v5664_v20 = vld [vmem:[#allocation110_spill] sm:$0xff] }
 0x290   : > { %v4556_v55 = vadd.f32 %v1283_v26, %v4386_v44  ;;  %v4559_v54 = vadd.f32 %v1282_v15, %v4393_v28  ;;  %v4562_v31 = vadd.f32 %v1285_v41, %v4402_v42  ;;  %v1288_v9 = vmul.f32 %v4006_v5, %v5661_v14  ;;  %5662 = vst [vmem:[#allocation72_spill] sm:$0xff] %v4566_v4  ;;  %v5665_v26 = vld [vmem:[#allocation111_spill] sm:$0xff]  ;;  %v5666_v15 = vld [vmem:[#allocation112_spill] sm:$0xff]  ;;  %v5667_v41 = vld [vmem:[#allocation113_spill] sm:$0xff] }
 0x291   : > { %v4569_v12 = vadd.f32 %v1284_v62, %v4413_v19  ;;  %v1519_v49 = vmul.f32 %v4032_v3, %v5663_v13  ;;  %v1521_v44 = vmul.f32 %v4032_v3, %v5664_v20  ;;  %v1520_v28 = vmul.f32 %v4032_v3, %v5665_v26  ;;  %v5668_v19 = vld [vmem:[#allocation114_spill] sm:$0xff]  ;;  %v4586_v52 = vpop.permute.xlu1 %2233  ;;  %v5670_v14 = vld [vmem:[#allocation115_spill] sm:$0xff]  ;;  %v5671_v20 = vld [vmem:[#allocation116_spill] sm:$0xff] }
 0x292   : > { %v4578_v42 = vadd.f32 %v1287_v57, %v4422_v8  ;;  %v1523_v5 = vmul.f32 %v4032_v3, %v5666_v15  ;;  %v1522_v6 = vmul.f32 %v4032_v3, %v5667_v41  ;;  %v1525_v62 = vmul.f32 %v4032_v3, %v5668_v19  ;;  %5669 = vst [vmem:[#allocation15_spill] sm:$0xff] %v4586_v52  ;;  %v5672_v57 = vld [vmem:[#allocation117_spill] sm:$0xff]  ;;  %v5674_v41 = vld [vmem:[#allocation118_spill] sm:$0xff]  ;;  %v5675_v4 = vld [vmem:[#allocation119_spill] sm:$0xff] }
 0x293   : > { %v4589_v27 = vadd.f32 %v1286_v48, %v4433_v30  ;;  %v1524_v13 = vmul.f32 %v4032_v3, %v5670_v14  ;;  %v1527_v8 = vmul.f32 %v4032_v3, %v5671_v20  ;;  %v1526_v26 = vmul.f32 %v4032_v3, %v5672_v57  ;;  %v5676_v30 = vld [vmem:[#allocation120_spill] sm:$0xff]  ;;  %v4606_v40 = vpop.permute.xlu0 %2248 }
 0x294   : > { %v4598_v15 = vadd.f32 %v1288_v9, %v4436_v38  ;;  %v1529_v19 = vmul.f32 %v4032_v3, %v5674_v41  ;;  %v1528_v52 = vmul.f32 %v4032_v3, %v5675_v4  ;;  %v1531_v48 = vmul.f32 %v4032_v3, %v5676_v30  ;;  %v5677_v9 = vld [vmem:[#allocation121_spill] sm:$0xff] }
 0x295   : > { %v4609_v14 = vadd.f32 %v1519_v49, %v4439_v24  ;;  %v4612_v20 = vadd.f32 %v1521_v44, %v4444_v60  ;;  %v4615_v38 = vadd.f32 %v1520_v28, %v4447_v1  ;;  %v1530_v57 = vmul.f32 %v4032_v3, %v5677_v9  ;;  %v5678_v24 = vld [vmem:[#allocation122_spill] sm:$0xff]  ;;  %v4630_v60 = vpop.permute.xlu1 %2243  ;;  %v5680_v28 = vld [vmem:[#allocation123_spill] sm:$0xff]  ;;  %v5687_v9 = vld [vmem:[#allocation129_spill] sm:$0xff] }
 0x296   : > { %5673 = vst [vmem:[#allocation16_spill] sm:$0xff] %v4598_v15  ;;  %v4620_v41 = vadd.f32 %v1523_v5, %v4450_v37  ;;  %v4623_v4 = vadd.f32 %v1522_v6, %v4457_v47  ;;  %v4626_v30 = vadd.f32 %v1525_v62, %v4460_v23  ;;  %v1533_v49 = vmul.f32 %v4032_v3, %v5678_v24 }
 0x297   : > { %5679 = vst [vmem:[#allocation20_spill] sm:$0xff] %v4630_v60  ;;  %v4633_v1 = vadd.f32 %v1524_v13, %v4463_v53  ;;  %v4636_v44 = vadd.f32 %v1527_v8, %v4468_v0  ;;  %v4639_v37 = vadd.f32 %v1526_v26, %v4471_v22  ;;  %v1532_v47 = vmul.f32 %v4032_v3, %v5680_v28  ;;  %v5681_v53 = vld [vmem:[#allocation124_spill] sm:$0xff]  ;;  %v4654_v0 = vpop.permute.xlu0 %2258  ;;  %v5683_v13 = vld [vmem:[#allocation125_spill] sm:$0xff]  ;;  %v5684_v26 = vld [vmem:[#allocation126_spill] sm:$0xff] }
 0x298   : > { %v4644_v23 = vadd.f32 %v1529_v19, %v4474_v16  ;;  %v4647_v5 = vadd.f32 %v1528_v52, %v4481_v11  ;;  %v4650_v6 = vadd.f32 %v1531_v48, %v4490_v34  ;;  %v1535_v62 = vmul.f32 %v4032_v3, %v5681_v53  ;;  %5682 = vst [vmem:[#allocation73_spill] sm:$0xff] %v4654_v0  ;;  %v5685_v19 = vld [vmem:[#allocation127_spill] sm:$0xff]  ;;  %v5686_v52 = vld [vmem:[#allocation128_spill] sm:$0xff] }
 0x299   : > { %v4657_v22 = vadd.f32 %v1530_v57, %v4501_v58  ;;  %v1534_v8 = vmul.f32 %v4032_v3, %v5683_v13  ;;  %v1537_v16 = vmul.f32 %v4032_v3, %v5684_v26  ;;  %v1536_v11 = vmul.f32 %v4032_v3, %v5685_v19  ;;  %v5688_v58 = vld [vmem:[#allocation130_spill] sm:$0xff]  ;;  %v4674_v28 = vpop.permute.xlu1 %2253  ;;  %v5690_v13 = vld [vmem:[#allocation131_spill] sm:$0xff]  ;;  %v5691_v19 = vld [vmem:[#allocation132_spill] sm:$0xff] }
 0x29a   : > { %v4666_v34 = vadd.f32 %v1533_v49, %v4510_v2  ;;  %v1539_v48 = vmul.f32 %v4032_v3, %v5686_v52  ;;  %v1538_v24 = vmul.f32 %v4032_v3, %v5687_v9  ;;  %v1541_v57 = vmul.f32 %v4032_v3, %v5688_v58  ;;  %5689 = vst [vmem:[#allocation22_spill] sm:$0xff] %v4674_v28  ;;  %v5692_v49 = vld [vmem:[#allocation133_spill] sm:$0xff]  ;;  %v5693_v9 = vld [vmem:[#allocation134_spill] sm:$0xff]  ;;  %v5694_v0 = vld [vmem:[#allocation135_spill] sm:$0xff] }
 0x29b   : > { %v4677_v53 = vadd.f32 %v1532_v47, %v4521_v32  ;;  %v1540_v26 = vmul.f32 %v4032_v3, %v5690_v13  ;;  %v1543_v2 = vmul.f32 %v4032_v3, %v5691_v19  ;;  %v1542_v52 = vmul.f32 %v4032_v3, %v5692_v49  ;;  %v5695_v32 = vld [vmem:[#allocation136_spill] sm:$0xff]  ;;  %v4694_v60 = vpop.permute.xlu0 %2268 }
 0x29c   : > { %v4686_v15 = vadd.f32 %v1535_v62, %v4524_v29  ;;  %v1545_v58 = vmul.f32 %v4032_v3, %v5693_v9  ;;  %v1544_v28 = vmul.f32 %v4032_v3, %v5694_v0  ;;  %v1547_v47 = vmul.f32 %v4032_v3, %v5695_v32  ;;  %5696 = vst [vmem:[#allocation24_spill] sm:$0xff] %v4694_v60  ;;  %v5697_v62 = vld [vmem:[#allocation185_spill] sm:$0xff] }
 0x29d   : > { %v4697_v13 = vadd.f32 %v1534_v8, %v4527_v46  ;;  %v4700_v19 = vadd.f32 %v1537_v16, %v4532_v45  ;;  %v4703_v29 = vadd.f32 %v1536_v11, %v4535_v56  ;;  %v2298_v49 = vsub.s32 7, %v5697_v62  ;;  %v5698_v60 = vld [vmem:[#allocation137_spill] sm:$0xff]  ;;  %v4717_v8 = vpop.permute.xlu1 %2263  ;;  %v5699_v16 = vld [vmem:[#allocation139_spill] sm:$0xff]  ;;  %v5708_v62 = vld [vmem:[#allocation146_spill] sm:$0xff] }
 0x29e   : > { %v4707_v9 = vadd.f32 %v1539_v48, %v4538_v21  ;;  %v4710_v0 = vadd.f32 %v1538_v24, %v4545_v18  ;;  %v4713_v32 = vadd.f32 %v1541_v57, %v4548_v10  ;;  %v1546_v46 = vmul.f32 %v4032_v3, %v5698_v60  ;;  %v5702_v24 = vld [vmem:[#allocation141_spill] sm:$0xff]  ;;  %v5703_v57 = vld [vmem:[#allocation142_spill] sm:$0xff] }
 0x29f   : > { %v4720_v45 = vadd.f32 %v1540_v26, %v4551_v33  ;;  %v4723_v56 = vadd.f32 %v1543_v2, %v4556_v55  ;;  %v4726_v21 = vadd.f32 %v1542_v52, %v4559_v54  ;;  %v1779_v18 = vmul.f32 %v4053_v50, %v5699_v16  ;;  %v5700_v33 = vld [vmem:[#allocation140_spill] sm:$0xff]  ;;  %v4741_v55 = vpop.permute.xlu0 %2278  ;;  %v5704_v2 = vld [vmem:[#allocation143_spill] sm:$0xff] }
 0x2a0   : > { %v4731_v10 = vadd.f32 %v1545_v58, %v4562_v31  ;;  %v4734_v11 = vadd.f32 %v1544_v28, %v4569_v12  ;;  %v4737_v60 = vadd.f32 %v1547_v47, %v4578_v42  ;;  %v1781_v48 = vmul.f32 %v4053_v50, %v5700_v33  ;;  %5701 = vst [vmem:[#allocation26_spill] sm:$0xff] %v4741_v55  ;;  %v5706_v28 = vld [vmem:[#allocation144_spill] sm:$0xff]  ;;  %v5707_v58 = vld [vmem:[#allocation145_spill] sm:$0xff]  ;;  %v5715_v55 = vld [vmem:[#allocation150_spill] sm:$0xff] }
 0x2a1   : > { %v1780_v54 = vmul.f32 %v4053_v50, %v5702_v24  ;;  %v1783_v26 = vmul.f32 %v4053_v50, %v5703_v57  ;;  %v1782_v31 = vmul.f32 %v4053_v50, %v5704_v2  ;;  %v4750_v12 = vrot.slane %v3888_v51, %v2298_v49  ;;  %v4761_v33 = vpop.permute.xlu1 %2273  ;;  %v5710_v24 = vld [vmem:[#allocation138_spill] sm:$0xff]  ;;  %v5711_v49 = vld [vmem:[#allocation147_spill] sm:$0xff] }
 0x2a2   : > { %v4753_v42 = vadd.f32 %v1546_v46, %v4589_v27  ;;  %v1785_v52 = vmul.f32 %v4053_v50, %v5706_v28  ;;  %v1784_v47 = vmul.f32 %v4053_v50, %v5707_v58  ;;  %v1787_v16 = vmul.f32 %v4053_v50, %v5708_v62  ;;  %5709 = vst [vmem:[#allocation28_spill] sm:$0xff] %v4761_v33  ;;  %v5712_v46 = vld [vmem:[#allocation169_spill] sm:$0xff]  ;;  %v5713_v58 = vld [vmem:[#allocation148_spill] sm:$0xff] }
 0x2a3   : > { %v4765_v57 = vmul.f32 %v4032_v3, %v5710_v24  ;;  %v1811_v51 = vadd.f32 %v1779_v18, %v4609_v14  ;;  %v1786_v27 = vmul.f32 %v4053_v50, %v5711_v49  ;;  %v2040_v2 = vmul.f32 %v4089_v61, %v5712_v46  ;;  %v4779_v24 = vpop.permute.xlu0 %2288 }
 0x2a4   : > { %5705 = vst [vmem:[#allocation74_spill] sm:$0xff] %v4753_v42  ;;  %v1813_v28 = vadd.f32 %v1781_v48, %v4612_v20  ;;  %v1789_v62 = vmul.f32 %v4053_v50, %v5713_v58  ;;  %v5714_v42 = vld [vmem:[#allocation149_spill] sm:$0xff]  ;;  %v1791_v3 = vmul.f32 %v4053_v50, %v5715_v55  ;;  %v1812_v14 = vadd.f32 %v1780_v54, %v4615_v38  ;;  %v5716_v55 = vld [vmem:[#allocation151_spill] sm:$0xff] }
 0x2a5   : > { %v1788_v33 = vmul.f32 %v4053_v50, %v5714_v42  ;;  %v1815_v18 = vadd.f32 %v1783_v26, %v4620_v41  ;;  %v1814_v49 = vadd.f32 %v1782_v31, %v4623_v4  ;;  %v2300_v20 = vmul.f32 %v4750_v12, %v4135_v7  ;;  %v4795_v38 = vpop.permute.xlu1 %2283  ;;  %v4800_v41 = vld [vmem:[%s5220_s1 + $0x8] ss:$0 sm:$0xff]  ;;  %v5718_v4 = vld [vmem:[#allocation152_spill] sm:$0xff] }
 0x2a6   : > { %v1817_v48 = vadd.f32 %v1785_v52, %v4626_v30  ;;  %v4788_v46 = vadd.f32 %v1784_v47, %v4633_v1  ;;  %v4791_v42 = vadd.f32 %v1787_v16, %v4636_v44  ;;  %v1790_v58 = vmul.f32 %v4053_v50, %v5716_v55  ;;  %5717 = vst [vmem:[#allocation30_spill] sm:$0xff] %v4795_v38  ;;  %v5719_v44 = vld [vmem:[#allocation170_spill] sm:$0xff]  ;;  %v5720_v47 = vld [vmem:[#allocation153_spill] sm:$0xff] }
 0x2a7   : > { %v4804_v7 = vadd.f32 %v1786_v27, %v4639_v37  ;;  %v1793_v30 = vmul.f32 %v4053_v50, %v5718_v4  ;;  %v2072_v1 = vadd.f32 %v2040_v2, %v1811_v51  ;;  %v2042_v54 = vmul.f32 %v4089_v61, %v5719_v44  ;;  %v2399_v16 = vpop.permute.xlu0 %2398  ;;  %v5721_v27 = vld [vmem:[#allocation171_spill] sm:$0xff]  ;;  %v5724_v4 = vld [vmem:[#allocation172_spill] sm:$0xff] }
 0x2a8   : > { %v4811_v26 = vadd.f32 %v1789_v62, %v4644_v23  ;;  %v4814_v31 = vadd.f32 %v1788_v33, %v4647_v5  ;;  %v4817_v52 = vadd.f32 %v1791_v3, %v4650_v6  ;;  %v1792_v37 = vmul.f32 %v4053_v50, %v5720_v47  ;;  %v5722_v6 = vld [vmem:[#allocation154_spill] sm:$0xff]  ;;  %v5723_v62 = vld [vmem:[#allocation155_spill] sm:$0xff] }
 0x2a9   : > { %v2041_v55 = vmul.f32 %v4089_v61, %v5721_v27  ;;  %v2332_v51 = vadd.f32 %v2300_v20, %v2072_v1  ;;  %v2302_v2 = vmul.f32 %v4750_v12, %v4167_v43  ;;  %v2560_v23 = vmul.f32 %v4800_v41, %v2399_v16  ;;  %v4840_v43 = vld [vmem:[%s5221_s2] ss:$0 sm:$0xff]  ;;  %v4842_v20 = vpop.permute.xlu1 %2293  ;;  %v5726_v27 = vld [vmem:[#allocation173_spill] sm:$0xff] }
 0x2aa   : > { %v4829_v5 = vadd.f32 %v1790_v58, %v4657_v22  ;;  %v1795_v33 = vmul.f32 %v4053_v50, %v5722_v6  ;;  %v1794_v3 = vmul.f32 %v4053_v50, %v5723_v62  ;;  %v2044_v44 = vmul.f32 %v4089_v61, %v5724_v4  ;;  %5725 = vst [vmem:[#allocation34_spill] sm:$0xff] %v4842_v20 }
 0x2ab   : > { %v4845_v1 = vadd.f32 %v1793_v30, %v4666_v34  ;;  %v2074_v22 = vadd.f32 %v2042_v54, %v1813_v28  ;;  %v2301_v58 = vmul.f32 %v4750_v12, %v4190_v59  ;;  %v2592_v47 = vadd.f32 %v2560_v23, %v2332_v51  ;;  %v2409_v4 = vpop.permute.xlu0 %2408  ;;  %v5727_v54 = vld [vmem:[#allocation174_spill] sm:$0xff]  ;;  %v5729_v23 = vld [vmem:[#allocation175_spill] sm:$0xff] }
 0x2ac   : > { %v4850_v16 = vadd.f32 %v1792_v37, %v4677_v53  ;;  %v2043_v6 = vmul.f32 %v4089_v61, %v5726_v27  ;;  %v2304_v62 = vmul.f32 %v4750_v12, %v4214_v17  ;;  %v2073_v20 = vadd.f32 %v2041_v55, %v1812_v14 }
 0x2ad   : > { %v2334_v38 = vadd.f32 %v2302_v2, %v2074_v22  ;;  %v2630_v34 = vadd.f32 %v4840_v43, %v2592_v47  ;;  %v2562_v28 = vmul.f32 %v4800_v41, %v2409_v4  ;;  %v4859_v59 = vadd.f32 %v1795_v33, %v4686_v15  ;;  %v2404_v51 = vpop.permute.xlu1 %2403  ;;  %v5728_v2 = vld [vmem:[#allocation156_spill] sm:$0xff] }
 0x2ae   : > { %v4862_v53 = vadd.f32 %v1794_v3, %v4697_v13  ;;  %v2076_v30 = vadd.f32 %v2044_v44, %v1815_v18  ;;  %v2046_v37 = vmul.f32 %v4089_v61, %v5727_v54  ;;  %v2333_v17 = vadd.f32 %v2301_v58, %v2073_v20  ;;  %v5730_v58 = vld [vmem:[#allocation157_spill] sm:$0xff]  ;;  %v5731_v4 = vld [vmem:[#allocation176_spill] sm:$0xff] }
 0x2af   : > { %v2303_v14 = vmul.f32 %v4750_v12, %v4234_v25  ;;  %2663 = vst.msk [vmem:[%s4868_s10] sm:$0xff] %vm2662_vm3, %v2630_v34  ;;  %v2594_v55 = vadd.f32 %v2562_v28, %v2334_v38  ;;  %v2561_v15 = vmul.f32 %v4800_v41, %v2404_v51  ;;  %v1797_v13 = vmul.f32 %v4053_v50, %v5728_v2  ;;  %v2419_v44 = vpop.permute.xlu0 %2418 }
 0x2b0   : > { %v2075_v18 = vadd.f32 %v2043_v6, %v1814_v49  ;;  %v2045_v33 = vmul.f32 %v4089_v61, %v5729_v23  ;;  %v2336_v3 = vadd.f32 %v2304_v62, %v2076_v30  ;;  %v2306_v25 = vmul.f32 %v4750_v12, %v4254_v35 }
 0x2b1   : > { %v2632_v20 = vadd.f32 %v4840_v43, %v2594_v55  ;;  %v2593_v22 = vadd.f32 %v2561_v15, %v2333_v17  ;;  %v2564_v38 = vmul.f32 %v4800_v41, %v2419_v44  ;;  %v1796_v47 = vmul.f32 %v4053_v50, %v5730_v58  ;;  %v2414_v62 = vpop.permute.xlu1 %2413  ;;  %v5733_v17 = vld [vmem:[#allocation58_spill] sm:$0xff]  ;;  %v5735_v44 = vld [vmem:[#allocation60_spill] sm:$0xff] }
 0x2b2   : > { %v2078_v27 = vadd.f32 %v2046_v37, %v1817_v48  ;;  %v2048_v49 = vmul.f32 %v4089_v61, %v5731_v4  ;;  %v2305_v6 = vmul.f32 %v4750_v12, %v4278_v39  ;;  %v2335_v34 = vadd.f32 %v2303_v14, %v2075_v18  ;;  %v5732_v37 = vld [vmem:[#allocation177_spill] sm:$0xff] }
 0x2b3   : > { %2665 = vst.msk [vmem:[%s4868_s10 + $0x10] sm:$0xff] %vm2662_vm3, %v2632_v20  ;;  %v2631_v35 = vadd.f32 %v4840_v43, %v2593_v22  ;;  %v2596_v28 = vadd.f32 %v2564_v38, %v2336_v3  ;;  %v2563_v30 = vmul.f32 %v4800_v41, %v2414_v62  ;;  %v4892_v54 = vadd.f32 %v1797_v13, %v4700_v19  ;;  %v2429_v14 = vpop.permute.xlu0 %2428  ;;  %v5734_v13 = vld [vmem:[#allocation178_spill] sm:$0xff] }
 0x2b4   : > { %v2077_v48 = vadd.f32 %v2045_v33, %v4788_v46  ;;  %v2047_v51 = vmul.f32 %v4089_v61, %v5732_v37  ;;  %v2308_v39 = vmul.f32 %v4750_v12, %v5733_v17  ;;  %v2338_v55 = vadd.f32 %v2306_v25, %v2078_v27 }
 0x2b5   : > { %2664 = vst.msk [vmem:[%s4868_s10 + $0x8] sm:$0xff] %vm2662_vm3, %v2631_v35  ;;  %v2634_v15 = vadd.f32 %v4840_v43, %v2596_v28  ;;  %v2595_v2 = vadd.f32 %v2563_v30, %v2335_v34  ;;  %v2566_v18 = vmul.f32 %v4800_v41, %v2429_v14  ;;  %v4904_v19 = vadd.f32 %v1796_v47, %v4703_v29  ;;  %v2424_v3 = vpop.permute.xlu1 %2423  ;;  %v5736_v29 = vld [vmem:[#allocation158_spill] sm:$0xff]  ;;  %v5737_v47 = vld [vmem:[#allocation179_spill] sm:$0xff] }
 0x2b6   : > { %v2080_v46 = vadd.f32 %v2048_v49, %v4791_v42  ;;  %v2050_v23 = vmul.f32 %v4089_v61, %v5734_v13  ;;  %v2337_v33 = vadd.f32 %v2305_v6, %v2077_v48  ;;  %v2307_v25 = vmul.f32 %v4750_v12, %v5735_v44  ;;  %v5738_v28 = vld [vmem:[#allocation159_spill] sm:$0xff]  ;;  %v5739_v48 = vld [vmem:[#allocation180_spill] sm:$0xff] }
 0x2b7   : > { %2667 = vst.msk [vmem:[%s4868_s10 + $0x20] sm:$0xff] %vm2662_vm3, %v2634_v15  ;;  %v2633_v20 = vadd.f32 %v4840_v43, %v2595_v2  ;;  %v2598_v22 = vadd.f32 %v2566_v18, %v2338_v55  ;;  %v2565_v38 = vmul.f32 %v4800_v41, %v2424_v3  ;;  %v1799_v58 = vmul.f32 %v4053_v50, %v5736_v29  ;;  %v2439_v49 = vpop.permute.xlu0 %2438  ;;  %v5741_v18 = vld [vmem:[#allocation181_spill] sm:$0xff]  ;;  %v5742_v13 = vld [vmem:[#allocation64_spill] sm:$0xff] }
 0x2b8   : > { %v2079_v42 = vadd.f32 %v2047_v51, %v4804_v7  ;;  %v2049_v27 = vmul.f32 %v4089_v61, %v5737_v47  ;;  %v2340_v4 = vadd.f32 %v2308_v39, %v2080_v46  ;;  %v2310_v6 = vmul.f32 %v4750_v12, %v4342_v63  ;;  %v5740_v51 = vld [vmem:[#allocation62_spill] sm:$0xff] }
 0x2b9   : > { %2666 = vst.msk [vmem:[%s4868_s10 + $0x18] sm:$0xff] %vm2662_vm3, %v2633_v20  ;;  %v2636_v62 = vadd.f32 %v4840_v43, %v2598_v22  ;;  %v2597_v34 = vadd.f32 %v2565_v38, %v2337_v33  ;;  %v2568_v35 = vmul.f32 %v4800_v41, %v2439_v49  ;;  %v1798_v30 = vmul.f32 %v4053_v50, %v5738_v28  ;;  %v2434_v63 = vpop.permute.xlu1 %2433  ;;  %v5743_v22 = vld [vmem:[#allocation182_spill] sm:$0xff] }
 0x2ba   : > { %v2082_v7 = vadd.f32 %v2050_v23, %v4811_v26  ;;  %v2052_v37 = vmul.f32 %v4089_v61, %v5739_v48  ;;  %v2309_v17 = vmul.f32 %v4750_v12, %v5740_v51  ;;  %v2339_v39 = vadd.f32 %v2307_v25, %v2079_v42  ;;  %v5744_v42 = vld [vmem:[#allocation67_spill] sm:$0xff] }
 0x2bb   : > { %2669 = vst.msk [vmem:[%s4868_s10 + $0x30] sm:$0xff] %vm2662_vm3, %v2636_v62  ;;  %v2635_v14 = vadd.f32 %v4840_v43, %v2597_v34  ;;  %v2600_v55 = vadd.f32 %v2568_v35, %v2340_v4  ;;  %v2567_v15 = vmul.f32 %v4800_v41, %v2434_v63  ;;  %v4938_v2 = vadd.f32 %v1799_v58, %v4707_v9  ;;  %v2449_v33 = vpop.permute.xlu0 %2448  ;;  %v5746_v62 = vld [vmem:[#allocation183_spill] sm:$0xff] }
 0x2bc   : > { %v2081_v26 = vadd.f32 %v2049_v27, %v4814_v31  ;;  %v2051_v46 = vmul.f32 %v4089_v61, %v5741_v18  ;;  %v2312_v23 = vmul.f32 %v4750_v12, %v5742_v13  ;;  %v2342_v3 = vadd.f32 %v2310_v6, %v2082_v7 }
 0x2bd   : > { %2668 = vst.msk [vmem:[%s4868_s10 + $0x28] sm:$0xff] %vm2662_vm3, %v2635_v14  ;;  %v2638_v44 = vadd.f32 %v4840_v43, %v2600_v55  ;;  %v2599_v25 = vadd.f32 %v2567_v15, %v2339_v39  ;;  %v2570_v20 = vmul.f32 %v4800_v41, %v2449_v33  ;;  %v4950_v9 = vadd.f32 %v1798_v30, %v4710_v0  ;;  %v2444_v58 = vpop.permute.xlu1 %2443  ;;  %v5745_v0 = vld [vmem:[#allocation160_spill] sm:$0xff]  ;;  %v5747_v30 = vld [vmem:[#allocation69_spill] sm:$0xff]  ;;  %v5750_v55 = vld [vmem:[#allocation70_spill] sm:$0xff] }
 0x2be   : > { %v2084_v31 = vadd.f32 %v2052_v37, %v4817_v52  ;;  %v2054_v38 = vmul.f32 %v4089_v61, %v5743_v22  ;;  %v2341_v29 = vadd.f32 %v2309_v17, %v2081_v26  ;;  %v2311_v47 = vmul.f32 %v4750_v12, %v5744_v42  ;;  %v5748_v17 = vld [vmem:[#allocation161_spill] sm:$0xff]  ;;  %v5749_v39 = vld [vmem:[#allocation184_spill] sm:$0xff]  ;;  %v5753_v42 = vld [vmem:[#allocation187_spill] sm:$0xff] }
 0x2bf   : > { %2671 = vst.msk [vmem:[%s4868_s10 + $0x40] sm:$0xff] %vm2662_vm3, %v2638_v44  ;;  %v2637_v27 = vadd.f32 %v4840_v43, %v2599_v25  ;;  %v2602_v4 = vadd.f32 %v2570_v20, %v2342_v3  ;;  %v2569_v49 = vmul.f32 %v4800_v41, %v2444_v58  ;;  %v1801_v6 = vmul.f32 %v4053_v50, %v5745_v0  ;;  %v2459_v28 = vpop.permute.xlu0 %2458  ;;  %v5751_v3 = vld [vmem:[#allocation186_spill] sm:$0xff]  ;;  %v5752_v25 = vld [vmem:[#allocation71_spill] sm:$0xff] }
 0x2c0   : > { %v2083_v52 = vadd.f32 %v2051_v46, %v4829_v5  ;;  %v2053_v34 = vmul.f32 %v4089_v61, %v5746_v62  ;;  %v2344_v35 = vadd.f32 %v2312_v23, %v2084_v31  ;;  %v2314_v7 = vmul.f32 %v4750_v12, %v5747_v30 }
 0x2c1   : > { %2670 = vst.msk [vmem:[%s4868_s10 + $0x38] sm:$0xff] %vm2662_vm3, %v2637_v27  ;;  %v2640_v48 = vadd.f32 %v4840_v43, %v2602_v4  ;;  %v2601_v37 = vadd.f32 %v2569_v49, %v2341_v29  ;;  %v2572_v51 = vmul.f32 %v4800_v41, %v2459_v28  ;;  %v1800_v63 = vmul.f32 %v4053_v50, %v5748_v17  ;;  %v2454_v26 = vpop.permute.xlu1 %2453  ;;  %v5754_v49 = vld [vmem:[#allocation12_spill] sm:$0xff] }
 0x2c2   : > { %v2086_v5 = vadd.f32 %v2054_v38, %v4845_v1  ;;  %v2056_v14 = vmul.f32 %v4089_v61, %v5749_v39  ;;  %v2313_v15 = vmul.f32 %v4750_v12, %v5750_v55  ;;  %v2343_v18 = vadd.f32 %v2311_v47, %v2083_v52  ;;  %v5758_v39 = vld [vmem:[#allocation189_spill] sm:$0xff] }
 0x2c3   : > { %2673 = vst.msk [vmem:[%s4868_s10 + $0x50] sm:$0xff] %vm2662_vm3, %v2640_v48  ;;  %v2639_v46 = vadd.f32 %v4840_v43, %v2601_v37  ;;  %v2604_v13 = vadd.f32 %v2572_v51, %v2344_v35  ;;  %v2571_v23 = vmul.f32 %v4800_v41, %v2454_v26  ;;  %v4984_v33 = vadd.f32 %v1801_v6, %v4713_v32  ;;  %v2469_v31 = vpop.permute.xlu0 %2468  ;;  %v5756_v35 = vld [vmem:[#allocation188_spill] sm:$0xff]  ;;  %v5759_v55 = vld [vmem:[#allocation13_spill] sm:$0xff] }
 0x2c4   : > { %v2085_v1 = vadd.f32 %v2053_v34, %v4850_v16  ;;  %v2055_v44 = vmul.f32 %v4089_v61, %v5751_v3  ;;  %v2316_v20 = vmul.f32 %v4750_v12, %v5752_v25  ;;  %v2346_v22 = vadd.f32 %v2314_v7, %v2086_v5 }
 0x2c5   : > { %2672 = vst.msk [vmem:[%s4868_s10 + $0x48] sm:$0xff] %vm2662_vm3, %v2639_v46  ;;  %v2642_v38 = vadd.f32 %v4840_v43, %v2604_v13  ;;  %v2603_v29 = vadd.f32 %v2571_v23, %v2343_v18  ;;  %v2574_v58 = vmul.f32 %v4800_v41, %v2469_v31  ;;  %v4996_v32 = vadd.f32 %v1800_v63, %v4720_v45  ;;  %v2464_v4 = vpop.permute.xlu1 %2463  ;;  %v5755_v45 = vld [vmem:[#allocation162_spill] sm:$0xff]  ;;  %v5757_v63 = vld [vmem:[#allocation163_spill] sm:$0xff] }
 0x2c6   : > { %v2088_v16 = vadd.f32 %v2056_v14, %v4859_v59  ;;  %v2058_v47 = vmul.f32 %v4089_v61, %v5753_v42  ;;  %v2345_v27 = vadd.f32 %v2313_v15, %v2085_v1  ;;  %v2315_v0 = vmul.f32 %v4750_v12, %v5754_v49  ;;  %v5760_v1 = vld [vmem:[#allocation190_spill] sm:$0xff] }
 0x2c7   : > { %2675 = vst.msk [vmem:[%s4868_s10 + $0x60] sm:$0xff] %vm2662_vm3, %v2642_v38  ;;  %v2641_v6 = vadd.f32 %v4840_v43, %v2603_v29  ;;  %v2606_v52 = vadd.f32 %v2574_v58, %v2346_v22  ;;  %v2573_v62 = vmul.f32 %v4800_v41, %v2464_v4  ;;  %v1803_v34 = vmul.f32 %v4053_v50, %v5755_v45  ;;  %v2479_v7 = vpop.permute.xlu0 %2478  ;;  %v5762_v58 = vld [vmem:[#allocation191_spill] sm:$0xff] }
 0x2c8   : > { %v2087_v59 = vadd.f32 %v2055_v44, %v4862_v53  ;;  %v2057_v28 = vmul.f32 %v4089_v61, %v5756_v35  ;;  %v2348_v30 = vadd.f32 %v2316_v20, %v2088_v16  ;;  %v2318_v48 = vmul.f32 %v4750_v12, %v4518_v36  ;;  %v5761_v44 = vld [vmem:[#allocation72_spill] sm:$0xff] }
 0x2c9   : > { %2674 = vst.msk [vmem:[%s4868_s10 + $0x58] sm:$0xff] %vm2662_vm3, %v2641_v6  ;;  %v2644_v37 = vadd.f32 %v4840_v43, %v2606_v52  ;;  %v2605_v51 = vadd.f32 %v2573_v62, %v2345_v27  ;;  %v2576_v17 = vmul.f32 %v4800_v41, %v2479_v7  ;;  %v1802_v5 = vmul.f32 %v4053_v50, %v5757_v63  ;;  %v2474_v36 = vpop.permute.xlu1 %2473  ;;  %v5763_v27 = vld [vmem:[#allocation15_spill] sm:$0xff]  ;;  %v5764_v52 = vld [vmem:[#allocation164_spill] sm:$0xff]  ;;  %v5765_v62 = vld [vmem:[#allocation10_spill] sm:$0xff] }
 0x2ca   : > { %v2090_v53 = vadd.f32 %v2058_v47, %v4892_v54  ;;  %v2060_v14 = vmul.f32 %v4089_v61, %v5758_v39  ;;  %v2317_v15 = vmul.f32 %v4750_v12, %v5759_v55  ;;  %v2347_v26 = vadd.f32 %v2315_v0, %v2087_v59  ;;  %v5768_v63 = vld [vmem:[#allocation20_spill] sm:$0xff] }
 0x2cb   : > { %2677 = vst.msk [vmem:[%s4868_s10 + $0x70] sm:$0xff] %vm2662_vm3, %v2644_v37  ;;  %v2643_v18 = vadd.f32 %v4840_v43, %v2605_v51  ;;  %v2608_v46 = vadd.f32 %v2576_v17, %v2348_v30  ;;  %v2575_v13 = vmul.f32 %v4800_v41, %v2474_v36  ;;  %v1835_v23 = vadd.f32 %v1803_v34, %v4723_v56  ;;  %v2489_v20 = vpop.permute.xlu0 %2488  ;;  %v5767_v51 = vld [vmem:[#allocation18_spill] sm:$0xff]  ;;  %v5769_v36 = vld [vmem:[#allocation32_spill] sm:$0xff] }
 0x2cc   : > { %v2089_v54 = vadd.f32 %v2057_v28, %v4904_v19  ;;  %v2059_v3 = vmul.f32 %v4089_v61, %v5760_v1  ;;  %v2320_v25 = vmul.f32 %v4750_v12, %v5761_v44  ;;  %v2350_v31 = vadd.f32 %v2318_v48, %v2090_v53  ;;  %v5766_v48 = vld [vmem:[#allocation165_spill] sm:$0xff] }
 0x2cd   : > { %2676 = vst.msk [vmem:[%s4868_s10 + $0x68] sm:$0xff] %vm2662_vm3, %v2643_v18  ;;  %v2646_v22 = vadd.f32 %v4840_v43, %v2608_v46  ;;  %v2607_v38 = vadd.f32 %v2575_v13, %v2347_v26  ;;  %v2578_v29 = vmul.f32 %v4800_v41, %v2489_v20  ;;  %v1834_v56 = vadd.f32 %v1802_v5, %v4726_v21  ;;  %v2484_v47 = vpop.permute.xlu1 %2483  ;;  %v5770_v18 = vld [vmem:[#allocation73_spill] sm:$0xff] }
 0x2ce   : > { %v2092_v19 = vadd.f32 %v2060_v14, %v4938_v2  ;;  %v2062_v16 = vmul.f32 %v4089_v61, %v5762_v58  ;;  %v2349_v42 = vadd.f32 %v2317_v15, %v2089_v54  ;;  %v2319_v4 = vmul.f32 %v4750_v12, %v5763_v27 }
 0x2cf   : > { %2679 = vst.msk [vmem:[%s4868_s10 + $0x80] sm:$0xff] %vm2662_vm3, %v2646_v22  ;;  %v2645_v49 = vadd.f32 %v4840_v43, %v2607_v38  ;;  %v2610_v0 = vadd.f32 %v2578_v29, %v2350_v31  ;;  %v2577_v6 = vmul.f32 %v4800_v41, %v2484_v47  ;;  %v1805_v21 = vmul.f32 %v4053_v50, %v5764_v52  ;;  %v2499_v59 = vpop.permute.xlu0 %2498  ;;  %v5772_v38 = vld [vmem:[#allocation22_spill] sm:$0xff]  ;;  %v5774_v47 = vld [vmem:[#allocation48_spill] sm:$0xff] }
 0x2d0   : > { %v2091_v2 = vadd.f32 %v2059_v3, %v4950_v9  ;;  %v2061_v45 = vmul.f32 %v4089_v61, %v5765_v62  ;;  %v2352_v34 = vadd.f32 %v2320_v25, %v2092_v19  ;;  %v2322_v35 = vmul.f32 %v4750_v12, %v4606_v40  ;;  %v5776_v62 = vld [vmem:[#allocation167_spill] sm:$0xff] }
 0x2d1   : > { %2678 = vst.msk [vmem:[%s4868_s10 + $0x78] sm:$0xff] %vm2662_vm3, %v2645_v49  ;;  %v2648_v28 = vadd.f32 %v4840_v43, %v2610_v0  ;;  %v2609_v30 = vadd.f32 %v2577_v6, %v2349_v42  ;;  %v2580_v7 = vmul.f32 %v4800_v41, %v2499_v59  ;;  %v1804_v37 = vmul.f32 %v4053_v50, %v5766_v48  ;;  %v2494_v40 = vpop.permute.xlu1 %2493  ;;  %v5773_v42 = vld [vmem:[#allocation166_spill] sm:$0xff]  ;;  %v5775_v0 = vld [vmem:[#allocation24_spill] sm:$0xff] }
 0x2d2   : > { %v2094_v9 = vadd.f32 %v2062_v16, %v4984_v33  ;;  %v2064_v17 = vmul.f32 %v4089_v61, %v5767_v51  ;;  %v2321_v5 = vmul.f32 %v4750_v12, %v5768_v63  ;;  %v2351_v53 = vadd.f32 %v2319_v4, %v2091_v2 }
 0x2d3   : > { %2681 = vst.msk [vmem:[%s4868_s10 + $0x90] sm:$0xff] %vm2662_vm3, %v2648_v28  ;;  %v2647_v39 = vadd.f32 %v4840_v43, %v2609_v30  ;;  %v2612_v14 = vadd.f32 %v2580_v7, %v2352_v34  ;;  %v2579_v55 = vmul.f32 %v4800_v41, %v2494_v40  ;;  %v1837_v15 = vadd.f32 %v1805_v21, %v4731_v10  ;;  %v2509_v13 = vpop.permute.xlu0 %2508  ;;  %v5777_v34 = vld [vmem:[#allocation50_spill] sm:$0xff] }
 0x2d4   : > { %v2093_v33 = vadd.f32 %v2061_v45, %v4996_v32  ;;  %v2063_v26 = vmul.f32 %v4089_v61, %v5769_v36  ;;  %v2324_v46 = vmul.f32 %v4750_v12, %v5770_v18  ;;  %v2354_v54 = vadd.f32 %v2322_v35, %v2094_v9  ;;  %v5771_v32 = vld [vmem:[#allocation40_spill] sm:$0xff] }
 0x2d5   : > { %2680 = vst.msk [vmem:[%s4868_s10 + $0x88] sm:$0xff] %vm2662_vm3, %v2647_v39  ;;  %v2650_v1 = vadd.f32 %v4840_v43, %v2612_v14  ;;  %v2611_v3 = vadd.f32 %v2579_v55, %v2351_v53  ;;  %v2582_v44 = vmul.f32 %v4800_v41, %v2509_v13  ;;  %v1836_v10 = vadd.f32 %v1804_v37, %v4734_v11  ;;  %v2504_v22 = vpop.permute.xlu1 %2503  ;;  %v5782_v13 = vld [vmem:[#allocation28_spill] sm:$0xff] }
 0x2d6   : > { %v2096_v25 = vadd.f32 %v2064_v17, %v1835_v23  ;;  %v2066_v20 = vmul.f32 %v4089_v61, %v5771_v32  ;;  %v2353_v31 = vadd.f32 %v2321_v5, %v2093_v33  ;;  %v2323_v29 = vmul.f32 %v4750_v12, %v5772_v38  ;;  %v5778_v17 = vld [vmem:[#allocation52_spill] sm:$0xff]  ;;  %v5779_v5 = vld [vmem:[#allocation26_spill] sm:$0xff] }
 0x2d7   : > { %2683 = vst.msk [vmem:[%s4868_s10 + $0xa0] sm:$0xff] %vm2662_vm3, %v2650_v1  ;;  %v2649_v19 = vadd.f32 %v4840_v43, %v2611_v3  ;;  %v2614_v58 = vadd.f32 %v2582_v44, %v2354_v54  ;;  %v2581_v16 = vmul.f32 %v4800_v41, %v2504_v22  ;;  %v1807_v11 = vmul.f32 %v4053_v50, %v5773_v42  ;;  %v2519_v49 = vpop.permute.xlu0 %2518  ;;  %v5785_v42 = vld [vmem:[#allocation30_spill] sm:$0xff] }
 0x2d8   : > { %v2095_v23 = vadd.f32 %v2063_v26, %v1834_v56  ;;  %v2065_v27 = vmul.f32 %v4089_v61, %v5774_v47  ;;  %v2356_v4 = vadd.f32 %v2324_v46, %v2096_v25  ;;  %v2326_v6 = vmul.f32 %v4750_v12, %v5775_v0 }
 0x2d9   : > { %2682 = vst.msk [vmem:[%s4868_s10 + $0x98] sm:$0xff] %vm2662_vm3, %v2649_v19  ;;  %v2652_v52 = vadd.f32 %v4840_v43, %v2614_v58  ;;  %v2613_v21 = vadd.f32 %v2581_v16, %v2353_v31  ;;  %v2584_v2 = vmul.f32 %v4800_v41, %v2519_v49  ;;  %v1806_v45 = vmul.f32 %v4053_v50, %v5776_v62  ;;  %v2514_v28 = vpop.permute.xlu1 %2513  ;;  %v5786_v49 = vld [vmem:[#allocation68_spill] sm:$0xff] }
 0x2da   : > { %v2098_v56 = vadd.f32 %v2066_v20, %v1837_v15  ;;  %v2068_v59 = vmul.f32 %v4089_v61, %v5777_v34  ;;  %v2325_v35 = vmul.f32 %v4750_v12, %v4717_v8  ;;  %v2355_v30 = vadd.f32 %v2323_v29, %v2095_v23  ;;  %v5780_v15 = vld [vmem:[#allocation74_spill] sm:$0xff] }
 0x2db   : > { %2685 = vst.msk [vmem:[%s4868_s10 + $0xb0] sm:$0xff] %vm2662_vm3, %v2652_v52  ;;  %v2651_v7 = vadd.f32 %v4840_v43, %v2613_v21  ;;  %v2616_v48 = vadd.f32 %v2584_v2, %v2356_v4  ;;  %v2583_v37 = vmul.f32 %v4800_v41, %v2514_v28  ;;  %v1839_v9 = vadd.f32 %v1807_v11, %v4737_v60  ;;  %v2529_v8 = vpop.permute.xlu0 %2528  ;;  %v5781_v60 = vld [vmem:[#allocation168_spill] sm:$0xff]  ;;  %v5784_v20 = vld [vmem:[#allocation54_spill] sm:$0xff] }
 0x2dc   : > { %v2097_v51 = vadd.f32 %v2065_v27, %v1836_v10  ;;  %v2067_v63 = vmul.f32 %v4089_v61, %v5778_v17  ;;  %v2328_v40 = vmul.f32 %v4750_v12, %v5779_v5  ;;  %v2358_v53 = vadd.f32 %v2326_v6, %v2098_v56  ;;  %v5783_v10 = vld [vmem:[#allocation16_spill] sm:$0xff] }
 0x2dd   : > { %2684 = vst.msk [vmem:[%s4868_s10 + $0xa8] sm:$0xff] %vm2662_vm3, %v2651_v7  ;;  %v2654_v39 = vadd.f32 %v4840_v43, %v2616_v48  ;;  %v2615_v14 = vadd.f32 %v2583_v37, %v2355_v30  ;;  %v2586_v55 = vmul.f32 %v4800_v41, %v2529_v8  ;;  %v1838_v33 = vadd.f32 %v1806_v45, %v5780_v15  ;;  %v5787_v45 = vld [vmem:[#allocation34_spill] sm:$0xff]  ;;  %v5788_v48 = vld [vmem:[#allocation56_spill] sm:$0xff] }
 0x2de   : > { %v1808_v36 = vmul.f32 %v4053_v50, %v5781_v60  ;;  %v2100_v26 = vadd.f32 %v2068_v59, %v1839_v9  ;;  %v2357_v18 = vadd.f32 %v2325_v35, %v2097_v51  ;;  %v2327_v54 = vmul.f32 %v4750_v12, %v5782_v13 }
 0x2df   : > { %v2524_v46 = vpop.permute.xlu1 %2523  ;;  %2687 = vst.msk [vmem:[%s4868_s10 + $0xc0] sm:$0xff] %vm2662_vm3, %v2654_v39  ;;  %v2653_v1 = vadd.f32 %v4840_v43, %v2615_v14  ;;  %v2618_v3 = vadd.f32 %v2586_v55, %v2358_v53  ;;  %v1580_v25 = vadd.f32 %v4765_v57, %v5783_v10  ;;  %v2099_v32 = vadd.f32 %v2067_v63, %v1838_v33 }
 0x2e0   : > { %v2585_v44 = vmul.f32 %v4800_v41, %v2524_v46  ;;  %v2069_v50 = vmul.f32 %v4089_v61, %v5784_v20  ;;  %v2360_v31 = vadd.f32 %v2328_v40, %v2100_v26  ;;  %v2539_v22 = vpop.permute.xlu0 %2538  ;;  %v2330_v38 = vmul.f32 %v4750_v12, %v4779_v24 }
 0x2e1   : > { %2686 = vst.msk [vmem:[%s4868_s10 + $0xb8] sm:$0xff] %vm2662_vm3, %v2653_v1  ;;  %v2656_v29 = vadd.f32 %v4840_v43, %v2618_v3  ;;  %v2588_v58 = vmul.f32 %v4800_v41, %v2539_v22  ;;  %v1840_v16 = vadd.f32 %v1808_v36, %v1580_v25  ;;  %v2329_v57 = vmul.f32 %v4750_v12, %v5785_v42 }
 0x2e2   : > { %v2617_v19 = vadd.f32 %v2585_v44, %v2357_v18  ;;  %v2359_v61 = vadd.f32 %v2327_v54, %v2099_v32  ;;  %v2362_v0 = vadd.f32 %v2330_v38, %v5786_v49  ;;  %v2331_v56 = vmul.f32 %v4750_v12, %v5787_v45 }
 0x2e3   : > { %v2534_v11 = vpop.permute.xlu1 %2533  ;;  %2689 = vst.msk [vmem:[%s4868_s10 + $0xd0] sm:$0xff] %vm2662_vm3, %v2656_v29  ;;  %v2620_v24 = vadd.f32 %v2588_v58, %v2360_v31  ;;  %v2101_v27 = vadd.f32 %v2069_v50, %v1840_v16 }
 0x2e4   : > { %v2655_v23 = vadd.f32 %v4840_v43, %v2617_v19  ;;  %v2587_v47 = vmul.f32 %v4800_v41, %v2534_v11  ;;  %v2549_v4 = vpop.permute.xlu0 %2548  ;;  %v2363_v37 = vadd.f32 %v2331_v56, %v5788_v48 }
 0x2e5   : > { %v2658_v6 = vadd.f32 %v4840_v43, %v2620_v24  ;;  %v2590_v21 = vmul.f32 %v4800_v41, %v2549_v4  ;;  %v2361_v2 = vadd.f32 %v2329_v57, %v2101_v27 }
 0x2e6   : > { %2688 = vst.msk [vmem:[%s4868_s10 + $0xc8] sm:$0xff] %vm2662_vm3, %v2655_v23  ;;  %v2619_v52 = vadd.f32 %v2587_v47, %v2359_v61 }
 0x2e7   : > { %v2544_v62 = vpop.permute.xlu1 %2543  ;;  %2691 = vst.msk [vmem:[%s4868_s10 + $0xe0] sm:$0xff] %vm2662_vm3, %v2658_v6  ;;  %v2622_v59 = vadd.f32 %v2590_v21, %v2362_v0 }
 0x2e8   : > { %v2657_v34 = vadd.f32 %v4840_v43, %v2619_v52  ;;  %v2589_v35 = vmul.f32 %v4800_v41, %v2544_v62 }
 0x2e9   : > { %v2660_v28 = vadd.f32 %v4840_v43, %v2622_v59 }
 0x2ea   : > { %2690 = vst.msk [vmem:[%s4868_s10 + $0xd8] sm:$0xff] %vm2662_vm3, %v2657_v34  ;;  %v2621_v30 = vadd.f32 %v2589_v35, %v2361_v2 }
 0x2eb   : > { %v2554_v7 = vpop.permute.xlu1 %2553  ;;  %2693 = vst.msk [vmem:[%s4868_s10 + $0xf0] sm:$0xff] %vm2662_vm3, %v2660_v28 }
 0x2ec   : > { %v2659_v12 = vadd.f32 %v4840_v43, %v2621_v30  ;;  %v2591_v9 = vmul.f32 %v4800_v41, %v2554_v7 }
 0x2ee   : > { %2692 = vst.msk [vmem:[%s4868_s10 + $0xe8] sm:$0xff] %vm2662_vm3, %v2659_v12  ;;  %v2623_v51 = vadd.f32 %v2591_v9, %v2363_v37 }
 0x2f0   : > { %v2661_v17 = vadd.f32 %v4840_v43, %v2623_v51 }
 0x2f2   : > { %2694 = vst.msk [vmem:[%s4868_s10 + $0xf8] sm:$0xff] %vm2662_vm3, %v2661_v17 }
 0x2f3   : > { %2845 = shalt.err (!%p2842_p3)
}
 0x2f4   : > { %s2846_s29 = scalar_lea.hbm %s5170_s24, 4096  ;;  %s2850_s5 = scalar_lea.hbm %s5222_s3, 8192 }
 0x2f5   : > { %p2847_p4 = scmp.ne.s32.totalorder %s5170_s24, %s2846_s29  ;;  %p2851_p9 = scmp.lt.s32.totalorder %s5170_s24, %s5222_s3 }
 0x2f6   : > { %p2852_p10 = scmp.lt.s32.totalorder %s2850_s5, %s2846_s29 }
 0x2f7   : > { %p2848_p7 = pnand %p2847_p4, %p2957_p5 }
 0x2f8   : > { %p2853_p11 = por %p2852_p10, %p2851_p9 }
 0x2f9   : > { %p2849_p8 = pneg %p2848_p7 }
 0x2fb   : > { %p2854_p12 = pnand %p2853_p11, %p2849_p8 }
 0x2fd   : > { %2857 = shalt.err (!%p2854_p12)
}
 0x2fe   : > { %s2897_s8 = smov 128   ;;  %s2898_s9 = smov 8  }
 0x2ff   : > { %2787 = dma.vmem_to_hbm [thread:$0]  (%p2957_p5), %s5172_s17, 4096, %s5170_s24, %s5179_s16, %s2897_s8, %s2897_s8, %s2898_s9  }
 0x300 PF: > { %p2793_p13 = scmp.ge.s32.totalorder %s2892_s15, 2  ;;  %s2724_s10 = sand.u32 1, %s2880_s12  }
 0x301   : > { %s2725_s11 = scalar_lea.sflag [#allocation4], %s2724_s10 }
 0x302   : > { %p2790_p0 = pnand %p2793_p13, %p2961_p6 }
 0x304   : > { %p2791_p1 = pneg %p2790_p0 }
 0x306   : > { %2875 = dma.done.wait (%p2791_p1), %s2725_s11, 4096  }
 0x307   : > { %2877 = vsyncadd (%p2791_p1), %s2725_s11, 4294963200  ;;  %p13_p2 = scmp.ge.s32.totalorder %s2944_s18, 4   ;;  %s5789_s12 = smov %s2884_s13 }
 0x308   : > { %s5790_s13 = smov %s2888_s14  ;;  %s5791_s14 = smov %s2955_s21 }
 0x309   : > { %s5792_s15 = smov %s2944_s18  ;;  %15 = sbr.rel (!%p13_p2) target bundleno = 3 (0x3), region = 70 }
 0x30e   :  { %2730 = vsyncpa [#allocation4], 1 }
 0x30f   :  { %2732 = vsyncpa [#allocation4 + $0x1], 1 }

</bundles_post_ra>
